<compile_context>
chip_gen: v5e
topology: v5e:2x2
jax: 0.10.0
libtpu: 0.0.40
codegen_flags: <defaults>
</compile_context>

<pallas_src>
import functools
import math

import jax
import jax.numpy as jnp
from jax.experimental import pallas as pl
from jax.experimental.pallas import tpu as pltpu

# ----------------------------- small synthetic BERT config -----------------------------
VOCAB = 64
HIDDEN = 32
N_HEADS = 4
HEAD_DIM = HIDDEN // N_HEADS
INTERMEDIATE = 64
N_LAYERS = 2
MAX_POS = 16
N_CLASSES = 3
LN_EPS = 1e-12
OUT_PAD = 128  # lane-dense classifier output slab


# --------------------------------- fused Pallas kernel ----------------------------------
def _fused_kernel(
    ids_ref, mask_ref,
    word_emb, pos_emb, type_emb,
    emb_ln_g, emb_ln_b,
    qkv_w, qkv_b, ao_w, ao_b, ln1_g, ln1_b,
    i_w, i_b, o_w, o_b, ln2_g, ln2_b,
    pooler_w, pooler_b, out_w, out_b,
    logits_ref,
    emb_buf,
    *, batch, seq, n_layers, n_heads, head_dim, hidden,
):
    """Single invocation: embeddings + full encoder + pooler + head for the whole batch."""

    def layer_norm(x, g, b):
        mu = jnp.mean(x, axis=-1, keepdims=True)
        var = jnp.mean(jnp.square(x - mu), axis=-1, keepdims=True)
        return (x - mu) * jax.lax.rsqrt(var + LN_EPS) * g + b

    def gelu(y):  # exact (erf) gelu, as in HF BERT
        return 0.5 * y * (1.0 + jax.lax.erf(y * (1.0 / math.sqrt(2.0))))

    # ---- fused embedding lookup: SMEM token ids index the VMEM word-embedding table ----
    for b in range(batch):
        for s in range(seq):
            tok = ids_ref[b, s]
            emb_buf[pl.ds(b * seq + s, 1), :] = word_emb[pl.ds(tok, 1), :]
    pos = jnp.concatenate([pos_emb[0:seq, :]] * batch, axis=0)          # (B*S, H)
    x = layer_norm(emb_buf[...] + pos + type_emb[0:1, :],
                   emb_ln_g[...], emb_ln_b[...])                        # (B*S, H)

    # additive attention masks built in-kernel from the raw int32 mask: one (1, S) row per batch
    masks = [(1.0 - mask_ref[b:b + 1, :].astype(jnp.float32)) * (-1e9)
             for b in range(batch)]

    scale = 1.0 / math.sqrt(head_dim)

    for li in range(n_layers):
        # fused lane-dense QKV projection over the whole batch
        qkv = jnp.dot(x, qkv_w[li], preferred_element_type=jnp.float32) + qkv_b[li]  # (B*S, 3H)
        q = qkv[:, 0 * hidden:1 * hidden]
        k = qkv[:, 1 * hidden:2 * hidden]
        v = qkv[:, 2 * hidden:3 * hidden]

        ctx_rows = []
        for b in range(batch):
            r0, r1 = b * seq, (b + 1) * seq
            qb, kb, vb = q[r0:r1, :], k[r0:r1, :], v[r0:r1, :]          # (S, H)

            # stacked per-head scores -> one softmax over the (n_heads*S, S) slab
            score_blocks = []
            for h in range(n_heads):
                c0, c1 = h * head_dim, (h + 1) * head_dim
                sh = jax.lax.dot_general(
                    qb[:, c0:c1], kb[:, c0:c1], (((1,), (1,)), ((), ())),
                    preferred_element_type=jnp.float32)                 # (S, S)
                score_blocks.append(sh)
            s_all = jnp.concatenate(score_blocks, axis=0) * scale + masks[b]
            s_all = s_all - jnp.max(s_all, axis=-1, keepdims=True)
            p_all = jnp.exp(s_all)
            p_all = p_all / jnp.sum(p_all, axis=-1, keepdims=True)      # exact divide

            # per-head contexts packed into the columns of a single (S, H) tile
            ctx_cols = []
            for h in range(n_heads):
                c0, c1 = h * head_dim, (h + 1) * head_dim
                ph = p_all[h * seq:(h + 1) * seq, :]                    # (S, S)
                ctx_cols.append(jnp.dot(ph, vb[:, c0:c1],
                                        preferred_element_type=jnp.float32))  # (S, hd)
            ctx_rows.append(jnp.concatenate(ctx_cols, axis=1))          # (S, H)
        ctx = jnp.concatenate(ctx_rows, axis=0)                         # (B*S, H)

        # single attention-output projection for all heads / batches
        attn = jnp.dot(ctx, ao_w[li], preferred_element_type=jnp.float32) + ao_b[li]
        x = layer_norm(attn + x, ln1_g[li], ln1_b[li])

        inter = gelu(jnp.dot(x, i_w[li], preferred_element_type=jnp.float32) + i_b[li])
        ffn = jnp.dot(inter, o_w[li], preferred_element_type=jnp.float32) + o_b[li]
        x = layer_norm(ffn + x, ln2_g[li], ln2_b[li])

    # BERT pooler on each batch's [CLS] token, Dropout(p=0) = identity, classifier head
    # computed into a lane-dense (B, 128) slab.
    cls = jnp.concatenate([x[b * seq:b * seq + 1, :] for b in range(batch)], axis=0)  # (B, H)
    pooled = jnp.tanh(jnp.dot(cls, pooler_w[...],
                              preferred_element_type=jnp.float32) + pooler_b[...])
    logits_ref[...] = jnp.dot(pooled, out_w[...],
                              preferred_element_type=jnp.float32) + out_b[...]        # (B, 128)


# --------------------------------- parameter packing ------------------------------------
def pack_params(params):
    """Stack per-layer weights along a leading layer axis; make small vectors lane-shaped."""
    layers = params["layers"]

    def stack(name):
        return jnp.stack([lp[name] for lp in layers], axis=0)

    def stack_row(name):  # (L, 1, dim)
        return jnp.stack([lp[name][None, :] for lp in layers], axis=0)

    qkv_w = jnp.stack(
        [jnp.concatenate([lp["q_w"], lp["k_w"], lp["v_w"]], axis=1) for lp in layers], axis=0)
    qkv_b = jnp.stack(
        [jnp.concatenate([lp["q_b"], lp["k_b"], lp["v_b"]])[None, :] for lp in layers], axis=0)

    return dict(
        word_emb=params["word_emb"], pos_emb=params["pos_emb"], type_emb=params["type_emb"],
        emb_ln_g=params["emb_ln_g"][None, :], emb_ln_b=params["emb_ln_b"][None, :],
        qkv_w=qkv_w, qkv_b=qkv_b,
        ao_w=stack("ao_w"), ao_b=stack_row("ao_b"),
        ln1_g=stack_row("ln1_g"), ln1_b=stack_row("ln1_b"),
        i_w=stack("i_w"), i_b=stack_row("i_b"),
        o_w=stack("o_w"), o_b=stack_row("o_b"),
        ln2_g=stack_row("ln2_g"), ln2_b=stack_row("ln2_b"),
        pooler_w=params["pooler_w"], pooler_b=params["pooler_b"][None, :],
        out_w=jnp.pad(params["out_w"], ((0, 0), (0, OUT_PAD - N_CLASSES))),
        out_b=jnp.pad(params["out_b"], (0, OUT_PAD - N_CLASSES))[None, :],
    )


_WEIGHT_ORDER = [
    "word_emb", "pos_emb", "type_emb",
    "emb_ln_g", "emb_ln_b",
    "qkv_w", "qkv_b", "ao_w", "ao_b", "ln1_g", "ln1_b",
    "i_w", "i_b", "o_w", "o_b", "ln2_g", "ln2_b",
    "pooler_w", "pooler_b", "out_w", "out_b",
]


# --------------------------------------- forward ----------------------------------------
def sentiment_classifier(params, input_ids, attention_mask):
    """Mirrors SentimentClassifier.forward: BERT -> pooled [CLS] -> Dropout(p=0) -> Linear."""
    B, S = input_ids.shape

    packed = pack_params(params)
    weights = [packed[n] for n in _WEIGHT_ORDER]

    kernel = functools.partial(
        _fused_kernel,
        batch=B, seq=S, n_layers=N_LAYERS, n_heads=N_HEADS,
        head_dim=HEAD_DIM, hidden=HIDDEN)

    in_specs = (
        [pl.BlockSpec(memory_space=pltpu.MemorySpace.SMEM)]     # input_ids (scalar gather index)
        + [pl.BlockSpec(memory_space=pltpu.MemorySpace.VMEM)]   # raw int32 attention_mask
        + [pl.BlockSpec(memory_space=pltpu.MemorySpace.VMEM) for _ in weights]
    )

    logits_pad = pl.pallas_call(
        kernel,
        out_shape=jax.ShapeDtypeStruct((B, OUT_PAD), jnp.float32),
        in_specs=in_specs,
        out_specs=pl.BlockSpec(memory_space=pltpu.MemorySpace.VMEM),
        scratch_shapes=[pltpu.VMEM((B * S, HIDDEN), jnp.float32)],   # in-kernel gather buffer
    )(input_ids.astype(jnp.int32), attention_mask.astype(jnp.int32), *weights)

    return logits_pad[:, :N_CLASSES]


# ----------------------------- pure-JAX reference (for check) ---------------------------
def reference_forward(params, input_ids, attention_mask):
    B, S = input_ids.shape
    word = jnp.take(params["word_emb"], input_ids, axis=0)
    x = word + params["pos_emb"][:S][None] + params["type_emb"][0][None, None, :]

    def ln(x, g, b):
        mu = x.mean(-1, keepdims=True)
        var = ((x - mu) ** 2).mean(-1, keepdims=True)
        return (x - mu) / jnp.sqrt(var + LN_EPS) * g + b

    x = ln(x, params["emb_ln_g"], params["emb_ln_b"])
    mask = (1.0 - attention_mask.astype(jnp.float32)) * -1e9

    for p in params["layers"]:
        q = x @ p["q_w"] + p["q_b"]
        k = x @ p["k_w"] + p["k_b"]
        v = x @ p["v_w"] + p["v_b"]

        def split(t):
            return t.reshape(B, S, N_HEADS, HEAD_DIM).transpose(0, 2, 1, 3)

        qh, kh, vh = split(q), split(k), split(v)
        s = jnp.einsum("bhqd,bhkd->bhqk", qh, kh) / math.sqrt(HEAD_DIM)
        s = s + mask[:, None, None, :]
        a = jax.nn.softmax(s, axis=-1)
        ctx = jnp.einsum("bhqk,bhkd->bhqd", a, vh).transpose(0, 2, 1, 3).reshape(B, S, HIDDEN)
        attn = ctx @ p["ao_w"] + p["ao_b"]
        x = ln(attn + x, p["ln1_g"], p["ln1_b"])
        inter = x @ p["i_w"] + p["i_b"]
        inter = 0.5 * inter * (1.0 + jax.lax.erf(inter / math.sqrt(2.0)))
        ffn = inter @ p["o_w"] + p["o_b"]
        x = ln(ffn + x, p["ln2_g"], p["ln2_b"])

    pooled = jnp.tanh(x[:, 0, :] @ params["pooler_w"] + params["pooler_b"])
    return pooled @ params["out_w"] + params["out_b"]


# --------------------------------- deterministic init -----------------------------------
def init_params(key):
    def dense(k, fan_in, fan_out):
        return (
            jax.random.normal(k, (fan_in, fan_out), jnp.float32) * 0.02,
            jnp.zeros((fan_out,), jnp.float32),
        )

    keys = jax.random.split(key, 4 + N_LAYERS)
    params = {
        "word_emb": jax.random.normal(keys[0], (VOCAB, HIDDEN), jnp.float32) * 0.02,
        "pos_emb": jax.random.normal(keys[1], (MAX_POS, HIDDEN), jnp.float32) * 0.02,
        "type_emb": jax.random.normal(keys[2], (2, HIDDEN), jnp.float32) * 0.02,
        "emb_ln_g": jnp.ones((HIDDEN,), jnp.float32),
        "emb_ln_b": jnp.zeros((HIDDEN,), jnp.float32),
        "layers": [],
    }
    for li in range(N_LAYERS):
        lk = jax.random.split(keys[4 + li], 6)
        qw, qb = dense(lk[0], HIDDEN, HIDDEN)
        kw, kb = dense(lk[1], HIDDEN, HIDDEN)
        vw, vb = dense(lk[2], HIDDEN, HIDDEN)
        aow, aob = dense(lk[3], HIDDEN, HIDDEN)
        iw, ib = dense(lk[4], HIDDEN, INTERMEDIATE)
        ow, ob = dense(lk[5], INTERMEDIATE, HIDDEN)
        params["layers"].append(
            {
                "q_w": qw, "q_b": qb, "k_w": kw, "k_b": kb, "v_w": vw, "v_b": vb,
                "ao_w": aow, "ao_b": aob,
                "ln1_g": jnp.ones((HIDDEN,), jnp.float32),
                "ln1_b": jnp.zeros((HIDDEN,), jnp.float32),
                "i_w": iw, "i_b": ib, "o_w": ow, "o_b": ob,
                "ln2_g": jnp.ones((HIDDEN,), jnp.float32),
                "ln2_b": jnp.zeros((HIDDEN,), jnp.float32),
            }
        )
    pk = jax.random.split(keys[3], 3)
    params["pooler_w"], params["pooler_b"] = dense(pk[1], HIDDEN, HIDDEN)
    params["out_w"], params["out_b"] = dense(pk[2], HIDDEN, N_CLASSES)
    return params


# --------------------------------------- main -------------------------------------------
if __name__ == "__main__":
    B, S = 2, 8
    key = jax.random.PRNGKey(0)
    pkey, ikey = jax.random.split(key)

    params = init_params(pkey)
    input_ids = jax.random.randint(ikey, (B, S), 0, VOCAB, dtype=jnp.int32)
    attention_mask = jnp.array(
        [[1, 1, 1, 1, 1, 1, 1, 1],
         [1, 1, 1, 1, 1, 1, 0, 0]], dtype=jnp.int32
    )

    logits = jax.jit(sentiment_classifier)(params, input_ids, attention_mask)
    logits = jax.block_until_ready(logits)

    ref = reference_forward(params, input_ids, attention_mask)
    assert logits.shape == (B, N_CLASSES)
    assert bool(jnp.all(jnp.isfinite(logits)))
    # exact softmax divide now -> tight tolerance (only f32 accumulation-order / rsqrt deltas)
    assert bool(jnp.allclose(logits, ref, atol=1e-3, rtol=1e-3))
    print("KERNEL_OK")
</pallas_src>

<mosaic_0001>
module attributes {stable_mosaic.version = 11 : i64} {
  func.func @_fused_kernel(%arg0: memref<2x8xi32, #tpu.memory_space<smem>>, %arg1: memref<2x8xi32, #tpu.memory_space<vmem>>, %arg2: memref<64x32xf32, #tpu.memory_space<vmem>>, %arg3: memref<16x32xf32, #tpu.memory_space<vmem>>, %arg4: memref<2x32xf32, #tpu.memory_space<vmem>>, %arg5: memref<1x32xf32, #tpu.memory_space<vmem>>, %arg6: memref<1x32xf32, #tpu.memory_space<vmem>>, %arg7: memref<2x32x96xf32, #tpu.memory_space<vmem>>, %arg8: memref<2x1x96xf32, #tpu.memory_space<vmem>>, %arg9: memref<2x32x32xf32, #tpu.memory_space<vmem>>, %arg10: memref<2x1x32xf32, #tpu.memory_space<vmem>>, %arg11: memref<2x1x32xf32, #tpu.memory_space<vmem>>, %arg12: memref<2x1x32xf32, #tpu.memory_space<vmem>>, %arg13: memref<2x32x64xf32, #tpu.memory_space<vmem>>, %arg14: memref<2x1x64xf32, #tpu.memory_space<vmem>>, %arg15: memref<2x64x32xf32, #tpu.memory_space<vmem>>, %arg16: memref<2x1x32xf32, #tpu.memory_space<vmem>>, %arg17: memref<2x1x32xf32, #tpu.memory_space<vmem>>, %arg18: memref<2x1x32xf32, #tpu.memory_space<vmem>>, %arg19: memref<32x32xf32, #tpu.memory_space<vmem>>, %arg20: memref<1x32xf32, #tpu.memory_space<vmem>>, %arg21: memref<32x128xf32, #tpu.memory_space<vmem>>, %arg22: memref<1x128xf32, #tpu.memory_space<vmem>>, %arg23: memref<2x128xf32, #tpu.memory_space<vmem>>, %arg24: memref<16x32xf32, #tpu.memory_space<vmem>>) attributes {dimension_semantics = [], scalar_prefetch = 0 : i64, scratch_operands = 1 : i64, tpu.core_type = #tpu.core_type<tc>} {
    %c0 = arith.constant 0 : index
    %c0_0 = arith.constant 0 : index
    %0 = memref.load %arg0[%c0, %c0_0] : memref<2x8xi32, #tpu.memory_space<smem>>
    %1 = arith.index_cast %0 : i32 to index
    %c0_1 = arith.constant 0 : index
    %2 = vector.load %arg2[%1, %c0_1] : memref<64x32xf32, #tpu.memory_space<vmem>>, vector<1x32xf32>
    %c0_2 = arith.constant 0 : index
    %c0_3 = arith.constant 0 : index
    %3 = vector.load %arg24[%c0_2, %c0_3] : memref<16x32xf32, #tpu.memory_space<vmem>>, vector<1x32xf32>
    tpu.vector_store %arg24[%c0_2, %c0_3], %2 {strides = array<i32>} : memref<16x32xf32, #tpu.memory_space<vmem>>, vector<1x32xf32>,
    %c0_4 = arith.constant 0 : index
    %c1 = arith.constant 1 : index
    %4 = memref.load %arg0[%c0_4, %c1] : memref<2x8xi32, #tpu.memory_space<smem>>
    %5 = arith.index_cast %4 : i32 to index
    %c0_5 = arith.constant 0 : index
    %6 = vector.load %arg2[%5, %c0_5] : memref<64x32xf32, #tpu.memory_space<vmem>>, vector<1x32xf32>
    %c1_6 = arith.constant 1 : index
    %c0_7 = arith.constant 0 : index
    %7 = vector.load %arg24[%c1_6, %c0_7] : memref<16x32xf32, #tpu.memory_space<vmem>>, vector<1x32xf32>
    tpu.vector_store %arg24[%c1_6, %c0_7], %6 {strides = array<i32>} : memref<16x32xf32, #tpu.memory_space<vmem>>, vector<1x32xf32>,
    %c0_8 = arith.constant 0 : index
    %c2 = arith.constant 2 : index
    %8 = memref.load %arg0[%c0_8, %c2] : memref<2x8xi32, #tpu.memory_space<smem>>
    %9 = arith.index_cast %8 : i32 to index
    %c0_9 = arith.constant 0 : index
    %10 = vector.load %arg2[%9, %c0_9] : memref<64x32xf32, #tpu.memory_space<vmem>>, vector<1x32xf32>
    %c2_10 = arith.constant 2 : index
    %c0_11 = arith.constant 0 : index
    %11 = vector.load %arg24[%c2_10, %c0_11] : memref<16x32xf32, #tpu.memory_space<vmem>>, vector<1x32xf32>
    tpu.vector_store %arg24[%c2_10, %c0_11], %10 {strides = array<i32>} : memref<16x32xf32, #tpu.memory_space<vmem>>, vector<1x32xf32>,
    %c0_12 = arith.constant 0 : index
    %c3 = arith.constant 3 : index
    %12 = memref.load %arg0[%c0_12, %c3] : memref<2x8xi32, #tpu.memory_space<smem>>
    %13 = arith.index_cast %12 : i32 to index
    %c0_13 = arith.constant 0 : index
    %14 = vector.load %arg2[%13, %c0_13] : memref<64x32xf32, #tpu.memory_space<vmem>>, vector<1x32xf32>
    %c3_14 = arith.constant 3 : index
    %c0_15 = arith.constant 0 : index
    %15 = vector.load %arg24[%c3_14, %c0_15] : memref<16x32xf32, #tpu.memory_space<vmem>>, vector<1x32xf32>
    tpu.vector_store %arg24[%c3_14, %c0_15], %14 {strides = array<i32>} : memref<16x32xf32, #tpu.memory_space<vmem>>, vector<1x32xf32>,
    %c0_16 = arith.constant 0 : index
    %c4 = arith.constant 4 : index
    %16 = memref.load %arg0[%c0_16, %c4] : memref<2x8xi32, #tpu.memory_space<smem>>
    %17 = arith.index_cast %16 : i32 to index
    %c0_17 = arith.constant 0 : index
    %18 = vector.load %arg2[%17, %c0_17] : memref<64x32xf32, #tpu.memory_space<vmem>>, vector<1x32xf32>
    %c4_18 = arith.constant 4 : index
    %c0_19 = arith.constant 0 : index
    %19 = vector.load %arg24[%c4_18, %c0_19] : memref<16x32xf32, #tpu.memory_space<vmem>>, vector<1x32xf32>
    tpu.vector_store %arg24[%c4_18, %c0_19], %18 {strides = array<i32>} : memref<16x32xf32, #tpu.memory_space<vmem>>, vector<1x32xf32>,
    %c0_20 = arith.constant 0 : index
    %c5 = arith.constant 5 : index
    %20 = memref.load %arg0[%c0_20, %c5] : memref<2x8xi32, #tpu.memory_space<smem>>
    %21 = arith.index_cast %20 : i32 to index
    %c0_21 = arith.constant 0 : index
    %22 = vector.load %arg2[%21, %c0_21] : memref<64x32xf32, #tpu.memory_space<vmem>>, vector<1x32xf32>
    %c5_22 = arith.constant 5 : index
    %c0_23 = arith.constant 0 : index
    %23 = vector.load %arg24[%c5_22, %c0_23] : memref<16x32xf32, #tpu.memory_space<vmem>>, vector<1x32xf32>
    tpu.vector_store %arg24[%c5_22, %c0_23], %22 {strides = array<i32>} : memref<16x32xf32, #tpu.memory_space<vmem>>, vector<1x32xf32>,
    %c0_24 = arith.constant 0 : index
    %c6 = arith.constant 6 : index
    %24 = memref.load %arg0[%c0_24, %c6] : memref<2x8xi32, #tpu.memory_space<smem>>
    %25 = arith.index_cast %24 : i32 to index
    %c0_25 = arith.constant 0 : index
    %26 = vector.load %arg2[%25, %c0_25] : memref<64x32xf32, #tpu.memory_space<vmem>>, vector<1x32xf32>
    %c6_26 = arith.constant 6 : index
    %c0_27 = arith.constant 0 : index
    %27 = vector.load %arg24[%c6_26, %c0_27] : memref<16x32xf32, #tpu.memory_space<vmem>>, vector<1x32xf32>
    tpu.vector_store %arg24[%c6_26, %c0_27], %26 {strides = array<i32>} : memref<16x32xf32, #tpu.memory_space<vmem>>, vector<1x32xf32>,
    %c0_28 = arith.constant 0 : index
    %c7 = arith.constant 7 : index
    %28 = memref.load %arg0[%c0_28, %c7] : memref<2x8xi32, #tpu.memory_space<smem>>
    %29 = arith.index_cast %28 : i32 to index
    %c0_29 = arith.constant 0 : index
    %30 = vector.load %arg2[%29, %c0_29] : memref<64x32xf32, #tpu.memory_space<vmem>>, vector<1x32xf32>
    %c7_30 = arith.constant 7 : index
    %c0_31 = arith.constant 0 : index
    %31 = vector.load %arg24[%c7_30, %c0_31] : memref<16x32xf32, #tpu.memory_space<vmem>>, vector<1x32xf32>
    tpu.vector_store %arg24[%c7_30, %c0_31], %30 {strides = array<i32>} : memref<16x32xf32, #tpu.memory_space<vmem>>, vector<1x32xf32>,
    %c1_32 = arith.constant 1 : index
    %c0_33 = arith.constant 0 : index
    %32 = memref.load %arg0[%c1_32, %c0_33] : memref<2x8xi32, #tpu.memory_space<smem>>
    %33 = arith.index_cast %32 : i32 to index
    %c0_34 = arith.constant 0 : index
    %34 = vector.load %arg2[%33, %c0_34] : memref<64x32xf32, #tpu.memory_space<vmem>>, vector<1x32xf32>
    %c8 = arith.constant 8 : index
    %c0_35 = arith.constant 0 : index
    %35 = vector.load %arg24[%c8, %c0_35] : memref<16x32xf32, #tpu.memory_space<vmem>>, vector<1x32xf32>
    tpu.vector_store %arg24[%c8, %c0_35], %34 {strides = array<i32>} : memref<16x32xf32, #tpu.memory_space<vmem>>, vector<1x32xf32>,
    %c1_36 = arith.constant 1 : index
    %c1_37 = arith.constant 1 : index
    %36 = memref.load %arg0[%c1_36, %c1_37] : memref<2x8xi32, #tpu.memory_space<smem>>
    %37 = arith.index_cast %36 : i32 to index
    %c0_38 = arith.constant 0 : index
    %38 = vector.load %arg2[%37, %c0_38] : memref<64x32xf32, #tpu.memory_space<vmem>>, vector<1x32xf32>
    %c9 = arith.constant 9 : index
    %c0_39 = arith.constant 0 : index
    %39 = vector.load %arg24[%c9, %c0_39] : memref<16x32xf32, #tpu.memory_space<vmem>>, vector<1x32xf32>
    tpu.vector_store %arg24[%c9, %c0_39], %38 {strides = array<i32>} : memref<16x32xf32, #tpu.memory_space<vmem>>, vector<1x32xf32>,
    %c1_40 = arith.constant 1 : index
    %c2_41 = arith.constant 2 : index
    %40 = memref.load %arg0[%c1_40, %c2_41] : memref<2x8xi32, #tpu.memory_space<smem>>
    %41 = arith.index_cast %40 : i32 to index
    %c0_42 = arith.constant 0 : index
    %42 = vector.load %arg2[%41, %c0_42] : memref<64x32xf32, #tpu.memory_space<vmem>>, vector<1x32xf32>
    %c10 = arith.constant 10 : index
    %c0_43 = arith.constant 0 : index
    %43 = vector.load %arg24[%c10, %c0_43] : memref<16x32xf32, #tpu.memory_space<vmem>>, vector<1x32xf32>
    tpu.vector_store %arg24[%c10, %c0_43], %42 {strides = array<i32>} : memref<16x32xf32, #tpu.memory_space<vmem>>, vector<1x32xf32>,
    %c1_44 = arith.constant 1 : index
    %c3_45 = arith.constant 3 : index
    %44 = memref.load %arg0[%c1_44, %c3_45] : memref<2x8xi32, #tpu.memory_space<smem>>
    %45 = arith.index_cast %44 : i32 to index
    %c0_46 = arith.constant 0 : index
    %46 = vector.load %arg2[%45, %c0_46] : memref<64x32xf32, #tpu.memory_space<vmem>>, vector<1x32xf32>
    %c11 = arith.constant 11 : index
    %c0_47 = arith.constant 0 : index
    %47 = vector.load %arg24[%c11, %c0_47] : memref<16x32xf32, #tpu.memory_space<vmem>>, vector<1x32xf32>
    tpu.vector_store %arg24[%c11, %c0_47], %46 {strides = array<i32>} : memref<16x32xf32, #tpu.memory_space<vmem>>, vector<1x32xf32>,
    %c1_48 = arith.constant 1 : index
    %c4_49 = arith.constant 4 : index
    %48 = memref.load %arg0[%c1_48, %c4_49] : memref<2x8xi32, #tpu.memory_space<smem>>
    %49 = arith.index_cast %48 : i32 to index
    %c0_50 = arith.constant 0 : index
    %50 = vector.load %arg2[%49, %c0_50] : memref<64x32xf32, #tpu.memory_space<vmem>>, vector<1x32xf32>
    %c12 = arith.constant 12 : index
    %c0_51 = arith.constant 0 : index
    %51 = vector.load %arg24[%c12, %c0_51] : memref<16x32xf32, #tpu.memory_space<vmem>>, vector<1x32xf32>
    tpu.vector_store %arg24[%c12, %c0_51], %50 {strides = array<i32>} : memref<16x32xf32, #tpu.memory_space<vmem>>, vector<1x32xf32>,
    %c1_52 = arith.constant 1 : index
    %c5_53 = arith.constant 5 : index
    %52 = memref.load %arg0[%c1_52, %c5_53] : memref<2x8xi32, #tpu.memory_space<smem>>
    %53 = arith.index_cast %52 : i32 to index
    %c0_54 = arith.constant 0 : index
    %54 = vector.load %arg2[%53, %c0_54] : memref<64x32xf32, #tpu.memory_space<vmem>>, vector<1x32xf32>
    %c13 = arith.constant 13 : index
    %c0_55 = arith.constant 0 : index
    %55 = vector.load %arg24[%c13, %c0_55] : memref<16x32xf32, #tpu.memory_space<vmem>>, vector<1x32xf32>
    tpu.vector_store %arg24[%c13, %c0_55], %54 {strides = array<i32>} : memref<16x32xf32, #tpu.memory_space<vmem>>, vector<1x32xf32>,
    %c1_56 = arith.constant 1 : index
    %c6_57 = arith.constant 6 : index
    %56 = memref.load %arg0[%c1_56, %c6_57] : memref<2x8xi32, #tpu.memory_space<smem>>
    %57 = arith.index_cast %56 : i32 to index
    %c0_58 = arith.constant 0 : index
    %58 = vector.load %arg2[%57, %c0_58] : memref<64x32xf32, #tpu.memory_space<vmem>>, vector<1x32xf32>
    %c14 = arith.constant 14 : index
    %c0_59 = arith.constant 0 : index
    %59 = vector.load %arg24[%c14, %c0_59] : memref<16x32xf32, #tpu.memory_space<vmem>>, vector<1x32xf32>
    tpu.vector_store %arg24[%c14, %c0_59], %58 {strides = array<i32>} : memref<16x32xf32, #tpu.memory_space<vmem>>, vector<1x32xf32>,
    %c1_60 = arith.constant 1 : index
    %c7_61 = arith.constant 7 : index
    %60 = memref.load %arg0[%c1_60, %c7_61] : memref<2x8xi32, #tpu.memory_space<smem>>
    %61 = arith.index_cast %60 : i32 to index
    %c0_62 = arith.constant 0 : index
    %62 = vector.load %arg2[%61, %c0_62] : memref<64x32xf32, #tpu.memory_space<vmem>>, vector<1x32xf32>
    %c15 = arith.constant 15 : index
    %c0_63 = arith.constant 0 : index
    %63 = vector.load %arg24[%c15, %c0_63] : memref<16x32xf32, #tpu.memory_space<vmem>>, vector<1x32xf32>
    tpu.vector_store %arg24[%c15, %c0_63], %62 {strides = array<i32>} : memref<16x32xf32, #tpu.memory_space<vmem>>, vector<1x32xf32>,
    %c0_64 = arith.constant 0 : index
    %c0_65 = arith.constant 0 : index
    %64 = vector.load %arg3[%c0_64, %c0_65] : memref<16x32xf32, #tpu.memory_space<vmem>>, vector<8x32xf32>
    %65 = tpu.concatenate %64, %64 in 0 : vector<8x32xf32>, vector<8x32xf32> -> vector<16x32xf32>
    %c0_66 = arith.constant 0 : index
    %c0_67 = arith.constant 0 : index
    %66 = vector.load %arg24[%c0_66, %c0_67] : memref<16x32xf32, #tpu.memory_space<vmem>>, vector<16x32xf32>
    %67 = arith.addf %66, %65 : vector<16x32xf32>
    %c0_68 = arith.constant 0 : index
    %c0_69 = arith.constant 0 : index
    %68 = vector.load %arg4[%c0_68, %c0_69] : memref<2x32xf32, #tpu.memory_space<vmem>>, vector<1x32xf32>
    %69 = vector.broadcast %68 : vector<1x32xf32> to vector<16x32xf32>
    %70 = arith.addf %67, %69 : vector<16x32xf32>
    %c0_70 = arith.constant 0 : index
    %c0_71 = arith.constant 0 : index
    %71 = vector.load %arg5[%c0_70, %c0_71] : memref<1x32xf32, #tpu.memory_space<vmem>>, vector<1x32xf32>
    %c0_72 = arith.constant 0 : index
    %c0_73 = arith.constant 0 : index
    %72 = vector.load %arg6[%c0_72, %c0_73] : memref<1x32xf32, #tpu.memory_space<vmem>>, vector<1x32xf32>
    %cst = arith.constant dense<0.000000e+00> : vector<16xf32>
    %73 = vector.multi_reduction <add>, %70, %cst [1] : vector<16x32xf32> to vector<16xf32>
    %74 = vector.shape_cast %73 : vector<16xf32> to vector<16x1xf32>
    %cst_74 = arith.constant 3.200000e+01 : f32
    %75 = vector.broadcast %cst_74 : f32 to vector<16x1xf32>
    %76 = arith.divf %74, %75 : vector<16x1xf32>
    %77 = vector.broadcast %76 : vector<16x1xf32> to vector<16x32xf32>
    %78 = arith.subf %70, %77 : vector<16x32xf32>
    %79 = arith.mulf %78, %78 : vector<16x32xf32>
    %cst_75 = arith.constant dense<0.000000e+00> : vector<16xf32>
    %80 = vector.multi_reduction <add>, %79, %cst_75 [1] : vector<16x32xf32> to vector<16xf32>
    %81 = vector.shape_cast %80 : vector<16xf32> to vector<16x1xf32>
    %cst_76 = arith.constant 3.200000e+01 : f32
    %82 = vector.broadcast %cst_76 : f32 to vector<16x1xf32>
    %83 = arith.divf %81, %82 : vector<16x1xf32>
    %84 = vector.broadcast %76 : vector<16x1xf32> to vector<16x32xf32>
    %85 = arith.subf %70, %84 : vector<16x32xf32>
    %cst_77 = arith.constant 9.99999996E-13 : f32
    %86 = vector.broadcast %cst_77 : f32 to vector<16x1xf32>
    %87 = arith.addf %83, %86 : vector<16x1xf32>
    %88 = math.rsqrt %87 : vector<16x1xf32>
    %89 = vector.broadcast %88 : vector<16x1xf32> to vector<16x32xf32>
    %90 = arith.mulf %85, %89 : vector<16x32xf32>
    %91 = vector.broadcast %71 : vector<1x32xf32> to vector<16x32xf32>
    %92 = arith.mulf %90, %91 : vector<16x32xf32>
    %93 = vector.broadcast %72 : vector<1x32xf32> to vector<16x32xf32>
    %94 = arith.addf %92, %93 : vector<16x32xf32>
    %c0_78 = arith.constant 0 : index
    %c0_79 = arith.constant 0 : index
    %95 = vector.load %arg1[%c0_78, %c0_79] : memref<2x8xi32, #tpu.memory_space<vmem>>, vector<1x8xi32>
    %96 = arith.sitofp %95 : vector<1x8xi32> to vector<1x8xf32>
    %cst_80 = arith.constant 1.000000e+00 : f32
    %97 = vector.broadcast %cst_80 : f32 to vector<1x8xf32>
    %98 = arith.subf %97, %96 : vector<1x8xf32>
    %cst_81 = arith.constant -1.000000e+09 : f32
    %99 = vector.broadcast %cst_81 : f32 to vector<1x8xf32>
    %100 = arith.mulf %98, %99 : vector<1x8xf32>
    %c1_82 = arith.constant 1 : index
    %c0_83 = arith.constant 0 : index
    %101 = vector.load %arg1[%c1_82, %c0_83] : memref<2x8xi32, #tpu.memory_space<vmem>>, vector<1x8xi32>
    %102 = arith.sitofp %101 : vector<1x8xi32> to vector<1x8xf32>
    %cst_84 = arith.constant 1.000000e+00 : f32
    %103 = vector.broadcast %cst_84 : f32 to vector<1x8xf32>
    %104 = arith.subf %103, %102 : vector<1x8xf32>
    %cst_85 = arith.constant -1.000000e+09 : f32
    %105 = vector.broadcast %cst_85 : f32 to vector<1x8xf32>
    %106 = arith.mulf %104, %105 : vector<1x8xf32>
    %c0_86 = arith.constant 0 : index
    %c0_87 = arith.constant 0 : index
    %c0_88 = arith.constant 0 : index
    %107 = vector.load %arg7[%c0_86, %c0_87, %c0_88] : memref<2x32x96xf32, #tpu.memory_space<vmem>>, vector<1x32x96xf32>
    %108 = vector.shape_cast %107 : vector<1x32x96xf32> to vector<32x96xf32>
    %cst_89 = arith.constant dense<0.000000e+00> : vector<16x96xf32>
    %109 = tpu.matmul %94, %108, %cst_89 {dimension_numbers = #tpu.dot_dimension_numbers<[1], [0], [0], [1], [0, 0, 1, 1], [], []>} : vector<16x32xf32>, vector<32x96xf32>, vector<16x96xf32> -> vector<16x96xf32>
    %c0_90 = arith.constant 0 : index
    %c0_91 = arith.constant 0 : index
    %c0_92 = arith.constant 0 : index
    %110 = vector.load %arg8[%c0_90, %c0_91, %c0_92] : memref<2x1x96xf32, #tpu.memory_space<vmem>>, vector<1x1x96xf32>
    %111 = vector.shape_cast %110 : vector<1x1x96xf32> to vector<1x96xf32>
    %112 = vector.broadcast %111 : vector<1x96xf32> to vector<16x96xf32>
    %113 = arith.addf %109, %112 : vector<16x96xf32>
    %114 = vector.extract_strided_slice %113 {offsets = [0, 0], sizes = [16, 32], strides = [1, 1]} : vector<16x96xf32> to vector<16x32xf32>
    %115 = vector.extract_strided_slice %113 {offsets = [0, 32], sizes = [16, 32], strides = [1, 1]} : vector<16x96xf32> to vector<16x32xf32>
    %116 = vector.extract_strided_slice %113 {offsets = [0, 64], sizes = [16, 32], strides = [1, 1]} : vector<16x96xf32> to vector<16x32xf32>
    %117 = vector.extract_strided_slice %114 {offsets = [0, 0], sizes = [8, 32], strides = [1, 1]} : vector<16x32xf32> to vector<8x32xf32>
    %118 = vector.extract_strided_slice %115 {offsets = [0, 0], sizes = [8, 32], strides = [1, 1]} : vector<16x32xf32> to vector<8x32xf32>
    %119 = vector.extract_strided_slice %116 {offsets = [0, 0], sizes = [8, 32], strides = [1, 1]} : vector<16x32xf32> to vector<8x32xf32>
    %120 = vector.extract_strided_slice %117 {offsets = [0, 0], sizes = [8, 8], strides = [1, 1]} : vector<8x32xf32> to vector<8x8xf32>
    %121 = vector.extract_strided_slice %118 {offsets = [0, 0], sizes = [8, 8], strides = [1, 1]} : vector<8x32xf32> to vector<8x8xf32>
    %cst_93 = arith.constant dense<0.000000e+00> : vector<8x8xf32>
    %122 = tpu.matmul %120, %121, %cst_93 {dimension_numbers = #tpu.dot_dimension_numbers<[1], [1], [0], [0], [0, 0, 1, 0], [], []>} : vector<8x8xf32>, vector<8x8xf32>, vector<8x8xf32> -> vector<8x8xf32>
    %123 = vector.extract_strided_slice %117 {offsets = [0, 8], sizes = [8, 8], strides = [1, 1]} : vector<8x32xf32> to vector<8x8xf32>
    %124 = vector.extract_strided_slice %118 {offsets = [0, 8], sizes = [8, 8], strides = [1, 1]} : vector<8x32xf32> to vector<8x8xf32>
    %cst_94 = arith.constant dense<0.000000e+00> : vector<8x8xf32>
    %125 = tpu.matmul %123, %124, %cst_94 {dimension_numbers = #tpu.dot_dimension_numbers<[1], [1], [0], [0], [0, 0, 1, 0], [], []>} : vector<8x8xf32>, vector<8x8xf32>, vector<8x8xf32> -> vector<8x8xf32>
    %126 = vector.extract_strided_slice %117 {offsets = [0, 16], sizes = [8, 8], strides = [1, 1]} : vector<8x32xf32> to vector<8x8xf32>
    %127 = vector.extract_strided_slice %118 {offsets = [0, 16], sizes = [8, 8], strides = [1, 1]} : vector<8x32xf32> to vector<8x8xf32>
    %cst_95 = arith.constant dense<0.000000e+00> : vector<8x8xf32>
    %128 = tpu.matmul %126, %127, %cst_95 {dimension_numbers = #tpu.dot_dimension_numbers<[1], [1], [0], [0], [0, 0, 1, 0], [], []>} : vector<8x8xf32>, vector<8x8xf32>, vector<8x8xf32> -> vector<8x8xf32>
    %129 = vector.extract_strided_slice %117 {offsets = [0, 24], sizes = [8, 8], strides = [1, 1]} : vector<8x32xf32> to vector<8x8xf32>
    %130 = vector.extract_strided_slice %118 {offsets = [0, 24], sizes = [8, 8], strides = [1, 1]} : vector<8x32xf32> to vector<8x8xf32>
    %cst_96 = arith.constant dense<0.000000e+00> : vector<8x8xf32>
    %131 = tpu.matmul %129, %130, %cst_96 {dimension_numbers = #tpu.dot_dimension_numbers<[1], [1], [0], [0], [0, 0, 1, 0], [], []>} : vector<8x8xf32>, vector<8x8xf32>, vector<8x8xf32> -> vector<8x8xf32>
    %132 = tpu.concatenate %122, %125, %128, %131 in 0 : vector<8x8xf32>, vector<8x8xf32>, vector<8x8xf32>, vector<8x8xf32> -> vector<32x8xf32>
    %cst_97 = arith.constant 0.353553385 : f32
    %133 = vector.broadcast %cst_97 : f32 to vector<32x8xf32>
    %134 = arith.mulf %132, %133 : vector<32x8xf32>
    %135 = vector.broadcast %100 : vector<1x8xf32> to vector<32x8xf32>
    %136 = arith.addf %134, %135 : vector<32x8xf32>
    %cst_98 = arith.constant dense<0xFF800000> : vector<32xf32>
    %137 = vector.multi_reduction <maximumf>, %136, %cst_98 [1] : vector<32x8xf32> to vector<32xf32>
    %138 = vector.shape_cast %137 : vector<32xf32> to vector<32x1xf32>
    %139 = vector.broadcast %138 : vector<32x1xf32> to vector<32x8xf32>
    %140 = arith.subf %136, %139 : vector<32x8xf32>
    %141 = math.exp %140 : vector<32x8xf32>
    %cst_99 = arith.constant dense<0.000000e+00> : vector<32xf32>
    %142 = vector.multi_reduction <add>, %141, %cst_99 [1] : vector<32x8xf32> to vector<32xf32>
    %143 = vector.shape_cast %142 : vector<32xf32> to vector<32x1xf32>
    %144 = vector.broadcast %143 : vector<32x1xf32> to vector<32x8xf32>
    %145 = arith.divf %141, %144 : vector<32x8xf32>
    %146 = vector.extract_strided_slice %145 {offsets = [0, 0], sizes = [8, 8], strides = [1, 1]} : vector<32x8xf32> to vector<8x8xf32>
    %147 = vector.extract_strided_slice %119 {offsets = [0, 0], sizes = [8, 8], strides = [1, 1]} : vector<8x32xf32> to vector<8x8xf32>
    %cst_100 = arith.constant dense<0.000000e+00> : vector<8x8xf32>
    %148 = tpu.matmul %146, %147, %cst_100 {dimension_numbers = #tpu.dot_dimension_numbers<[1], [0], [0], [1], [0, 0, 1, 1], [], []>} : vector<8x8xf32>, vector<8x8xf32>, vector<8x8xf32> -> vector<8x8xf32>
    %149 = vector.extract_strided_slice %145 {offsets = [8, 0], sizes = [8, 8], strides = [1, 1]} : vector<32x8xf32> to vector<8x8xf32>
    %150 = vector.extract_strided_slice %119 {offsets = [0, 8], sizes = [8, 8], strides = [1, 1]} : vector<8x32xf32> to vector<8x8xf32>
    %cst_101 = arith.constant dense<0.000000e+00> : vector<8x8xf32>
    %151 = tpu.matmul %149, %150, %cst_101 {dimension_numbers = #tpu.dot_dimension_numbers<[1], [0], [0], [1], [0, 0, 1, 1], [], []>} : vector<8x8xf32>, vector<8x8xf32>, vector<8x8xf32> -> vector<8x8xf32>
    %152 = vector.extract_strided_slice %145 {offsets = [16, 0], sizes = [8, 8], strides = [1, 1]} : vector<32x8xf32> to vector<8x8xf32>
    %153 = vector.extract_strided_slice %119 {offsets = [0, 16], sizes = [8, 8], strides = [1, 1]} : vector<8x32xf32> to vector<8x8xf32>
    %cst_102 = arith.constant dense<0.000000e+00> : vector<8x8xf32>
    %154 = tpu.matmul %152, %153, %cst_102 {dimension_numbers = #tpu.dot_dimension_numbers<[1], [0], [0], [1], [0, 0, 1, 1], [], []>} : vector<8x8xf32>, vector<8x8xf32>, vector<8x8xf32> -> vector<8x8xf32>
    %155 = vector.extract_strided_slice %145 {offsets = [24, 0], sizes = [8, 8], strides = [1, 1]} : vector<32x8xf32> to vector<8x8xf32>
    %156 = vector.extract_strided_slice %119 {offsets = [0, 24], sizes = [8, 8], strides = [1, 1]} : vector<8x32xf32> to vector<8x8xf32>
    %cst_103 = arith.constant dense<0.000000e+00> : vector<8x8xf32>
    %157 = tpu.matmul %155, %156, %cst_103 {dimension_numbers = #tpu.dot_dimension_numbers<[1], [0], [0], [1], [0, 0, 1, 1], [], []>} : vector<8x8xf32>, vector<8x8xf32>, vector<8x8xf32> -> vector<8x8xf32>
    %158 = tpu.concatenate %148, %151, %154, %157 in 1 : vector<8x8xf32>, vector<8x8xf32>, vector<8x8xf32>, vector<8x8xf32> -> vector<8x32xf32>
    %159 = vector.extract_strided_slice %114 {offsets = [8, 0], sizes = [8, 32], strides = [1, 1]} : vector<16x32xf32> to vector<8x32xf32>
    %160 = vector.extract_strided_slice %115 {offsets = [8, 0], sizes = [8, 32], strides = [1, 1]} : vector<16x32xf32> to vector<8x32xf32>
    %161 = vector.extract_strided_slice %116 {offsets = [8, 0], sizes = [8, 32], strides = [1, 1]} : vector<16x32xf32> to vector<8x32xf32>
    %162 = vector.extract_strided_slice %159 {offsets = [0, 0], sizes = [8, 8], strides = [1, 1]} : vector<8x32xf32> to vector<8x8xf32>
    %163 = vector.extract_strided_slice %160 {offsets = [0, 0], sizes = [8, 8], strides = [1, 1]} : vector<8x32xf32> to vector<8x8xf32>
    %cst_104 = arith.constant dense<0.000000e+00> : vector<8x8xf32>
    %164 = tpu.matmul %162, %163, %cst_104 {dimension_numbers = #tpu.dot_dimension_numbers<[1], [1], [0], [0], [0, 0, 1, 0], [], []>} : vector<8x8xf32>, vector<8x8xf32>, vector<8x8xf32> -> vector<8x8xf32>
    %165 = vector.extract_strided_slice %159 {offsets = [0, 8], sizes = [8, 8], strides = [1, 1]} : vector<8x32xf32> to vector<8x8xf32>
    %166 = vector.extract_strided_slice %160 {offsets = [0, 8], sizes = [8, 8], strides = [1, 1]} : vector<8x32xf32> to vector<8x8xf32>
    %cst_105 = arith.constant dense<0.000000e+00> : vector<8x8xf32>
    %167 = tpu.matmul %165, %166, %cst_105 {dimension_numbers = #tpu.dot_dimension_numbers<[1], [1], [0], [0], [0, 0, 1, 0], [], []>} : vector<8x8xf32>, vector<8x8xf32>, vector<8x8xf32> -> vector<8x8xf32>
    %168 = vector.extract_strided_slice %159 {offsets = [0, 16], sizes = [8, 8], strides = [1, 1]} : vector<8x32xf32> to vector<8x8xf32>
    %169 = vector.extract_strided_slice %160 {offsets = [0, 16], sizes = [8, 8], strides = [1, 1]} : vector<8x32xf32> to vector<8x8xf32>
    %cst_106 = arith.constant dense<0.000000e+00> : vector<8x8xf32>
    %170 = tpu.matmul %168, %169, %cst_106 {dimension_numbers = #tpu.dot_dimension_numbers<[1], [1], [0], [0], [0, 0, 1, 0], [], []>} : vector<8x8xf32>, vector<8x8xf32>, vector<8x8xf32> -> vector<8x8xf32>
    %171 = vector.extract_strided_slice %159 {offsets = [0, 24], sizes = [8, 8], strides = [1, 1]} : vector<8x32xf32> to vector<8x8xf32>
    %172 = vector.extract_strided_slice %160 {offsets = [0, 24], sizes = [8, 8], strides = [1, 1]} : vector<8x32xf32> to vector<8x8xf32>
    %cst_107 = arith.constant dense<0.000000e+00> : vector<8x8xf32>
    %173 = tpu.matmul %171, %172, %cst_107 {dimension_numbers = #tpu.dot_dimension_numbers<[1], [1], [0], [0], [0, 0, 1, 0], [], []>} : vector<8x8xf32>, vector<8x8xf32>, vector<8x8xf32> -> vector<8x8xf32>
    %174 = tpu.concatenate %164, %167, %170, %173 in 0 : vector<8x8xf32>, vector<8x8xf32>, vector<8x8xf32>, vector<8x8xf32> -> vector<32x8xf32>
    %cst_108 = arith.constant 0.353553385 : f32
    %175 = vector.broadcast %cst_108 : f32 to vector<32x8xf32>
    %176 = arith.mulf %174, %175 : vector<32x8xf32>
    %177 = vector.broadcast %106 : vector<1x8xf32> to vector<32x8xf32>
    %178 = arith.addf %176, %177 : vector<32x8xf32>
    %cst_109 = arith.constant dense<0xFF800000> : vector<32xf32>
    %179 = vector.multi_reduction <maximumf>, %178, %cst_109 [1] : vector<32x8xf32> to vector<32xf32>
    %180 = vector.shape_cast %179 : vector<32xf32> to vector<32x1xf32>
    %181 = vector.broadcast %180 : vector<32x1xf32> to vector<32x8xf32>
    %182 = arith.subf %178, %181 : vector<32x8xf32>
    %183 = math.exp %182 : vector<32x8xf32>
    %cst_110 = arith.constant dense<0.000000e+00> : vector<32xf32>
    %184 = vector.multi_reduction <add>, %183, %cst_110 [1] : vector<32x8xf32> to vector<32xf32>
    %185 = vector.shape_cast %184 : vector<32xf32> to vector<32x1xf32>
    %186 = vector.broadcast %185 : vector<32x1xf32> to vector<32x8xf32>
    %187 = arith.divf %183, %186 : vector<32x8xf32>
    %188 = vector.extract_strided_slice %187 {offsets = [0, 0], sizes = [8, 8], strides = [1, 1]} : vector<32x8xf32> to vector<8x8xf32>
    %189 = vector.extract_strided_slice %161 {offsets = [0, 0], sizes = [8, 8], strides = [1, 1]} : vector<8x32xf32> to vector<8x8xf32>
    %cst_111 = arith.constant dense<0.000000e+00> : vector<8x8xf32>
    %190 = tpu.matmul %188, %189, %cst_111 {dimension_numbers = #tpu.dot_dimension_numbers<[1], [0], [0], [1], [0, 0, 1, 1], [], []>} : vector<8x8xf32>, vector<8x8xf32>, vector<8x8xf32> -> vector<8x8xf32>
    %191 = vector.extract_strided_slice %187 {offsets = [8, 0], sizes = [8, 8], strides = [1, 1]} : vector<32x8xf32> to vector<8x8xf32>
    %192 = vector.extract_strided_slice %161 {offsets = [0, 8], sizes = [8, 8], strides = [1, 1]} : vector<8x32xf32> to vector<8x8xf32>
    %cst_112 = arith.constant dense<0.000000e+00> : vector<8x8xf32>
    %193 = tpu.matmul %191, %192, %cst_112 {dimension_numbers = #tpu.dot_dimension_numbers<[1], [0], [0], [1], [0, 0, 1, 1], [], []>} : vector<8x8xf32>, vector<8x8xf32>, vector<8x8xf32> -> vector<8x8xf32>
    %194 = vector.extract_strided_slice %187 {offsets = [16, 0], sizes = [8, 8], strides = [1, 1]} : vector<32x8xf32> to vector<8x8xf32>
    %195 = vector.extract_strided_slice %161 {offsets = [0, 16], sizes = [8, 8], strides = [1, 1]} : vector<8x32xf32> to vector<8x8xf32>
    %cst_113 = arith.constant dense<0.000000e+00> : vector<8x8xf32>
    %196 = tpu.matmul %194, %195, %cst_113 {dimension_numbers = #tpu.dot_dimension_numbers<[1], [0], [0], [1], [0, 0, 1, 1], [], []>} : vector<8x8xf32>, vector<8x8xf32>, vector<8x8xf32> -> vector<8x8xf32>
    %197 = vector.extract_strided_slice %187 {offsets = [24, 0], sizes = [8, 8], strides = [1, 1]} : vector<32x8xf32> to vector<8x8xf32>
    %198 = vector.extract_strided_slice %161 {offsets = [0, 24], sizes = [8, 8], strides = [1, 1]} : vector<8x32xf32> to vector<8x8xf32>
    %cst_114 = arith.constant dense<0.000000e+00> : vector<8x8xf32>
    %199 = tpu.matmul %197, %198, %cst_114 {dimension_numbers = #tpu.dot_dimension_numbers<[1], [0], [0], [1], [0, 0, 1, 1], [], []>} : vector<8x8xf32>, vector<8x8xf32>, vector<8x8xf32> -> vector<8x8xf32>
    %200 = tpu.concatenate %190, %193, %196, %199 in 1 : vector<8x8xf32>, vector<8x8xf32>, vector<8x8xf32>, vector<8x8xf32> -> vector<8x32xf32>
    %201 = tpu.concatenate %158, %200 in 0 : vector<8x32xf32>, vector<8x32xf32> -> vector<16x32xf32>
    %c0_115 = arith.constant 0 : index
    %c0_116 = arith.constant 0 : index
    %c0_117 = arith.constant 0 : index
    %202 = vector.load %arg9[%c0_115, %c0_116, %c0_117] : memref<2x32x32xf32, #tpu.memory_space<vmem>>, vector<1x32x32xf32>
    %203 = vector.shape_cast %202 : vector<1x32x32xf32> to vector<32x32xf32>
    %cst_118 = arith.constant dense<0.000000e+00> : vector<16x32xf32>
    %204 = tpu.matmul %201, %203, %cst_118 {dimension_numbers = #tpu.dot_dimension_numbers<[1], [0], [0], [1], [0, 0, 1, 1], [], []>} : vector<16x32xf32>, vector<32x32xf32>, vector<16x32xf32> -> vector<16x32xf32>
    %c0_119 = arith.constant 0 : index
    %c0_120 = arith.constant 0 : index
    %c0_121 = arith.constant 0 : index
    %205 = vector.load %arg10[%c0_119, %c0_120, %c0_121] : memref<2x1x32xf32, #tpu.memory_space<vmem>>, vector<1x1x32xf32>
    %206 = vector.shape_cast %205 : vector<1x1x32xf32> to vector<1x32xf32>
    %207 = vector.broadcast %206 : vector<1x32xf32> to vector<16x32xf32>
    %208 = arith.addf %204, %207 : vector<16x32xf32>
    %209 = arith.addf %208, %94 : vector<16x32xf32>
    %c0_122 = arith.constant 0 : index
    %c0_123 = arith.constant 0 : index
    %c0_124 = arith.constant 0 : index
    %210 = vector.load %arg11[%c0_122, %c0_123, %c0_124] : memref<2x1x32xf32, #tpu.memory_space<vmem>>, vector<1x1x32xf32>
    %211 = vector.shape_cast %210 : vector<1x1x32xf32> to vector<1x32xf32>
    %c0_125 = arith.constant 0 : index
    %c0_126 = arith.constant 0 : index
    %c0_127 = arith.constant 0 : index
    %212 = vector.load %arg12[%c0_125, %c0_126, %c0_127] : memref<2x1x32xf32, #tpu.memory_space<vmem>>, vector<1x1x32xf32>
    %213 = vector.shape_cast %212 : vector<1x1x32xf32> to vector<1x32xf32>
    %cst_128 = arith.constant dense<0.000000e+00> : vector<16xf32>
    %214 = vector.multi_reduction <add>, %209, %cst_128 [1] : vector<16x32xf32> to vector<16xf32>
    %215 = vector.shape_cast %214 : vector<16xf32> to vector<16x1xf32>
    %cst_129 = arith.constant 3.200000e+01 : f32
    %216 = vector.broadcast %cst_129 : f32 to vector<16x1xf32>
    %217 = arith.divf %215, %216 : vector<16x1xf32>
    %218 = vector.broadcast %217 : vector<16x1xf32> to vector<16x32xf32>
    %219 = arith.subf %209, %218 : vector<16x32xf32>
    %220 = arith.mulf %219, %219 : vector<16x32xf32>
    %cst_130 = arith.constant dense<0.000000e+00> : vector<16xf32>
    %221 = vector.multi_reduction <add>, %220, %cst_130 [1] : vector<16x32xf32> to vector<16xf32>
    %222 = vector.shape_cast %221 : vector<16xf32> to vector<16x1xf32>
    %cst_131 = arith.constant 3.200000e+01 : f32
    %223 = vector.broadcast %cst_131 : f32 to vector<16x1xf32>
    %224 = arith.divf %222, %223 : vector<16x1xf32>
    %225 = vector.broadcast %217 : vector<16x1xf32> to vector<16x32xf32>
    %226 = arith.subf %209, %225 : vector<16x32xf32>
    %cst_132 = arith.constant 9.99999996E-13 : f32
    %227 = vector.broadcast %cst_132 : f32 to vector<16x1xf32>
    %228 = arith.addf %224, %227 : vector<16x1xf32>
    %229 = math.rsqrt %228 : vector<16x1xf32>
    %230 = vector.broadcast %229 : vector<16x1xf32> to vector<16x32xf32>
    %231 = arith.mulf %226, %230 : vector<16x32xf32>
    %232 = vector.broadcast %211 : vector<1x32xf32> to vector<16x32xf32>
    %233 = arith.mulf %231, %232 : vector<16x32xf32>
    %234 = vector.broadcast %213 : vector<1x32xf32> to vector<16x32xf32>
    %235 = arith.addf %233, %234 : vector<16x32xf32>
    %c0_133 = arith.constant 0 : index
    %c0_134 = arith.constant 0 : index
    %c0_135 = arith.constant 0 : index
    %236 = vector.load %arg13[%c0_133, %c0_134, %c0_135] : memref<2x32x64xf32, #tpu.memory_space<vmem>>, vector<1x32x64xf32>
    %237 = vector.shape_cast %236 : vector<1x32x64xf32> to vector<32x64xf32>
    %cst_136 = arith.constant dense<0.000000e+00> : vector<16x64xf32>
    %238 = tpu.matmul %235, %237, %cst_136 {dimension_numbers = #tpu.dot_dimension_numbers<[1], [0], [0], [1], [0, 0, 1, 1], [], []>} : vector<16x32xf32>, vector<32x64xf32>, vector<16x64xf32> -> vector<16x64xf32>
    %c0_137 = arith.constant 0 : index
    %c0_138 = arith.constant 0 : index
    %c0_139 = arith.constant 0 : index
    %239 = vector.load %arg14[%c0_137, %c0_138, %c0_139] : memref<2x1x64xf32, #tpu.memory_space<vmem>>, vector<1x1x64xf32>
    %240 = vector.shape_cast %239 : vector<1x1x64xf32> to vector<1x64xf32>
    %241 = vector.broadcast %240 : vector<1x64xf32> to vector<16x64xf32>
    %242 = arith.addf %238, %241 : vector<16x64xf32>
    %cst_140 = arith.constant 5.000000e-01 : f32
    %243 = vector.broadcast %cst_140 : f32 to vector<16x64xf32>
    %244 = arith.mulf %243, %242 : vector<16x64xf32>
    %cst_141 = arith.constant 0.707106769 : f32
    %245 = vector.broadcast %cst_141 : f32 to vector<16x64xf32>
    %246 = arith.mulf %242, %245 : vector<16x64xf32>
    %247 = math.erf %246 : vector<16x64xf32>
    %cst_142 = arith.constant 1.000000e+00 : f32
    %248 = vector.broadcast %cst_142 : f32 to vector<16x64xf32>
    %249 = arith.addf %248, %247 : vector<16x64xf32>
    %250 = arith.mulf %244, %249 : vector<16x64xf32>
    %c0_143 = arith.constant 0 : index
    %c0_144 = arith.constant 0 : index
    %c0_145 = arith.constant 0 : index
    %251 = vector.load %arg15[%c0_143, %c0_144, %c0_145] : memref<2x64x32xf32, #tpu.memory_space<vmem>>, vector<1x64x32xf32>
    %252 = vector.shape_cast %251 : vector<1x64x32xf32> to vector<64x32xf32>
    %cst_146 = arith.constant dense<0.000000e+00> : vector<16x32xf32>
    %253 = tpu.matmul %250, %252, %cst_146 {dimension_numbers = #tpu.dot_dimension_numbers<[1], [0], [0], [1], [0, 0, 1, 1], [], []>} : vector<16x64xf32>, vector<64x32xf32>, vector<16x32xf32> -> vector<16x32xf32>
    %c0_147 = arith.constant 0 : index
    %c0_148 = arith.constant 0 : index
    %c0_149 = arith.constant 0 : index
    %254 = vector.load %arg16[%c0_147, %c0_148, %c0_149] : memref<2x1x32xf32, #tpu.memory_space<vmem>>, vector<1x1x32xf32>
    %255 = vector.shape_cast %254 : vector<1x1x32xf32> to vector<1x32xf32>
    %256 = vector.broadcast %255 : vector<1x32xf32> to vector<16x32xf32>
    %257 = arith.addf %253, %256 : vector<16x32xf32>
    %258 = arith.addf %257, %235 : vector<16x32xf32>
    %c0_150 = arith.constant 0 : index
    %c0_151 = arith.constant 0 : index
    %c0_152 = arith.constant 0 : index
    %259 = vector.load %arg17[%c0_150, %c0_151, %c0_152] : memref<2x1x32xf32, #tpu.memory_space<vmem>>, vector<1x1x32xf32>
    %260 = vector.shape_cast %259 : vector<1x1x32xf32> to vector<1x32xf32>
    %c0_153 = arith.constant 0 : index
    %c0_154 = arith.constant 0 : index
    %c0_155 = arith.constant 0 : index
    %261 = vector.load %arg18[%c0_153, %c0_154, %c0_155] : memref<2x1x32xf32, #tpu.memory_space<vmem>>, vector<1x1x32xf32>
    %262 = vector.shape_cast %261 : vector<1x1x32xf32> to vector<1x32xf32>
    %cst_156 = arith.constant dense<0.000000e+00> : vector<16xf32>
    %263 = vector.multi_reduction <add>, %258, %cst_156 [1] : vector<16x32xf32> to vector<16xf32>
    %264 = vector.shape_cast %263 : vector<16xf32> to vector<16x1xf32>
    %cst_157 = arith.constant 3.200000e+01 : f32
    %265 = vector.broadcast %cst_157 : f32 to vector<16x1xf32>
    %266 = arith.divf %264, %265 : vector<16x1xf32>
    %267 = vector.broadcast %266 : vector<16x1xf32> to vector<16x32xf32>
    %268 = arith.subf %258, %267 : vector<16x32xf32>
    %269 = arith.mulf %268, %268 : vector<16x32xf32>
    %cst_158 = arith.constant dense<0.000000e+00> : vector<16xf32>
    %270 = vector.multi_reduction <add>, %269, %cst_158 [1] : vector<16x32xf32> to vector<16xf32>
    %271 = vector.shape_cast %270 : vector<16xf32> to vector<16x1xf32>
    %cst_159 = arith.constant 3.200000e+01 : f32
    %272 = vector.broadcast %cst_159 : f32 to vector<16x1xf32>
    %273 = arith.divf %271, %272 : vector<16x1xf32>
    %274 = vector.broadcast %266 : vector<16x1xf32> to vector<16x32xf32>
    %275 = arith.subf %258, %274 : vector<16x32xf32>
    %cst_160 = arith.constant 9.99999996E-13 : f32
    %276 = vector.broadcast %cst_160 : f32 to vector<16x1xf32>
    %277 = arith.addf %273, %276 : vector<16x1xf32>
    %278 = math.rsqrt %277 : vector<16x1xf32>
    %279 = vector.broadcast %278 : vector<16x1xf32> to vector<16x32xf32>
    %280 = arith.mulf %275, %279 : vector<16x32xf32>
    %281 = vector.broadcast %260 : vector<1x32xf32> to vector<16x32xf32>
    %282 = arith.mulf %280, %281 : vector<16x32xf32>
    %283 = vector.broadcast %262 : vector<1x32xf32> to vector<16x32xf32>
    %284 = arith.addf %282, %283 : vector<16x32xf32>
    %c1_161 = arith.constant 1 : index
    %c0_162 = arith.constant 0 : index
    %c0_163 = arith.constant 0 : index
    %285 = vector.load %arg7[%c1_161, %c0_162, %c0_163] : memref<2x32x96xf32, #tpu.memory_space<vmem>>, vector<1x32x96xf32>
    %286 = vector.shape_cast %285 : vector<1x32x96xf32> to vector<32x96xf32>
    %cst_164 = arith.constant dense<0.000000e+00> : vector<16x96xf32>
    %287 = tpu.matmul %284, %286, %cst_164 {dimension_numbers = #tpu.dot_dimension_numbers<[1], [0], [0], [1], [0, 0, 1, 1], [], []>} : vector<16x32xf32>, vector<32x96xf32>, vector<16x96xf32> -> vector<16x96xf32>
    %c1_165 = arith.constant 1 : index
    %c0_166 = arith.constant 0 : index
    %c0_167 = arith.constant 0 : index
    %288 = vector.load %arg8[%c1_165, %c0_166, %c0_167] : memref<2x1x96xf32, #tpu.memory_space<vmem>>, vector<1x1x96xf32>
    %289 = vector.shape_cast %288 : vector<1x1x96xf32> to vector<1x96xf32>
    %290 = vector.broadcast %289 : vector<1x96xf32> to vector<16x96xf32>
    %291 = arith.addf %287, %290 : vector<16x96xf32>
    %292 = vector.extract_strided_slice %291 {offsets = [0, 0], sizes = [16, 32], strides = [1, 1]} : vector<16x96xf32> to vector<16x32xf32>
    %293 = vector.extract_strided_slice %291 {offsets = [0, 32], sizes = [16, 32], strides = [1, 1]} : vector<16x96xf32> to vector<16x32xf32>
    %294 = vector.extract_strided_slice %291 {offsets = [0, 64], sizes = [16, 32], strides = [1, 1]} : vector<16x96xf32> to vector<16x32xf32>
    %295 = vector.extract_strided_slice %292 {offsets = [0, 0], sizes = [8, 32], strides = [1, 1]} : vector<16x32xf32> to vector<8x32xf32>
    %296 = vector.extract_strided_slice %293 {offsets = [0, 0], sizes = [8, 32], strides = [1, 1]} : vector<16x32xf32> to vector<8x32xf32>
    %297 = vector.extract_strided_slice %294 {offsets = [0, 0], sizes = [8, 32], strides = [1, 1]} : vector<16x32xf32> to vector<8x32xf32>
    %298 = vector.extract_strided_slice %295 {offsets = [0, 0], sizes = [8, 8], strides = [1, 1]} : vector<8x32xf32> to vector<8x8xf32>
    %299 = vector.extract_strided_slice %296 {offsets = [0, 0], sizes = [8, 8], strides = [1, 1]} : vector<8x32xf32> to vector<8x8xf32>
    %cst_168 = arith.constant dense<0.000000e+00> : vector<8x8xf32>
    %300 = tpu.matmul %298, %299, %cst_168 {dimension_numbers = #tpu.dot_dimension_numbers<[1], [1], [0], [0], [0, 0, 1, 0], [], []>} : vector<8x8xf32>, vector<8x8xf32>, vector<8x8xf32> -> vector<8x8xf32>
    %301 = vector.extract_strided_slice %295 {offsets = [0, 8], sizes = [8, 8], strides = [1, 1]} : vector<8x32xf32> to vector<8x8xf32>
    %302 = vector.extract_strided_slice %296 {offsets = [0, 8], sizes = [8, 8], strides = [1, 1]} : vector<8x32xf32> to vector<8x8xf32>
    %cst_169 = arith.constant dense<0.000000e+00> : vector<8x8xf32>
    %303 = tpu.matmul %301, %302, %cst_169 {dimension_numbers = #tpu.dot_dimension_numbers<[1], [1], [0], [0], [0, 0, 1, 0], [], []>} : vector<8x8xf32>, vector<8x8xf32>, vector<8x8xf32> -> vector<8x8xf32>
    %304 = vector.extract_strided_slice %295 {offsets = [0, 16], sizes = [8, 8], strides = [1, 1]} : vector<8x32xf32> to vector<8x8xf32>
    %305 = vector.extract_strided_slice %296 {offsets = [0, 16], sizes = [8, 8], strides = [1, 1]} : vector<8x32xf32> to vector<8x8xf32>
    %cst_170 = arith.constant dense<0.000000e+00> : vector<8x8xf32>
    %306 = tpu.matmul %304, %305, %cst_170 {dimension_numbers = #tpu.dot_dimension_numbers<[1], [1], [0], [0], [0, 0, 1, 0], [], []>} : vector<8x8xf32>, vector<8x8xf32>, vector<8x8xf32> -> vector<8x8xf32>
    %307 = vector.extract_strided_slice %295 {offsets = [0, 24], sizes = [8, 8], strides = [1, 1]} : vector<8x32xf32> to vector<8x8xf32>
    %308 = vector.extract_strided_slice %296 {offsets = [0, 24], sizes = [8, 8], strides = [1, 1]} : vector<8x32xf32> to vector<8x8xf32>
    %cst_171 = arith.constant dense<0.000000e+00> : vector<8x8xf32>
    %309 = tpu.matmul %307, %308, %cst_171 {dimension_numbers = #tpu.dot_dimension_numbers<[1], [1], [0], [0], [0, 0, 1, 0], [], []>} : vector<8x8xf32>, vector<8x8xf32>, vector<8x8xf32> -> vector<8x8xf32>
    %310 = tpu.concatenate %300, %303, %306, %309 in 0 : vector<8x8xf32>, vector<8x8xf32>, vector<8x8xf32>, vector<8x8xf32> -> vector<32x8xf32>
    %cst_172 = arith.constant 0.353553385 : f32
    %311 = vector.broadcast %cst_172 : f32 to vector<32x8xf32>
    %312 = arith.mulf %310, %311 : vector<32x8xf32>
    %313 = vector.broadcast %100 : vector<1x8xf32> to vector<32x8xf32>
    %314 = arith.addf %312, %313 : vector<32x8xf32>
    %cst_173 = arith.constant dense<0xFF800000> : vector<32xf32>
    %315 = vector.multi_reduction <maximumf>, %314, %cst_173 [1] : vector<32x8xf32> to vector<32xf32>
    %316 = vector.shape_cast %315 : vector<32xf32> to vector<32x1xf32>
    %317 = vector.broadcast %316 : vector<32x1xf32> to vector<32x8xf32>
    %318 = arith.subf %314, %317 : vector<32x8xf32>
    %319 = math.exp %318 : vector<32x8xf32>
    %cst_174 = arith.constant dense<0.000000e+00> : vector<32xf32>
    %320 = vector.multi_reduction <add>, %319, %cst_174 [1] : vector<32x8xf32> to vector<32xf32>
    %321 = vector.shape_cast %320 : vector<32xf32> to vector<32x1xf32>
    %322 = vector.broadcast %321 : vector<32x1xf32> to vector<32x8xf32>
    %323 = arith.divf %319, %322 : vector<32x8xf32>
    %324 = vector.extract_strided_slice %323 {offsets = [0, 0], sizes = [8, 8], strides = [1, 1]} : vector<32x8xf32> to vector<8x8xf32>
    %325 = vector.extract_strided_slice %297 {offsets = [0, 0], sizes = [8, 8], strides = [1, 1]} : vector<8x32xf32> to vector<8x8xf32>
    %cst_175 = arith.constant dense<0.000000e+00> : vector<8x8xf32>
    %326 = tpu.matmul %324, %325, %cst_175 {dimension_numbers = #tpu.dot_dimension_numbers<[1], [0], [0], [1], [0, 0, 1, 1], [], []>} : vector<8x8xf32>, vector<8x8xf32>, vector<8x8xf32> -> vector<8x8xf32>
    %327 = vector.extract_strided_slice %323 {offsets = [8, 0], sizes = [8, 8], strides = [1, 1]} : vector<32x8xf32> to vector<8x8xf32>
    %328 = vector.extract_strided_slice %297 {offsets = [0, 8], sizes = [8, 8], strides = [1, 1]} : vector<8x32xf32> to vector<8x8xf32>
    %cst_176 = arith.constant dense<0.000000e+00> : vector<8x8xf32>
    %329 = tpu.matmul %327, %328, %cst_176 {dimension_numbers = #tpu.dot_dimension_numbers<[1], [0], [0], [1], [0, 0, 1, 1], [], []>} : vector<8x8xf32>, vector<8x8xf32>, vector<8x8xf32> -> vector<8x8xf32>
    %330 = vector.extract_strided_slice %323 {offsets = [16, 0], sizes = [8, 8], strides = [1, 1]} : vector<32x8xf32> to vector<8x8xf32>
    %331 = vector.extract_strided_slice %297 {offsets = [0, 16], sizes = [8, 8], strides = [1, 1]} : vector<8x32xf32> to vector<8x8xf32>
    %cst_177 = arith.constant dense<0.000000e+00> : vector<8x8xf32>
    %332 = tpu.matmul %330, %331, %cst_177 {dimension_numbers = #tpu.dot_dimension_numbers<[1], [0], [0], [1], [0, 0, 1, 1], [], []>} : vector<8x8xf32>, vector<8x8xf32>, vector<8x8xf32> -> vector<8x8xf32>
    %333 = vector.extract_strided_slice %323 {offsets = [24, 0], sizes = [8, 8], strides = [1, 1]} : vector<32x8xf32> to vector<8x8xf32>
    %334 = vector.extract_strided_slice %297 {offsets = [0, 24], sizes = [8, 8], strides = [1, 1]} : vector<8x32xf32> to vector<8x8xf32>
    %cst_178 = arith.constant dense<0.000000e+00> : vector<8x8xf32>
    %335 = tpu.matmul %333, %334, %cst_178 {dimension_numbers = #tpu.dot_dimension_numbers<[1], [0], [0], [1], [0, 0, 1, 1], [], []>} : vector<8x8xf32>, vector<8x8xf32>, vector<8x8xf32> -> vector<8x8xf32>
    %336 = tpu.concatenate %326, %329, %332, %335 in 1 : vector<8x8xf32>, vector<8x8xf32>, vector<8x8xf32>, vector<8x8xf32> -> vector<8x32xf32>
    %337 = vector.extract_strided_slice %292 {offsets = [8, 0], sizes = [8, 32], strides = [1, 1]} : vector<16x32xf32> to vector<8x32xf32>
    %338 = vector.extract_strided_slice %293 {offsets = [8, 0], sizes = [8, 32], strides = [1, 1]} : vector<16x32xf32> to vector<8x32xf32>
    %339 = vector.extract_strided_slice %294 {offsets = [8, 0], sizes = [8, 32], strides = [1, 1]} : vector<16x32xf32> to vector<8x32xf32>
    %340 = vector.extract_strided_slice %337 {offsets = [0, 0], sizes = [8, 8], strides = [1, 1]} : vector<8x32xf32> to vector<8x8xf32>
    %341 = vector.extract_strided_slice %338 {offsets = [0, 0], sizes = [8, 8], strides = [1, 1]} : vector<8x32xf32> to vector<8x8xf32>
    %cst_179 = arith.constant dense<0.000000e+00> : vector<8x8xf32>
    %342 = tpu.matmul %340, %341, %cst_179 {dimension_numbers = #tpu.dot_dimension_numbers<[1], [1], [0], [0], [0, 0, 1, 0], [], []>} : vector<8x8xf32>, vector<8x8xf32>, vector<8x8xf32> -> vector<8x8xf32>
    %343 = vector.extract_strided_slice %337 {offsets = [0, 8], sizes = [8, 8], strides = [1, 1]} : vector<8x32xf32> to vector<8x8xf32>
    %344 = vector.extract_strided_slice %338 {offsets = [0, 8], sizes = [8, 8], strides = [1, 1]} : vector<8x32xf32> to vector<8x8xf32>
    %cst_180 = arith.constant dense<0.000000e+00> : vector<8x8xf32>
    %345 = tpu.matmul %343, %344, %cst_180 {dimension_numbers = #tpu.dot_dimension_numbers<[1], [1], [0], [0], [0, 0, 1, 0], [], []>} : vector<8x8xf32>, vector<8x8xf32>, vector<8x8xf32> -> vector<8x8xf32>
    %346 = vector.extract_strided_slice %337 {offsets = [0, 16], sizes = [8, 8], strides = [1, 1]} : vector<8x32xf32> to vector<8x8xf32>
    %347 = vector.extract_strided_slice %338 {offsets = [0, 16], sizes = [8, 8], strides = [1, 1]} : vector<8x32xf32> to vector<8x8xf32>
    %cst_181 = arith.constant dense<0.000000e+00> : vector<8x8xf32>
    %348 = tpu.matmul %346, %347, %cst_181 {dimension_numbers = #tpu.dot_dimension_numbers<[1], [1], [0], [0], [0, 0, 1, 0], [], []>} : vector<8x8xf32>, vector<8x8xf32>, vector<8x8xf32> -> vector<8x8xf32>
    %349 = vector.extract_strided_slice %337 {offsets = [0, 24], sizes = [8, 8], strides = [1, 1]} : vector<8x32xf32> to vector<8x8xf32>
    %350 = vector.extract_strided_slice %338 {offsets = [0, 24], sizes = [8, 8], strides = [1, 1]} : vector<8x32xf32> to vector<8x8xf32>
    %cst_182 = arith.constant dense<0.000000e+00> : vector<8x8xf32>
    %351 = tpu.matmul %349, %350, %cst_182 {dimension_numbers = #tpu.dot_dimension_numbers<[1], [1], [0], [0], [0, 0, 1, 0], [], []>} : vector<8x8xf32>, vector<8x8xf32>, vector<8x8xf32> -> vector<8x8xf32>
    %352 = tpu.concatenate %342, %345, %348, %351 in 0 : vector<8x8xf32>, vector<8x8xf32>, vector<8x8xf32>, vector<8x8xf32> -> vector<32x8xf32>
    %cst_183 = arith.constant 0.353553385 : f32
    %353 = vector.broadcast %cst_183 : f32 to vector<32x8xf32>
    %354 = arith.mulf %352, %353 : vector<32x8xf32>
    %355 = vector.broadcast %106 : vector<1x8xf32> to vector<32x8xf32>
    %356 = arith.addf %354, %355 : vector<32x8xf32>
    %cst_184 = arith.constant dense<0xFF800000> : vector<32xf32>
    %357 = vector.multi_reduction <maximumf>, %356, %cst_184 [1] : vector<32x8xf32> to vector<32xf32>
    %358 = vector.shape_cast %357 : vector<32xf32> to vector<32x1xf32>
    %359 = vector.broadcast %358 : vector<32x1xf32> to vector<32x8xf32>
    %360 = arith.subf %356, %359 : vector<32x8xf32>
    %361 = math.exp %360 : vector<32x8xf32>
    %cst_185 = arith.constant dense<0.000000e+00> : vector<32xf32>
    %362 = vector.multi_reduction <add>, %361, %cst_185 [1] : vector<32x8xf32> to vector<32xf32>
    %363 = vector.shape_cast %362 : vector<32xf32> to vector<32x1xf32>
    %364 = vector.broadcast %363 : vector<32x1xf32> to vector<32x8xf32>
    %365 = arith.divf %361, %364 : vector<32x8xf32>
    %366 = vector.extract_strided_slice %365 {offsets = [0, 0], sizes = [8, 8], strides = [1, 1]} : vector<32x8xf32> to vector<8x8xf32>
    %367 = vector.extract_strided_slice %339 {offsets = [0, 0], sizes = [8, 8], strides = [1, 1]} : vector<8x32xf32> to vector<8x8xf32>
    %cst_186 = arith.constant dense<0.000000e+00> : vector<8x8xf32>
    %368 = tpu.matmul %366, %367, %cst_186 {dimension_numbers = #tpu.dot_dimension_numbers<[1], [0], [0], [1], [0, 0, 1, 1], [], []>} : vector<8x8xf32>, vector<8x8xf32>, vector<8x8xf32> -> vector<8x8xf32>
    %369 = vector.extract_strided_slice %365 {offsets = [8, 0], sizes = [8, 8], strides = [1, 1]} : vector<32x8xf32> to vector<8x8xf32>
    %370 = vector.extract_strided_slice %339 {offsets = [0, 8], sizes = [8, 8], strides = [1, 1]} : vector<8x32xf32> to vector<8x8xf32>
    %cst_187 = arith.constant dense<0.000000e+00> : vector<8x8xf32>
    %371 = tpu.matmul %369, %370, %cst_187 {dimension_numbers = #tpu.dot_dimension_numbers<[1], [0], [0], [1], [0, 0, 1, 1], [], []>} : vector<8x8xf32>, vector<8x8xf32>, vector<8x8xf32> -> vector<8x8xf32>
    %372 = vector.extract_strided_slice %365 {offsets = [16, 0], sizes = [8, 8], strides = [1, 1]} : vector<32x8xf32> to vector<8x8xf32>
    %373 = vector.extract_strided_slice %339 {offsets = [0, 16], sizes = [8, 8], strides = [1, 1]} : vector<8x32xf32> to vector<8x8xf32>
    %cst_188 = arith.constant dense<0.000000e+00> : vector<8x8xf32>
    %374 = tpu.matmul %372, %373, %cst_188 {dimension_numbers = #tpu.dot_dimension_numbers<[1], [0], [0], [1], [0, 0, 1, 1], [], []>} : vector<8x8xf32>, vector<8x8xf32>, vector<8x8xf32> -> vector<8x8xf32>
    %375 = vector.extract_strided_slice %365 {offsets = [24, 0], sizes = [8, 8], strides = [1, 1]} : vector<32x8xf32> to vector<8x8xf32>
    %376 = vector.extract_strided_slice %339 {offsets = [0, 24], sizes = [8, 8], strides = [1, 1]} : vector<8x32xf32> to vector<8x8xf32>
    %cst_189 = arith.constant dense<0.000000e+00> : vector<8x8xf32>
    %377 = tpu.matmul %375, %376, %cst_189 {dimension_numbers = #tpu.dot_dimension_numbers<[1], [0], [0], [1], [0, 0, 1, 1], [], []>} : vector<8x8xf32>, vector<8x8xf32>, vector<8x8xf32> -> vector<8x8xf32>
    %378 = tpu.concatenate %368, %371, %374, %377 in 1 : vector<8x8xf32>, vector<8x8xf32>, vector<8x8xf32>, vector<8x8xf32> -> vector<8x32xf32>
    %379 = tpu.concatenate %336, %378 in 0 : vector<8x32xf32>, vector<8x32xf32> -> vector<16x32xf32>
    %c1_190 = arith.constant 1 : index
    %c0_191 = arith.constant 0 : index
    %c0_192 = arith.constant 0 : index
    %380 = vector.load %arg9[%c1_190, %c0_191, %c0_192] : memref<2x32x32xf32, #tpu.memory_space<vmem>>, vector<1x32x32xf32>
    %381 = vector.shape_cast %380 : vector<1x32x32xf32> to vector<32x32xf32>
    %cst_193 = arith.constant dense<0.000000e+00> : vector<16x32xf32>
    %382 = tpu.matmul %379, %381, %cst_193 {dimension_numbers = #tpu.dot_dimension_numbers<[1], [0], [0], [1], [0, 0, 1, 1], [], []>} : vector<16x32xf32>, vector<32x32xf32>, vector<16x32xf32> -> vector<16x32xf32>
    %c1_194 = arith.constant 1 : index
    %c0_195 = arith.constant 0 : index
    %c0_196 = arith.constant 0 : index
    %383 = vector.load %arg10[%c1_194, %c0_195, %c0_196] : memref<2x1x32xf32, #tpu.memory_space<vmem>>, vector<1x1x32xf32>
    %384 = vector.shape_cast %383 : vector<1x1x32xf32> to vector<1x32xf32>
    %385 = vector.broadcast %384 : vector<1x32xf32> to vector<16x32xf32>
    %386 = arith.addf %382, %385 : vector<16x32xf32>
    %387 = arith.addf %386, %284 : vector<16x32xf32>
    %c1_197 = arith.constant 1 : index
    %c0_198 = arith.constant 0 : index
    %c0_199 = arith.constant 0 : index
    %388 = vector.load %arg11[%c1_197, %c0_198, %c0_199] : memref<2x1x32xf32, #tpu.memory_space<vmem>>, vector<1x1x32xf32>
    %389 = vector.shape_cast %388 : vector<1x1x32xf32> to vector<1x32xf32>
    %c1_200 = arith.constant 1 : index
    %c0_201 = arith.constant 0 : index
    %c0_202 = arith.constant 0 : index
    %390 = vector.load %arg12[%c1_200, %c0_201, %c0_202] : memref<2x1x32xf32, #tpu.memory_space<vmem>>, vector<1x1x32xf32>
    %391 = vector.shape_cast %390 : vector<1x1x32xf32> to vector<1x32xf32>
    %cst_203 = arith.constant dense<0.000000e+00> : vector<16xf32>
    %392 = vector.multi_reduction <add>, %387, %cst_203 [1] : vector<16x32xf32> to vector<16xf32>
    %393 = vector.shape_cast %392 : vector<16xf32> to vector<16x1xf32>
    %cst_204 = arith.constant 3.200000e+01 : f32
    %394 = vector.broadcast %cst_204 : f32 to vector<16x1xf32>
    %395 = arith.divf %393, %394 : vector<16x1xf32>
    %396 = vector.broadcast %395 : vector<16x1xf32> to vector<16x32xf32>
    %397 = arith.subf %387, %396 : vector<16x32xf32>
    %398 = arith.mulf %397, %397 : vector<16x32xf32>
    %cst_205 = arith.constant dense<0.000000e+00> : vector<16xf32>
    %399 = vector.multi_reduction <add>, %398, %cst_205 [1] : vector<16x32xf32> to vector<16xf32>
    %400 = vector.shape_cast %399 : vector<16xf32> to vector<16x1xf32>
    %cst_206 = arith.constant 3.200000e+01 : f32
    %401 = vector.broadcast %cst_206 : f32 to vector<16x1xf32>
    %402 = arith.divf %400, %401 : vector<16x1xf32>
    %403 = vector.broadcast %395 : vector<16x1xf32> to vector<16x32xf32>
    %404 = arith.subf %387, %403 : vector<16x32xf32>
    %cst_207 = arith.constant 9.99999996E-13 : f32
    %405 = vector.broadcast %cst_207 : f32 to vector<16x1xf32>
    %406 = arith.addf %402, %405 : vector<16x1xf32>
    %407 = math.rsqrt %406 : vector<16x1xf32>
    %408 = vector.broadcast %407 : vector<16x1xf32> to vector<16x32xf32>
    %409 = arith.mulf %404, %408 : vector<16x32xf32>
    %410 = vector.broadcast %389 : vector<1x32xf32> to vector<16x32xf32>
    %411 = arith.mulf %409, %410 : vector<16x32xf32>
    %412 = vector.broadcast %391 : vector<1x32xf32> to vector<16x32xf32>
    %413 = arith.addf %411, %412 : vector<16x32xf32>
    %c1_208 = arith.constant 1 : index
    %c0_209 = arith.constant 0 : index
    %c0_210 = arith.constant 0 : index
    %414 = vector.load %arg13[%c1_208, %c0_209, %c0_210] : memref<2x32x64xf32, #tpu.memory_space<vmem>>, vector<1x32x64xf32>
    %415 = vector.shape_cast %414 : vector<1x32x64xf32> to vector<32x64xf32>
    %cst_211 = arith.constant dense<0.000000e+00> : vector<16x64xf32>
    %416 = tpu.matmul %413, %415, %cst_211 {dimension_numbers = #tpu.dot_dimension_numbers<[1], [0], [0], [1], [0, 0, 1, 1], [], []>} : vector<16x32xf32>, vector<32x64xf32>, vector<16x64xf32> -> vector<16x64xf32>
    %c1_212 = arith.constant 1 : index
    %c0_213 = arith.constant 0 : index
    %c0_214 = arith.constant 0 : index
    %417 = vector.load %arg14[%c1_212, %c0_213, %c0_214] : memref<2x1x64xf32, #tpu.memory_space<vmem>>, vector<1x1x64xf32>
    %418 = vector.shape_cast %417 : vector<1x1x64xf32> to vector<1x64xf32>
    %419 = vector.broadcast %418 : vector<1x64xf32> to vector<16x64xf32>
    %420 = arith.addf %416, %419 : vector<16x64xf32>
    %cst_215 = arith.constant 5.000000e-01 : f32
    %421 = vector.broadcast %cst_215 : f32 to vector<16x64xf32>
    %422 = arith.mulf %421, %420 : vector<16x64xf32>
    %cst_216 = arith.constant 0.707106769 : f32
    %423 = vector.broadcast %cst_216 : f32 to vector<16x64xf32>
    %424 = arith.mulf %420, %423 : vector<16x64xf32>
    %425 = math.erf %424 : vector<16x64xf32>
    %cst_217 = arith.constant 1.000000e+00 : f32
    %426 = vector.broadcast %cst_217 : f32 to vector<16x64xf32>
    %427 = arith.addf %426, %425 : vector<16x64xf32>
    %428 = arith.mulf %422, %427 : vector<16x64xf32>
    %c1_218 = arith.constant 1 : index
    %c0_219 = arith.constant 0 : index
    %c0_220 = arith.constant 0 : index
    %429 = vector.load %arg15[%c1_218, %c0_219, %c0_220] : memref<2x64x32xf32, #tpu.memory_space<vmem>>, vector<1x64x32xf32>
    %430 = vector.shape_cast %429 : vector<1x64x32xf32> to vector<64x32xf32>
    %cst_221 = arith.constant dense<0.000000e+00> : vector<16x32xf32>
    %431 = tpu.matmul %428, %430, %cst_221 {dimension_numbers = #tpu.dot_dimension_numbers<[1], [0], [0], [1], [0, 0, 1, 1], [], []>} : vector<16x64xf32>, vector<64x32xf32>, vector<16x32xf32> -> vector<16x32xf32>
    %c1_222 = arith.constant 1 : index
    %c0_223 = arith.constant 0 : index
    %c0_224 = arith.constant 0 : index
    %432 = vector.load %arg16[%c1_222, %c0_223, %c0_224] : memref<2x1x32xf32, #tpu.memory_space<vmem>>, vector<1x1x32xf32>
    %433 = vector.shape_cast %432 : vector<1x1x32xf32> to vector<1x32xf32>
    %434 = vector.broadcast %433 : vector<1x32xf32> to vector<16x32xf32>
    %435 = arith.addf %431, %434 : vector<16x32xf32>
    %436 = arith.addf %435, %413 : vector<16x32xf32>
    %c1_225 = arith.constant 1 : index
    %c0_226 = arith.constant 0 : index
    %c0_227 = arith.constant 0 : index
    %437 = vector.load %arg17[%c1_225, %c0_226, %c0_227] : memref<2x1x32xf32, #tpu.memory_space<vmem>>, vector<1x1x32xf32>
    %438 = vector.shape_cast %437 : vector<1x1x32xf32> to vector<1x32xf32>
    %c1_228 = arith.constant 1 : index
    %c0_229 = arith.constant 0 : index
    %c0_230 = arith.constant 0 : index
    %439 = vector.load %arg18[%c1_228, %c0_229, %c0_230] : memref<2x1x32xf32, #tpu.memory_space<vmem>>, vector<1x1x32xf32>
    %440 = vector.shape_cast %439 : vector<1x1x32xf32> to vector<1x32xf32>
    %cst_231 = arith.constant dense<0.000000e+00> : vector<16xf32>
    %441 = vector.multi_reduction <add>, %436, %cst_231 [1] : vector<16x32xf32> to vector<16xf32>
    %442 = vector.shape_cast %441 : vector<16xf32> to vector<16x1xf32>
    %cst_232 = arith.constant 3.200000e+01 : f32
    %443 = vector.broadcast %cst_232 : f32 to vector<16x1xf32>
    %444 = arith.divf %442, %443 : vector<16x1xf32>
    %445 = vector.broadcast %444 : vector<16x1xf32> to vector<16x32xf32>
    %446 = arith.subf %436, %445 : vector<16x32xf32>
    %447 = arith.mulf %446, %446 : vector<16x32xf32>
    %cst_233 = arith.constant dense<0.000000e+00> : vector<16xf32>
    %448 = vector.multi_reduction <add>, %447, %cst_233 [1] : vector<16x32xf32> to vector<16xf32>
    %449 = vector.shape_cast %448 : vector<16xf32> to vector<16x1xf32>
    %cst_234 = arith.constant 3.200000e+01 : f32
    %450 = vector.broadcast %cst_234 : f32 to vector<16x1xf32>
    %451 = arith.divf %449, %450 : vector<16x1xf32>
    %452 = vector.broadcast %444 : vector<16x1xf32> to vector<16x32xf32>
    %453 = arith.subf %436, %452 : vector<16x32xf32>
    %cst_235 = arith.constant 9.99999996E-13 : f32
    %454 = vector.broadcast %cst_235 : f32 to vector<16x1xf32>
    %455 = arith.addf %451, %454 : vector<16x1xf32>
    %456 = math.rsqrt %455 : vector<16x1xf32>
    %457 = vector.broadcast %456 : vector<16x1xf32> to vector<16x32xf32>
    %458 = arith.mulf %453, %457 : vector<16x32xf32>
    %459 = vector.broadcast %438 : vector<1x32xf32> to vector<16x32xf32>
    %460 = arith.mulf %458, %459 : vector<16x32xf32>
    %461 = vector.broadcast %440 : vector<1x32xf32> to vector<16x32xf32>
    %462 = arith.addf %460, %461 : vector<16x32xf32>
    %463 = vector.extract_strided_slice %462 {offsets = [0, 0], sizes = [1, 32], strides = [1, 1]} : vector<16x32xf32> to vector<1x32xf32>
    %464 = vector.extract_strided_slice %462 {offsets = [8, 0], sizes = [1, 32], strides = [1, 1]} : vector<16x32xf32> to vector<1x32xf32>
    %465 = tpu.concatenate %463, %464 in 0 : vector<1x32xf32>, vector<1x32xf32> -> vector<2x32xf32>
    %c0_236 = arith.constant 0 : index
    %c0_237 = arith.constant 0 : index
    %466 = vector.load %arg19[%c0_236, %c0_237] : memref<32x32xf32, #tpu.memory_space<vmem>>, vector<32x32xf32>
    %cst_238 = arith.constant dense<0.000000e+00> : vector<2x32xf32>
    %467 = tpu.matmul %465, %466, %cst_238 {dimension_numbers = #tpu.dot_dimension_numbers<[1], [0], [0], [1], [0, 0, 1, 1], [], []>} : vector<2x32xf32>, vector<32x32xf32>, vector<2x32xf32> -> vector<2x32xf32>
    %c0_239 = arith.constant 0 : index
    %c0_240 = arith.constant 0 : index
    %468 = vector.load %arg20[%c0_239, %c0_240] : memref<1x32xf32, #tpu.memory_space<vmem>>, vector<1x32xf32>
    %469 = vector.broadcast %468 : vector<1x32xf32> to vector<2x32xf32>
    %470 = arith.addf %467, %469 : vector<2x32xf32>
    %471 = math.tanh %470 : vector<2x32xf32>
    %c0_241 = arith.constant 0 : index
    %c0_242 = arith.constant 0 : index
    %472 = vector.load %arg21[%c0_241, %c0_242] : memref<32x128xf32, #tpu.memory_space<vmem>>, vector<32x128xf32>
    %cst_243 = arith.constant dense<0.000000e+00> : vector<2x128xf32>
    %473 = tpu.matmul %471, %472, %cst_243 {dimension_numbers = #tpu.dot_dimension_numbers<[1], [0], [0], [1], [0, 0, 1, 1], [], []>} : vector<2x32xf32>, vector<32x128xf32>, vector<2x128xf32> -> vector<2x128xf32>
    %c0_244 = arith.constant 0 : index
    %c0_245 = arith.constant 0 : index
    %474 = vector.load %arg22[%c0_244, %c0_245] : memref<1x128xf32, #tpu.memory_space<vmem>>, vector<1x128xf32>
    %475 = vector.broadcast %474 : vector<1x128xf32> to vector<2x128xf32>
    %476 = arith.addf %473, %475 : vector<2x128xf32>
    %c0_246 = arith.constant 0 : index
    %c0_247 = arith.constant 0 : index
    %477 = vector.load %arg23[%c0_246, %c0_247] : memref<2x128xf32, #tpu.memory_space<vmem>>, vector<2x128xf32>
    tpu.vector_store %arg23[%c0_246, %c0_247], %476 {strides = array<i32>} : memref<2x128xf32, #tpu.memory_space<vmem>>, vector<2x128xf32>,
    return
  }
}

</mosaic_0001>

<bundles_post_ra>
// kernel: sentiment_classifier.1
= control target key start
LH: loop header
LB: loop body
LE: loop exit
PB: predicated region body
PF: predicated region fallthrough
CT: control target
= control target key end

     0   :  { %s3532_s0 = inlined_call_operand.vmem [shape: s32[2,8], index: 0, kind: input, shape index: {}]   ;;  %s3533_s1 = inlined_call_operand.vmem [shape: s32[2,8], index: 1, kind: input, shape index: {}]   ;;  %s3534_s2 = inlined_call_operand.vmem [shape: f32[64,32], index: 2, kind: input, shape index: {}]   ;;  %s3535_s3 = inlined_call_operand.vmem [shape: f32[16,32], index: 3, kind: input, shape index: {}]   ;;  %s3536_s4 = inlined_call_operand.vmem [shape: f32[2,32], index: 4, kind: input, shape index: {}]   ;;  %s3537_s5 = inlined_call_operand.vmem [shape: f32[1,32], index: 5, kind: input, shape index: {}]   ;;  %s3538_s6 = inlined_call_operand.vmem [shape: f32[1,32], index: 6, kind: input, shape index: {}]   ;;  %s3539_s7 = inlined_call_operand.vmem [shape: f32[2,32,96], index: 7, kind: input, shape index: {}]   ;;  %s3540_s8 = inlined_call_operand.vmem [shape: f32[2,1,96], index: 8, kind: input, shape index: {}]   ;;  %s3541_s9 = inlined_call_operand.vmem [shape: f32[2,32,32], index: 9, kind: input, shape index: {}]   ;;  %s3542_s10 = inlined_call_operand.vmem [shape: f32[2,1,32], index: 10, kind: input, shape index: {}]   ;;  %s3543_s11 = inlined_call_operand.vmem [shape: f32[2,1,32], index: 11, kind: input, shape index: {}]   ;;  %s3544_s12 = inlined_call_operand.vmem [shape: f32[2,1,32], index: 12, kind: input, shape index: {}]   ;;  %s3545_s13 = inlined_call_operand.vmem [shape: f32[2,32,64], index: 13, kind: input, shape index: {}]   ;;  %s3546_s14 = inlined_call_operand.vmem [shape: f32[2,1,64], index: 14, kind: input, shape index: {}]   ;;  %s3547_s15 = inlined_call_operand.vmem [shape: f32[2,64,32], index: 15, kind: input, shape index: {}]   ;;  %s3548_s16 = inlined_call_operand.vmem [shape: f32[2,1,32], index: 16, kind: input, shape index: {}]   ;;  %s3549_s17 = inlined_call_operand.vmem [shape: f32[2,1,32], index: 17, kind: input, shape index: {}]   ;;  %s3550_s18 = inlined_call_operand.vmem [shape: f32[2,1,32], index: 18, kind: input, shape index: {}]   ;;  %s3551_s19 = inlined_call_operand.vmem [shape: f32[32,32], index: 19, kind: input, shape index: {}]   ;;  %s3552_s20 = inlined_call_operand.vmem [shape: f32[1,32], index: 20, kind: input, shape index: {}]   ;;  %s3553_s21 = inlined_call_operand.vmem [shape: f32[32,128], index: 21, kind: input, shape index: {}]   ;;  %s3554_s22 = inlined_call_operand.vmem [shape: f32[1,128], index: 22, kind: input, shape index: {}]   ;;  %s3555_s23 = inlined_call_operand.hbm [shape: f32[2,128], index: 23, kind: output, shape index: {}]  }
   0x1   :  { %3567 = sst [smem:[#allocation9_spill]] %s3532_s0 }
   0x2   :  { %3568 = sst [smem:[#allocation10_spill]] %s3533_s1 }
   0x3   :  { %3569 = sst [smem:[#allocation11_spill]] %s3534_s2 }
   0x4   :  { %3570 = sst [smem:[#allocation12_spill]] %s3535_s3 }
   0x5   :  { %3571 = sst [smem:[#allocation13_spill]] %s3536_s4 }
   0x6   :  { %3572 = sst [smem:[#allocation14_spill]] %s3537_s5 }
   0x7   :  { %3573 = sst [smem:[#allocation15_spill]] %s3538_s6 }
   0x8   :  { %3574 = sst [smem:[#allocation16_spill]] %s3539_s7 }
   0x9   :  { %3575 = sst [smem:[#allocation17_spill]] %s3551_s19 }
   0xa   :  { %3576 = sst [smem:[#allocation18_spill]] %s3552_s20 }
   0xb   :  { %3577 = sst [smem:[#allocation19_spill]] %s3553_s21 }
   0xc   :  { %3578 = sst [smem:[#allocation20_spill]] %s3554_s22 }
   0xd   :  { %3579 = sst [smem:[#allocation21_spill]] %s3555_s23 }
   0xe   :  { %28 = vsyncpa [#allocation5], 0 }
   0xf   :  { %29 = vsyncpa [#allocation4], 0  ;;  %s3580_s24 = sld [smem:[#allocation9_spill]]  ;;  %s2689_s5 = smov [#allocation3]  }
  0x15   :  { %s35_s25 = sshll.u32 %s3580_s24, 4  ;;  %s36_s25 = int_to_ptr.vmem [resolvable:$true] %s35_s25 }
  0x16   :  { %38 = dma.vmem_to_smem %s36_s25, 32, %s2689_s5, [#allocation5]  }
  0x17   :  { %2685 = dma.done.wait [#allocation5], 32  }
  0x18   :  { %2686 = vsyncadd [#allocation5], 4294967264 }
  0x19   :  { %87 = sfence }
  0x1a   :  { %s88_s1 = sld [smem:[#allocation3]]  ;;  %vm91_vm0 = vcmask 253952   ;;  %vm164_vm1 = vcmask 261120   ;;  %v2690_v26 = vmov 32.0   ;;  %vm274_vm9 = vcmask 64512  }
  0x1b   :  { %s2402_s26 = sld [smem:[#allocation3 + $0x1]]  ;;  %2553 = vrcp.f32 %v2690_v26 }
  0x1c   :  { %s2403_s2 = sld [smem:[#allocation3 + $0x2]] }
  0x1d   :  { %s2404_s6 = sld [smem:[#allocation3 + $0x3]] }
  0x1e   :  { %s2405_s27 = sld [smem:[#allocation3 + $0x4]] }
  0x1f   :  { %s2406_s7 = sld [smem:[#allocation3 + $0x5]] }
  0x20   :  { %s3581_s3 = sld [smem:[#allocation11_spill]] }
  0x21   :  { %s2407_s23 = sld [smem:[#allocation3 + $0x6]]  ;;  %v2554_v27 = vpop.eup %2553 }
  0x22   :  { %s2408_s25 = sld [smem:[#allocation3 + $0x7]]  ;;  %v172_v28 = vmul.f32 32.0, %v2554_v27  ;;  %vm176_vm2 = vweird.f32 %v2554_v27 }
  0x23   :  { %s2409_s21 = sld [smem:[#allocation3 + $0x80]] }
  0x24   :  { %s2412_s5 = sld [smem:[#allocation3 + $0x83]]  ;;  %v173_v29 = vsub.f32 1.0, %v172_v28 }
  0x25   :  { %s3582_s19 = sld [smem:[#allocation12_spill]] }
  0x26   :  { %s89_s0 = scalar_lea.vmem %s3581_s3, %s88_s1  ;;  %s94_s24 = scalar_lea.vmem %s3581_s3, %s2402_s26  ;;  %v174_v30 = vmul.f32 %v2554_v27, %v173_v29 }
  0x27   :  { %v90_v0 = vld [vmem:[%s89_s0] sm:$0x1]  ;;  %s98_s20 = scalar_lea.vmem %s3581_s3, %s2403_s2  ;;  %s102_s29 = scalar_lea.vmem %s3581_s3, %s2404_s6 }
  0x28   :  { %92 = vst.msk [vmem:[#allocation2] sm:$0x1] %vm91_vm0, %v90_v0  ;;  %v95_v1 = vld [vmem:[%s94_s24] sm:$0x1]  ;;  %s2410_s0 = sld [smem:[#allocation3 + $0x81]]  ;;  %s106_s30 = scalar_lea.vmem %s3581_s3, %s2405_s27  ;;  %v175_v31 = vadd.f32 %v2554_v27, %v174_v30 }
  0x29   :  { %96 = vst.msk [vmem:[#allocation2 + $0x1] sm:$0x1] %vm91_vm0, %v95_v1  ;;  %v99_v2 = vld [vmem:[%s98_s20] sm:$0x1]  ;;  %s2411_s24 = sld [smem:[#allocation3 + $0x82]]  ;;  %s110_s20 = scalar_lea.vmem %s3581_s3, %s2406_s7 }
  0x2a   :  { %100 = vst.msk [vmem:[#allocation2 + $0x2] sm:$0x1] %vm91_vm0, %v99_v2  ;;  %v103_v3 = vld [vmem:[%s102_s29] sm:$0x1]  ;;  %s114_s1 = scalar_lea.vmem %s3581_s3, %s2407_s23  ;;  %s2413_s29 = sld [smem:[#allocation3 + $0x84]]  ;;  %v2901_v32 = vsel %vm176_vm2, %v2554_v27, %v175_v31 }
  0x2b   :  { %104 = vst.msk [vmem:[#allocation2 + $0x3] sm:$0x1] %vm91_vm0, %v103_v3  ;;  %v107_v4 = vld [vmem:[%s106_s30] sm:$0x1]  ;;  %s118_s4 = scalar_lea.vmem %s3581_s3, %s2408_s25  ;;  %s2414_s30 = sld [smem:[#allocation3 + $0x85]] }
  0x2c   :  { %108 = vst.msk [vmem:[#allocation2 + $0x4] sm:$0x1] %vm91_vm0, %v107_v4  ;;  %v111_v5 = vld [vmem:[%s110_s20] sm:$0x1]  ;;  %s122_s2 = scalar_lea.vmem %s3581_s3, %s2409_s21  ;;  %s2415_s20 = sld [smem:[#allocation3 + $0x86]] }
  0x2d   :  { %112 = vst.msk [vmem:[#allocation2 + $0x5] sm:$0x1] %vm91_vm0, %v111_v5  ;;  %v115_v6 = vld [vmem:[%s114_s1] sm:$0x1]  ;;  %s2416_s1 = sld [smem:[#allocation3 + $0x87]]  ;;  %s134_s7 = scalar_lea.vmem %s3581_s3, %s2412_s5 }
  0x2e   :  { %116 = vst.msk [vmem:[#allocation2 + $0x6] sm:$0x1] %vm91_vm0, %v115_v6  ;;  %v119_v7 = vld [vmem:[%s118_s4] sm:$0x1]  ;;  %s126_s28 = scalar_lea.vmem %s3581_s3, %s2410_s0  ;;  %s3583_s25 = sld [smem:[#allocation13_spill]] }
  0x2f   :  { %120 = vst.msk [vmem:[#allocation2 + $0x7] sm:$0x1] %vm91_vm0, %v119_v7  ;;  %v123_v8 = vld [vmem:[%s122_s2] sm:$0x1]  ;;  %s130_s26 = scalar_lea.vmem %s3581_s3, %s2411_s24  ;;  %s3585_s27 = sld [smem:[#allocation14_spill]] }
  0x30   :  { %124 = vst.msk [vmem:[#allocation2 + $0x8] sm:$0x1] %vm91_vm0, %v123_v8  ;;  %v127_v9 = vld [vmem:[%s126_s28] sm:$0x1]  ;;  %s138_s6 = scalar_lea.vmem %s3581_s3, %s2413_s29  ;;  %s2691_s29 = smov 72  }
  0x31   :  { %128 = vst.msk [vmem:[#allocation2 + $0x9] sm:$0x1] %vm91_vm0, %v127_v9  ;;  %v131_v10 = vld [vmem:[%s130_s26] sm:$0x1]  ;;  %s142_s26 = scalar_lea.vmem %s3581_s3, %s2414_s30  ;;  %s2695_s30 = smov 96  }
  0x32   :  { %v153_v11 = vld [vmem:[%s3582_s19] sm:$0xff]  ;;  %132 = vst.msk [vmem:[#allocation2 + $0xa] sm:$0x1] %vm91_vm0, %v131_v10  ;;  %s146_s4 = scalar_lea.vmem %s3581_s3, %s2415_s20  ;;  %s3584_s20 = sld [smem:[#allocation16_spill]] }
  0x33   :  { %v135_v12 = vld [vmem:[%s134_s7] sm:$0x1]  ;;  %s150_s22 = scalar_lea.vmem %s3581_s3, %s2416_s1  ;;  %s3586_s19 = sld [smem:[#allocation15_spill]] }
  0x34   :  { %v2532_v13 = vld [vmem:[%s3583_s25] ss:$0 sm:$0xff]  ;;  %136 = vst.msk [vmem:[#allocation2 + $0xb] sm:$0x1] %vm91_vm0, %v135_v12  ;;  %s2692_s7 = smov 120   ;;  %s3563_s3 = smov 64  }
  0x35   :  { %v139_v14 = vld [vmem:[%s138_s6] sm:$0x1]  ;;  %s2696_s1 = smov 104   ;;  %s2697_s2 = smov 80  }
  0x36   :  { %140 = vst.msk [vmem:[#allocation2 + $0xc] sm:$0x1] %vm91_vm0, %v139_v14  ;;  %v143_v15 = vld [vmem:[%s142_s26] sm:$0x1]  ;;  %s2698_s0 = smov 112   ;;  %s3561_s23 = smov 56  }
  0x37   :  { %144 = vst.msk [vmem:[#allocation2 + $0xd] sm:$0x1] %vm91_vm0, %v143_v15  ;;  %v147_v16 = vld [vmem:[%s146_s4] sm:$0x1]  ;;  %s3587_s24 = sld [smem:[#allocation10_spill]]  ;;  %s2700_s25 = smov 40  }
  0x38   :  { %v154_v17 = vld [vmem:[#allocation2] sm:$0xff]  ;;  %148 = vst.msk [vmem:[#allocation2 + $0xe] sm:$0x1] %vm91_vm0, %v147_v16  ;;  %v237_v43 = vld [vmem:[%s3584_s20 + $0x18] sm:$0xff]  ;;  %v236_v44 = vld [vmem:[%s3584_s20 + $0x10] sm:$0xff]  ;;  %s2703_s21 = smov 16  }
  0x39   :  { %v151_v18 = vld [vmem:[%s150_s22] sm:$0x1]  ;;  %v156_v19 = vadd.f32 %v154_v17, %v153_v11  ;;  %260 = vmatpush.msra.mxu0 %v237_v43  ;;  %v235_v45 = vld [vmem:[%s3584_s20 + $0x8] sm:$0xff]  ;;  %s2693_s22 = smov 88   ;;  %s2704_s4 = smov 8  }
  0x3a   :  { %152 = vst.msk [vmem:[#allocation2 + $0xf] sm:$0x1] %vm91_vm0, %v151_v18  ;;  %v234_v46 = vld [vmem:[%s3584_s20] sm:$0xff]  ;;  %s3591_s6 = sld [smem:[#allocation17_spill]] }
  0x3b   :  { %v160_v20 = vadd.f32 %v2532_v13, %v156_v19  ;;  %261 = vmatpush.msra.mxu0 %v236_v44  ;;  %v2533_v61 = vld [vmem:[%s3585_s27] ss:$0 sm:$0xff]  ;;  %s3565_s27 = smov 48  }
  0x3c   :  { %v2534_v1 = vld [vmem:[%s3586_s19] ss:$0 sm:$0xff]  ;;  %s2702_s19 = smov 24  }
  0x3d   :  { %v165_v21 = vsel %vm164_vm1, %v160_v20, 0.0  ;;  %262 = vmatpush.msra.mxu0 %v235_v45  ;;  %v226_v26 = vld [vmem:[%s3587_s24] sm:$0x1] }
  0x3e   :  { %166 = vadd.xlane.f32.xlu0 %v165_v21  ;;  %v227_v27 = vcvt.s32.f32 %v226_v26 }
  0x3f   :  { %263 = vmatpush.msra.mxu0 %v234_v46 }
  0x40   :  { %v228_v28 = vsub.f32 1.0, %v227_v27 }
  0x41   :  { %v155_v22 = vld [vmem:[#allocation2 + $0x8] sm:$0xff] }
  0x42   :  { %v157_v23 = vadd.f32 %v155_v22, %v153_v11  ;;  %v2535_v11 = vld [vmem:[%s3540_s8] ss:$0 sm:$0xff]  ;;  %v229_v29 = vmul.f32 -1e+09, %v228_v28 }
  0x44   :  { %v161_v24 = vadd.f32 %v2532_v13, %v157_v23  ;;  %v2975_v30 = vperm.slane %v229_v29, 0 }
  0x46   :  { %v168_v25 = vsel %vm164_vm1, %v161_v24, 0.0 }
  0x47   :  { %169 = vadd.xlane.f32.xlu1 %v168_v25 }
  0xb1   :  { %v167_v33 = vpop.xlane.xlu0 %166 }
  0xb2   :  { %v178_v34 = vmul.f32 %v2901_v32, %v167_v33 }
  0xb4   :  { %v180_v35 = vsub.f32 %v160_v20, %v178_v34 }
  0xb6   :  { %v182_v36 = vmul.f32 %v180_v35, %v180_v35 }
  0xb8   :  { %v184_v37 = vsel %vm164_vm1, %v182_v36, 0.0 }
  0xb9   :  { %185 = vadd.xlane.f32.xlu0 %v184_v37 }
  0xba   :  { %v170_v38 = vpop.xlane.xlu1 %169 }
  0xbb   :  { %v179_v39 = vmul.f32 %v2901_v32, %v170_v38 }
  0xbd   :  { %v181_v40 = vsub.f32 %v161_v24, %v179_v39 }
  0xbf   :  { %v183_v41 = vmul.f32 %v181_v40, %v181_v40 }
  0xc1   :  { %v187_v42 = vsel %vm164_vm1, %v183_v41, 0.0 }
  0xc2   :  { %188 = vadd.xlane.f32.xlu1 %v187_v42 }
 0x12c   :  { %v186_v47 = vpop.xlane.xlu0 %185 }
 0x12d   :  { %v190_v48 = vmul.f32 %v186_v47, %v2901_v32 }
 0x12f   :  { %v192_v49 = vadd.f32 1e-12, %v190_v48 }
 0x131   :  { %2555 = vrsqrt.f32 %v192_v49  ;;  %vm200_vm4 = vweird.f32 %v192_v49 }
 0x135   :  { %v189_v50 = vpop.xlane.xlu1 %188 }
 0x136   :  { %v191_v51 = vmul.f32 %v189_v50, %v2901_v32 }
 0x137   :  { %v2556_v52 = vpop.eup %2555 }
 0x138   :  { %v193_v53 = vadd.f32 1e-12, %v191_v51  ;;  %v195_v54 = vmul.f32 %v2556_v52, %v192_v49  ;;  %vm201_vm3 = vweird.f32 %v2556_v52 }
 0x139   :  { %vm202_vm5 = vmor %vm200_vm4, %vm201_vm3 }
 0x13a   :  { %2557 = vrsqrt.f32 %v193_v53  ;;  %v196_v55 = vmul.f32 %v2556_v52, %v195_v54  ;;  %vm210_vm6 = vweird.f32 %v193_v53 }
 0x13c   :  { %v197_v56 = vmul.f32 0.5, %v196_v55 }
 0x13e   :  { %v198_v57 = vsub.f32 1.5, %v197_v56 }
 0x140   :  { %v2558_v58 = vpop.eup %2557  ;;  %v199_v59 = vmul.f32 %v2556_v52, %v198_v57 }
 0x141   :  { %v205_v60 = vmul.f32 %v2558_v58, %v193_v53  ;;  %vm211_vm7 = vweird.f32 %v2558_v58 }
 0x142   :  { %v203_v62 = vsel %vm202_vm5, %v2556_v52, %v199_v59  ;;  %vm212_vm8 = vmor %vm210_vm6, %vm211_vm7 }
 0x143   :  { %v206_v63 = vmul.f32 %v2558_v58, %v205_v60  ;;  %v214_v0 = vmul.f32 %v203_v62, %v180_v35 }
 0x145   :  { %v207_v2 = vmul.f32 0.5, %v206_v63  ;;  %v219_v3 = vmul.f32 %v2533_v61, %v214_v0 }
 0x147   :  { %v208_v4 = vsub.f32 1.5, %v207_v2  ;;  %v2927_v5 = vadd.f32 %v2534_v1, %v219_v3 }
 0x149   :  { %v209_v6 = vmul.f32 %v2558_v58, %v208_v4  ;;  %2417 = vmatmul.msk.f32.vlgmr.msra.gmra.mxu0 %vm164_vm1, %v2927_v5 }
 0x14b   :  { %v213_v7 = vsel %vm212_vm8, %v2558_v58, %v209_v6 }
 0x14c   :  { %v215_v8 = vmul.f32 %v213_v7, %v181_v40 }
 0x14e   :  { %v220_v9 = vmul.f32 %v2533_v61, %v215_v8 }
 0x150   :  { %v2931_v10 = vadd.f32 %v2534_v1, %v220_v9 }
 0x152   :  { %2418 = vmatmul.msk.f32.gmra.mxu0 %vm164_vm1, %v2931_v10 }
 0x1c6   :  { %v265_v12 = vpop.f32.mrf.mxu0 }
 0x1c7   :  { %v2938_v13 = vadd.f32 %v2535_v11, %v265_v12 }
 0x1c9   :  { %357 = vrot.lane.b32.xlu1 %v2938_v13, %s2691_s29  ;;  %299 = vrot.lane.b32.xlu0 %v2938_v13, %s2692_s7 }
 0x1ca   :  { %301 = vrot.lane.b32.xlu2 %v2938_v13, %s2693_s22 }
 0x1cf   :  { %v268_v14 = vpop.f32.mrf.mxu0 }
 0x1d0   :  { %v2950_v15 = vadd.f32 %v2535_v11, %v268_v14 }
 0x1d1   :  { %488 = vrot.lane.b32.xlu0 %v2938_v13, %s3563_s3 }
 0x1d2   :  { %272 = vrot.lane.b32.xlu2 %v2938_v13, %s2695_s30  ;;  %610 = vrot.lane.b32.xlu1 %v2950_v15, %s2695_s30 }
 0x1da   :  { %355 = vrot.lane.b32.xlu2 %v2938_v13, %s2696_s1 }
 0x1e2   :  { %329 = vrot.lane.b32.xlu2 %v2938_v13, %s2697_s2 }
 0x1ea   :  { %327 = vrot.lane.b32.xlu2 %v2938_v13, %s2698_s0 }
 0x1f2   :  { %514 = vrot.lane.b32.xlu2 %v2938_v13, %s3561_s23 }
 0x224   :  { %v302_v16 = vpop.permute.xlu2 %301 }
 0x225   :  { %2421 = vmatpush.xpose.msk.msrb.mxu0 %vm274_vm9, %v302_v16 }
 0x22c   :  { %v273_v17 = vpop.permute.xlu2 %272 }
 0x22d   :  { %2419 = vmatpush.xpose.msk.msra.mxu1 %vm274_vm9, %v273_v17 }
 0x230   :  { %2420 = vmatmul.msk.f32.vlgmr.msra.gmra.mxu1 %vm274_vm9, %v2938_v13 }
 0x234   :  { %v356_v18 = vpop.permute.xlu2 %355 }
 0x23b   :  { %v358_v19 = vpop.permute.xlu1 %357  ;;  %v300_v20 = vpop.permute.xlu0 %299 }
 0x23c   :  { %v330_v21 = vpop.permute.xlu2 %329  ;;  %2422 = vmatmul.msk.f32.vlgmr.msrb.gmra.mxu0 %vm274_vm9, %v300_v20  ;;  %2425 = vmatpush.xpose.msk.msrb.mxu1 %vm274_vm9, %v358_v19 }
 0x23d   :  { %2423 = vmatpush.xpose.msk.msra.mxu3 %vm274_vm9, %v330_v21 }
 0x23f   :  { %2426 = vmatmul.msk.f32.vlgmr.msrb.gmra.mxu1 %vm274_vm9, %v356_v18 }
 0x243   :  { %v489_v22 = vpop.permute.xlu0 %488 }
 0x244   :  { %v328_v23 = vpop.permute.xlu2 %327  ;;  %509 = vmatpush.msra.mxu2 %v489_v22  ;;  %v611_v24 = vpop.permute.xlu1 %610 }
 0x245   :  { %2424 = vmatmul.msk.f32.vlgmr.msra.gmra.mxu3 %vm274_vm9, %v328_v23 }
 0x24c   :  { %v515_v25 = vpop.permute.xlu2 %514 }
 0x24d   :  { %535 = vmatpush.msrb.mxu3 %v515_v25 }
 0x24f   :  { %2431 = vmatpush.xpose.msk.msra.mxu3 %vm274_vm9, %v611_v24 }
 0x2ad   :  { %v296_v31 = vpop.f32.mrf.mxu1 }
 0x2ae   :  { %v383_v33 = vmul.f32 0.35355338, %v296_v31 }
 0x2b0   :  { %v388_v34 = vadd.f32 %v2975_v30, %v383_v33 }
 0x2b2   :  { %v392_v35 = vsel %vm274_vm9, %v388_v34, -inf }
 0x2b3   :  { %393 = vmax.xlane.f32.xlu2 %v392_v35 }
 0x2b9   :  { %v324_v36 = vpop.f32.mrf.mxu0 }
 0x2ba   :  { %v384_v37 = vmul.f32 0.35355338, %v324_v36 }
 0x2bc   :  { %v380_v38 = vpop.f32.mrf.mxu1  ;;  %v389_v39 = vadd.f32 %v2975_v30, %v384_v37 }
 0x2bd   :  { %v386_v40 = vmul.f32 0.35355338, %v380_v38 }
 0x2be   :  { %v395_v41 = vsel %vm274_vm9, %v389_v39, -inf }
 0x2bf   :  { %396 = vmax.xlane.f32.xlu0 %v395_v41  ;;  %v391_v42 = vadd.f32 %v2975_v30, %v386_v40 }
 0x2c1   :  { %v401_v43 = vsel %vm274_vm9, %v391_v42, -inf }
 0x2c2   :  { %402 = vmax.xlane.f32.xlu1 %v401_v43 }
 0x2c8   :  { %v352_v44 = vpop.f32.mrf.mxu3 }
 0x2c9   :  { %v385_v45 = vmul.f32 0.35355338, %v352_v44 }
 0x2cb   :  { %566 = vrot.lane.b32.xlu2 %v2938_v13, %s2700_s25  ;;  %v390_v46 = vadd.f32 %v2975_v30, %v385_v45 }
 0x2cd   :  { %v398_v47 = vsel %vm274_vm9, %v390_v46, -inf }
 0x2d3   :  { %694 = vrot.lane.b32.xlu0 %v2950_v15, %s2691_s29 }
 0x2db   :  { %638 = vrot.lane.b32.xlu1 %v2950_v15, %s2693_s22 }
 0x2fd   :  { %399 = vmax.xlane.f32.xlu0 %v398_v47 }
 0x311   :  { %540 = vrot.lane.b32.xlu0 %v2938_v13, %s3565_s27 }
 0x326   :  { %v394_v48 = vpop.xlane.xlu2 %393 }
 0x327   :  { %v404_v49 = vsub.f32 %v388_v34, %v394_v48 }
 0x329   :  { %v408_v50 = vmul.f32 1.442695, %v404_v49 }
 0x32b   :  { %2559 = vpow2.f32 %v408_v50 }
 0x32e   :  { %v567_v51 = vpop.permute.xlu2 %566 }
 0x32f   :  { %587 = vmatpush.msrb.mxu2 %v567_v51 }
 0x331   :  { %v2560_v52 = vpop.eup %2559 }
 0x332   :  { %v397_v53 = vpop.xlane.xlu0 %396  ;;  %v416_v54 = vsel %vm274_vm9, %v2560_v52, 0.0 }
 0x333   :  { %v405_v55 = vsub.f32 %v389_v39, %v397_v53  ;;  %417 = vadd.xlane.f32.xlu1 %v416_v54 }
 0x335   :  { %v410_v56 = vmul.f32 1.442695, %v405_v55  ;;  %v403_v57 = vpop.xlane.xlu1 %402 }
 0x336   :  { %v407_v58 = vsub.f32 %v391_v42, %v403_v57 }
 0x337   :  { %2561 = vpow2.f32 %v410_v56 }
 0x338   :  { %v414_v59 = vmul.f32 1.442695, %v407_v58 }
 0x33a   :  { %2563 = vpow2.f32 %v414_v59 }
 0x33d   :  { %v2994_v60 = vpop.eup %2561 }
 0x33e   :  { %v419_v61 = vsel %vm274_vm9, %v2994_v60, 0.0 }
 0x33f   :  { %420 = vadd.xlane.f32.xlu2 %v419_v61 }
 0x340   :  { %v2998_v62 = vpop.eup %2563 }
 0x341   :  { %v425_v63 = vsel %vm274_vm9, %v2998_v62, 0.0 }
 0x342   :  { %426 = vadd.xlane.f32.xlu0 %v425_v63 }
 0x345   :  { %v695_v1 = vpop.permute.xlu0 %694 }
 0x34d   :  { %v639_v0 = vpop.permute.xlu1 %638 }
 0x34e   :  { %2433 = vmatpush.xpose.msk.msra.mxu0 %vm274_vm9, %v639_v0 }
 0x356   :  { %636 = vrot.lane.b32.xlu0 %v2950_v15, %s2692_s7 }
 0x357   :  { %692 = vrot.lane.b32.xlu2 %v2950_v15, %s2696_s1 }
 0x35f   :  { %666 = vrot.lane.b32.xlu2 %v2950_v15, %s2697_s2 }
 0x370   :  { %v400_v2 = vpop.xlane.xlu0 %399 }
 0x371   :  { %v406_v3 = vsub.f32 %v390_v46, %v400_v2 }
 0x373   :  { %v412_v4 = vmul.f32 1.442695, %v406_v3 }
 0x375   :  { %2565 = vpow2.f32 %v412_v4 }
 0x37b   :  { %v3009_v6 = vpop.eup %2565 }
 0x37c   :  { %v422_v7 = vsel %vm274_vm9, %v3009_v6, 0.0 }
 0x37d   :  { %423 = vadd.xlane.f32.xlu1 %v422_v7 }
 0x383   :  { %v541_v8 = vpop.permute.xlu0 %540 }
 0x384   :  { %561 = vmatpush.msra.mxu1 %v541_v8 }
 0x396   :  { %664 = vrot.lane.b32.xlu1 %v2950_v15, %s2698_s0 }
 0x3a6   :  { %v418_v9 = vpop.xlane.xlu1 %417 }
 0x3a7   :  { %2567 = vrcp.f32 %v418_v9  ;;  %v439_v16 = vand.u32 2147483648, %v418_v9  ;;  %v437_v18 = vand.u32 2147483647, %v418_v9  ;;  %vm433_vm11 = vweird.f32 %v418_v9 }
 0x3a9   :  { %v440_v21 = vor.u32 1.1754944e-38, %v439_v16  ;;  %vm438_vm13 = vcmp.eq.f32.partialorder %v437_v18, 8.507059e+37 }
 0x3ad   :  { %v2568_v11 = vpop.eup %2567 }
 0x3ae   :  { %v429_v12 = vmul.f32 %v2568_v11, %v418_v9  ;;  %vm434_vm10 = vweird.f32 %v2568_v11 }
 0x3af   :  { %vm435_vm12 = vmor %vm433_vm11, %vm434_vm10 }
 0x3b0   :  { %v430_v13 = vsub.f32 1.0, %v429_v12 }
 0x3b2   :  { %v431_v14 = vmul.f32 %v2568_v11, %v430_v13  ;;  %v421_v17 = vpop.xlane.xlu2 %420 }
 0x3b3   :  { %2569 = vrcp.f32 %v421_v17  ;;  %v454_v31 = vand.u32 2147483648, %v421_v17  ;;  %v452_v35 = vand.u32 2147483647, %v421_v17  ;;  %vm448_vm15 = vweird.f32 %v421_v17 }
 0x3b4   :  { %v432_v19 = vadd.f32 %v2568_v11, %v431_v14 }
 0x3b5   :  { %v427_v20 = vpop.xlane.xlu0 %426  ;;  %v455_v39 = vor.u32 1.1754944e-38, %v454_v31  ;;  %vm453_vm3 = vcmp.eq.f32.partialorder %v452_v35, 8.507059e+37 }
 0x3b6   :  { %2571 = vrcp.f32 %v427_v20  ;;  %v436_v22 = vsel %vm435_vm12, %v2568_v11, %v432_v19  ;;  %v484_v38 = vand.u32 2147483648, %v427_v20  ;;  %v482_v41 = vand.u32 2147483647, %v427_v20 }
 0x3b7   :  { %v441_v23 = vsel %vm438_vm13, %v440_v21, %v436_v22  ;;  %vm478_vm4 = vweird.f32 %v427_v20 }
 0x3b8   :  { %v442_v25 = vmul.f32 %v2560_v52, %v441_v23  ;;  %v485_v46 = vor.u32 1.1754944e-38, %v484_v38  ;;  %vm483_vm6 = vcmp.eq.f32.partialorder %v482_v41, 8.507059e+37 }
 0x3b9   :  { %v2570_v24 = vpop.eup %2569 }
 0x3ba   :  { %v444_v26 = vmul.f32 %v2570_v24, %v421_v17  ;;  %v693_v27 = vpop.permute.xlu2 %692  ;;  %2427 = vmatmul.msk.f32.vlgmr.msra.gmra.mxu2 %vm274_vm9, %v442_v25  ;;  %vm449_vm14 = vweird.f32 %v2570_v24 }
 0x3bb   :  { %2437 = vmatpush.xpose.msk.msra.mxu2 %vm274_vm9, %v695_v1  ;;  %vm450_vm0 = vmor %vm448_vm15, %vm449_vm14  ;;  %v230_v1 = vld [vmem:[%s3587_s24 + $0x1] sm:$0x1] }
 0x3bc   :  { %v2572_v28 = vpop.eup %2571  ;;  %v445_v29 = vsub.f32 1.0, %v444_v26  ;;  %v231_v2 = vcvt.s32.f32 %v230_v1 }
 0x3bd   :  { %v474_v33 = vmul.f32 %v2572_v28, %v427_v20  ;;  %vm479_vm2 = vweird.f32 %v2572_v28 }
 0x3be   :  { %v446_v34 = vmul.f32 %v2570_v24, %v445_v29  ;;  %vm480_vm5 = vmor %vm478_vm4, %vm479_vm2  ;;  %v232_v3 = vsub.f32 1.0, %v231_v2 }
 0x3bf   :  { %v475_v36 = vsub.f32 1.0, %v474_v33 }
 0x3c0   :  { %v447_v37 = vadd.f32 %v2570_v24, %v446_v34  ;;  %v233_v4 = vmul.f32 -1e+09, %v232_v3 }
 0x3c1   :  { %v476_v40 = vmul.f32 %v2572_v28, %v475_v36 }
 0x3c2   :  { %v667_v42 = vpop.permute.xlu2 %666  ;;  %v451_v43 = vsel %vm450_vm0, %v2570_v24, %v447_v37  ;;  %v3034_v8 = vperm.slane %v233_v4, 0 }
 0x3c3   :  { %v477_v44 = vadd.f32 %v2572_v28, %v476_v40  ;;  %2435 = vmatpush.xpose.msk.msrb.mxu1 %vm274_vm9, %v667_v42  ;;  %v456_v45 = vsel %vm453_vm3, %v455_v39, %v451_v43 }
 0x3c4   :  { %v457_v47 = vmul.f32 %v2994_v60, %v456_v45 }
 0x3c5   :  { %v481_v48 = vsel %vm480_vm5, %v2572_v28, %v477_v44  ;;  %vm605_vm5 = vcmask 130048  }
 0x3c6   :  { %2428 = vmatmul.msk.f32.vlgmr.msrb.gmra.mxu3 %vm274_vm9, %v457_v47  ;;  %v486_v49 = vsel %vm483_vm6, %v485_v46, %v481_v48  ;;  %vm607_vm6 = vcmask 195584  }
 0x3c7   :  { %v487_v50 = vmul.f32 %v2998_v62, %v486_v49 }
 0x3c8   :  { %v637_v51 = vpop.permute.xlu0 %636 }
 0x3c9   :  { %2430 = vmatmul.msk.f32.vlgmr.msrb.gmra.mxu2 %vm274_vm9, %v487_v50  ;;  %2434 = vmatmul.msk.f32.vlgmr.msra.gmra.mxu0 %vm274_vm9, %v637_v51 }
 0x3ce   :  { %2432 = vmatmul.msk.f32.vlgmr.msra.gmra.mxu3 %vm274_vm9, %v2950_v15 }
 0x3d1   :  { %2438 = vmatmul.msk.f32.vlgmr.msra.gmra.mxu2 %vm274_vm9, %v693_v27 }
 0x3f0   :  { %v424_v52 = vpop.xlane.xlu1 %423 }
 0x3f1   :  { %2573 = vrcp.f32 %v424_v52  ;;  %v469_v56 = vand.u32 2147483648, %v424_v52  ;;  %v467_v58 = vand.u32 2147483647, %v424_v52  ;;  %vm463_vm8 = vweird.f32 %v424_v52 }
 0x3f3   :  { %v470_v60 = vor.u32 1.1754944e-38, %v469_v56  ;;  %vm468_vm11 = vcmp.eq.f32.partialorder %v467_v58, 8.507059e+37 }
 0x3f7   :  { %v2574_v53 = vpop.eup %2573 }
 0x3f8   :  { %v459_v54 = vmul.f32 %v2574_v53, %v424_v52  ;;  %vm464_vm7 = vweird.f32 %v2574_v53  ;;  %v947_v52 = vld [vmem:[%s3541_s9 + $0x18] sm:$0xff] }
 0x3f9   :  { %vm465_vm10 = vmor %vm463_vm8, %vm464_vm7 }
 0x3fa   :  { %v460_v55 = vsub.f32 1.0, %v459_v54 }
 0x3fc   :  { %v461_v57 = vmul.f32 %v2574_v53, %v460_v55  ;;  %v945_v55 = vld [vmem:[%s3541_s9 + $0x8] sm:$0xff] }
 0x3fe   :  { %v462_v59 = vadd.f32 %v2574_v53, %v461_v57 }
 0x400   :  { %v466_v61 = vsel %vm465_vm10, %v2574_v53, %v462_v59  ;;  %v946_v53 = vld [vmem:[%s3541_s9 + $0x10] sm:$0xff] }
 0x401   :  { %v471_v62 = vsel %vm468_vm11, %v470_v60, %v466_v61 }
 0x402   :  { %v472_v63 = vmul.f32 %v3009_v6, %v471_v62 }
 0x404   :  { %2429 = vmatmul.msk.f32.vlgmr.msra.gmra.mxu1 %vm274_vm9, %v472_v63 }
 0x408   :  { %v665_v0 = vpop.permute.xlu1 %664 }
 0x40c   :  { %2436 = vmatmul.msk.f32.vlgmr.msrb.gmra.mxu1 %vm274_vm9, %v665_v0 }
 0x43d   :  { %v3032_v7 = vpop.f32.mrf.mxu2 }
 0x446   :  { %v661_v9 = vpop.f32.mrf.mxu0 }
 0x447   :  { %v721_v11 = vmul.f32 0.35355338, %v661_v9 }
 0x449   :  { %v537_v12 = vpop.f32.mrf.mxu3  ;;  %v726_v6 = vadd.f32 %v3034_v8, %v721_v11 }
 0x44b   :  { %v732_v13 = vsel %vm274_vm9, %v726_v6, -inf }
 0x44c   :  { %733 = vmax.xlane.f32.xlu1 %v732_v13  ;;  %v589_v14 = vpop.f32.mrf.mxu2 }
 0x451   :  { %v633_v16 = vpop.f32.mrf.mxu3 }
 0x452   :  { %v720_v17 = vmul.f32 0.35355338, %v633_v16 }
 0x454   :  { %v717_v18 = vpop.f32.mrf.mxu2  ;;  %v725_v19 = vadd.f32 %v3034_v8, %v720_v17 }
 0x455   :  { %v723_v20 = vmul.f32 0.35355338, %v717_v18 }
 0x456   :  { %v729_v21 = vsel %vm274_vm9, %v725_v19, -inf }
 0x457   :  { %730 = vmax.xlane.f32.xlu2 %v729_v21  ;;  %v728_v22 = vadd.f32 %v3034_v8, %v723_v20 }
 0x459   :  { %v738_v23 = vsel %vm274_vm9, %v728_v22, -inf }
 0x45a   :  { %739 = vmax.xlane.f32.xlu0 %v738_v23 }
 0x465   :  { %825 = vrot.lane.b32.xlu1 %v2950_v15, %s3563_s3 }
 0x46d   :  { %601 = vrot.lane.b32.xlu1 %v589_v14, %s2702_s19 }
 0x481   :  { %v563_v24 = vpop.f32.mrf.mxu1 }
 0x482   :  { %597 = vrot.lane.b32.xlu0 %v563_v24, %s2703_s21 }
 0x489   :  { %v689_v25 = vpop.f32.mrf.mxu1 }
 0x48a   :  { %v722_v26 = vmul.f32 0.35355338, %v689_v25 }
 0x48c   :  { %v727_v27 = vadd.f32 %v3034_v8, %v722_v26 }
 0x48e   :  { %v735_v28 = vsel %vm274_vm9, %v727_v27, -inf }
 0x48f   :  { %736 = vmax.xlane.f32.xlu2 %v735_v28 }
 0x4bf   :  { %v734_v29 = vpop.xlane.xlu1 %733 }
 0x4c0   :  { %v742_v31 = vsub.f32 %v726_v6, %v734_v29 }
 0x4c2   :  { %v747_v33 = vmul.f32 1.442695, %v742_v31 }
 0x4c4   :  { %2575 = vpow2.f32 %v747_v33 }
 0x4ca   :  { %v2576_v34 = vpop.eup %2575  ;;  %v731_v35 = vpop.xlane.xlu2 %730 }
 0x4cb   :  { %v741_v36 = vsub.f32 %v725_v19, %v731_v35  ;;  %v756_v37 = vsel %vm274_vm9, %v2576_v34, 0.0 }
 0x4cc   :  { %757 = vadd.xlane.f32.xlu2 %v756_v37 }
 0x4cd   :  { %v745_v38 = vmul.f32 1.442695, %v741_v36  ;;  %v740_v39 = vpop.xlane.xlu0 %739 }
 0x4ce   :  { %v744_v40 = vsub.f32 %v728_v22, %v740_v39 }
 0x4cf   :  { %2577 = vpow2.f32 %v745_v38 }
 0x4d0   :  { %v751_v41 = vmul.f32 1.442695, %v744_v40 }
 0x4d2   :  { %2579 = vpow2.f32 %v751_v41 }
 0x4d5   :  { %v3049_v42 = vpop.eup %2577 }
 0x4d6   :  { %v753_v43 = vsel %vm274_vm9, %v3049_v42, 0.0 }
 0x4d7   :  { %v826_v44 = vpop.permute.xlu1 %825  ;;  %754 = vadd.xlane.f32.xlu0 %v753_v43 }
 0x4d8   :  { %v3053_v45 = vpop.eup %2579  ;;  %846 = vmatpush.msrb.mxu3 %v826_v44 }
 0x4d9   :  { %v762_v46 = vsel %vm274_vm9, %v3053_v45, 0.0 }
 0x4da   :  { %763 = vadd.xlane.f32.xlu1 %v762_v46  ;;  %970 = vmatpush.msra.mxu3 %v947_v52 }
 0x4dc   :  { %971 = vmatpush.msra.mxu3 %v946_v53 }
 0x4de   :  { %972 = vmatpush.msra.mxu3 %v945_v55 }
 0x4df   :  { %v602_v14 = vpop.permute.xlu1 %601 }
 0x4e4   :  { %593 = vrot.lane.b32.xlu2 %v537_v12, %s2704_s4 }
 0x4ec   :  { %851 = vrot.lane.b32.xlu2 %v2950_v15, %s3561_s23 }
 0x4f3   :  { %877 = vrot.lane.b32.xlu1 %v2950_v15, %s3565_s27  ;;  %s3595_s27 = sld [smem:[#allocation21_spill]] }
 0x4f4   :  { %v598_v56 = vpop.permute.xlu0 %597 }
 0x502   :  { %v737_v47 = vpop.xlane.xlu2 %736 }
 0x503   :  { %v743_v48 = vsub.f32 %v727_v27, %v737_v47 }
 0x505   :  { %v749_v49 = vmul.f32 1.442695, %v743_v48 }
 0x507   :  { %2581 = vpow2.f32 %v749_v49 }
 0x50d   :  { %v3062_v50 = vpop.eup %2581 }
 0x50e   :  { %v759_v51 = vsel %vm274_vm9, %v3062_v50, 0.0 }
 0x50f   :  { %760 = vadd.xlane.f32.xlu0 %v759_v51 }
 0x523   :  { %903 = vrot.lane.b32.xlu0 %v2950_v15, %s2700_s25  ;;  %v944_v15 = vld [vmem:[%s3541_s9] sm:$0xff] }
 0x524   :  { %973 = vmatpush.msra.mxu3 %v944_v15 }
 0x53f   :  { %v758_v54 = vpop.xlane.xlu2 %757 }
 0x540   :  { %2583 = vrcp.f32 %v758_v54  ;;  %v791_v61 = vand.u32 2147483648, %v758_v54  ;;  %v789_v0 = vand.u32 2147483647, %v758_v54  ;;  %vm785_vm13 = vweird.f32 %v758_v54 }
 0x542   :  { %v792_v2 = vor.u32 1.1754944e-38, %v791_v61  ;;  %vm790_vm15 = vcmp.eq.f32.partialorder %v789_v0, 8.507059e+37 }
 0x546   :  { %v2584_v57 = vpop.eup %2583 }
 0x547   :  { %v781_v58 = vmul.f32 %v2584_v57, %v758_v54  ;;  %v594_v59 = vpop.permute.xlu2 %593  ;;  %vm786_vm12 = vweird.f32 %v2584_v57 }
 0x548   :  { %vm787_vm14 = vmor %vm785_vm13, %vm786_vm12  ;;  %v604_v25 = vsel %vm274_vm9, %v3032_v7, %v594_v59 }
 0x549   :  { %v782_v60 = vsub.f32 1.0, %v781_v58  ;;  %v606_v26 = vsel %vm605_vm5, %v604_v25, %v598_v56 }
 0x54a   :  { %v755_v62 = vpop.xlane.xlu0 %754  ;;  %v608_v28 = vsel %vm607_vm6, %v606_v26, %v602_v14  ;;  %v1040_v14 = vld [vmem:[%s3545_s13 + $0x8] sm:$0xff]  ;;  %v3122_v26 = vld [vmem:[%s3543_s11] ss:$0 sm:$0xff] }
 0x54b   :  { %v783_v63 = vmul.f32 %v2584_v57, %v782_v60  ;;  %2585 = vrcp.f32 %v755_v62  ;;  %v776_v16 = vand.u32 2147483648, %v755_v62  ;;  %v774_v18 = vand.u32 2147483647, %v755_v62 }
 0x54c   :  { %vm770_vm2 = vweird.f32 %v755_v62 }
 0x54d   :  { %v784_v1 = vadd.f32 %v2584_v57, %v783_v63  ;;  %v777_v20 = vor.u32 1.1754944e-38, %v776_v16  ;;  %vm775_vm4 = vcmp.eq.f32.partialorder %v774_v18, 8.507059e+37  ;;  %v764_v24 = vpop.xlane.xlu1 %763  ;;  %v1039_v16 = vld [vmem:[%s3545_s13] sm:$0xff] }
 0x54e   :  { %2587 = vrcp.f32 %v764_v24  ;;  %v821_v7 = vand.u32 2147483648, %v764_v24  ;;  %vm815_vm8 = vweird.f32 %v764_v24  ;;  %v819_v40 = vand.u32 2147483647, %v764_v24 }
 0x54f   :  { %v788_v3 = vsel %vm787_vm14, %v2584_v57, %v784_v1  ;;  %v852_v4 = vpop.permute.xlu2 %851  ;;  %v2536_v57 = vld [vmem:[%s3542_s10] ss:$0 sm:$0xff] }
 0x550   :  { %v793_v9 = vsel %vm790_vm15, %v792_v2, %v788_v3  ;;  %872 = vmatpush.msrb.mxu0 %v852_v4  ;;  %v822_v46 = vor.u32 1.1754944e-38, %v821_v7  ;;  %vm820_vm13 = vcmp.eq.f32.partialorder %v819_v40, 8.507059e+37 }
 0x551   :  { %v2586_v11 = vpop.eup %2585  ;;  %v794_v12 = vmul.f32 %v2576_v34, %v793_v9 }
 0x552   :  { %v766_v6 = vmul.f32 %v2586_v11, %v755_v62  ;;  %vm771_vm0 = vweird.f32 %v2586_v11 }
 0x553   :  { %2440 = vmatmul.msk.f32.vlgmr.msrb.gmra.mxu0 %vm274_vm9, %v794_v12  ;;  %vm772_vm3 = vmor %vm770_vm2, %vm771_vm0 }
 0x554   :  { %v767_v13 = vsub.f32 1.0, %v766_v6  ;;  %v2588_v29 = vpop.eup %2587  ;;  %v1042_v6 = vld [vmem:[%s3545_s13 + $0x18] sm:$0xff] }
 0x555   :  { %v811_v31 = vmul.f32 %v2588_v29, %v764_v24  ;;  %vm816_vm7 = vweird.f32 %v2588_v29  ;;  %1065 = vmatpush.msra.mxu0 %v1042_v6 }
 0x556   :  { %v768_v17 = vmul.f32 %v2586_v11, %v767_v13  ;;  %vm817_vm10 = vmor %vm815_vm8, %vm816_vm7  ;;  %v1041_v13 = vld [vmem:[%s3545_s13 + $0x10] sm:$0xff] }
 0x557   :  { %v812_v34 = vsub.f32 1.0, %v811_v31  ;;  %1066 = vmatpush.msra.mxu0 %v1041_v13 }
 0x558   :  { %v769_v19 = vadd.f32 %v2586_v11, %v768_v17 }
 0x559   :  { %v813_v35 = vmul.f32 %v2588_v29, %v812_v34  ;;  %1067 = vmatpush.msra.mxu0 %v1040_v14 }
 0x55a   :  { %v773_v21 = vsel %vm772_vm3, %v2586_v11, %v769_v19 }
 0x55b   :  { %v778_v22 = vsel %vm775_vm4, %v777_v20, %v773_v21  ;;  %v814_v38 = vadd.f32 %v2588_v29, %v813_v35  ;;  %1068 = vmatpush.msra.mxu0 %v1039_v16 }
 0x55c   :  { %v779_v23 = vmul.f32 %v3049_v42, %v778_v22 }
 0x55d   :  { %v818_v44 = vsel %vm817_vm10, %v2588_v29, %v814_v38  ;;  %v3127_v29 = vld [vmem:[%s3544_s12] ss:$0 sm:$0xff] }
 0x55e   :  { %2439 = vmatmul.msk.f32.vlgmr.msrb.gmra.mxu3 %vm274_vm9, %v779_v23  ;;  %v823_v49 = vsel %vm820_vm13, %v822_v46, %v818_v44  ;;  %v3140_v38 = vld [vmem:[%s3546_s14] ss:$0 sm:$0xff] }
 0x55f   :  { %v824_v55 = vmul.f32 %v3053_v45, %v823_v49 }
 0x565   :  { %v878_v27 = vpop.permute.xlu1 %877 }
 0x566   :  { %898 = vmatpush.msra.mxu1 %v878_v27  ;;  %2443 = vmatmul.msk.f32.vlgmr.msra.gmra.mxu3 %vm164_vm1, %v608_v28 }
 0x582   :  { %v761_v33 = vpop.xlane.xlu0 %760 }
 0x583   :  { %2589 = vrcp.f32 %v761_v33  ;;  %v806_v41 = vand.u32 2147483648, %v761_v33  ;;  %v804_v43 = vand.u32 2147483647, %v761_v33  ;;  %vm800_vm12 = vweird.f32 %v761_v33 }
 0x585   :  { %v807_v48 = vor.u32 1.1754944e-38, %v806_v41  ;;  %vm805_vm15 = vcmp.eq.f32.partialorder %v804_v43, 8.507059e+37 }
 0x589   :  { %v2590_v36 = vpop.eup %2589 }
 0x58a   :  { %v796_v37 = vmul.f32 %v2590_v36, %v761_v33  ;;  %vm801_vm11 = vweird.f32 %v2590_v36 }
 0x58b   :  { %vm802_vm14 = vmor %vm800_vm12, %vm801_vm11  ;;  %vm1176_vm11 = vcmask 523264  }
 0x58c   :  { %v797_v39 = vsub.f32 1.0, %v796_v37 }
 0x58e   :  { %v798_v42 = vmul.f32 %v2590_v36, %v797_v39 }
 0x590   :  { %v799_v47 = vadd.f32 %v2590_v36, %v798_v42 }
 0x592   :  { %v803_v51 = vsel %vm802_vm14, %v2590_v36, %v799_v47  ;;  %v1171_v47 = vld [vmem:[%s3547_s15 + $0x38] sm:$0xff] }
 0x593   :  { %v808_v52 = vsel %vm805_vm15, %v807_v48, %v803_v51  ;;  %1191 = vmatpush.msrb.mxu1 %v1171_v47 }
 0x594   :  { %v809_v53 = vmul.f32 %v3062_v50, %v808_v52  ;;  %v1170_v52 = vld [vmem:[%s3547_s15 + $0x30] sm:$0xff] }
 0x595   :  { %v904_v54 = vpop.permute.xlu0 %903  ;;  %1192 = vmatpush.msrb.mxu1 %v1170_v52 }
 0x596   :  { %2441 = vmatmul.msk.f32.vlgmr.msra.gmra.mxu1 %vm274_vm9, %v809_v53  ;;  %924 = vmatpush.msrb.mxu2 %v904_v54 }
 0x597   :  { %2442 = vmatmul.msk.f32.vlgmr.msrb.gmra.mxu2 %vm274_vm9, %v824_v55 }
 0x5d0   :  { %v874_v56 = vpop.f32.mrf.mxu0 }
 0x5d1   :  { %930 = vrot.lane.b32.xlu0 %v874_v56, %s2704_s4  ;;  %v1169_v56 = vld [vmem:[%s3547_s15 + $0x28] sm:$0xff] }
 0x5d2   :  { %1193 = vmatpush.msrb.mxu1 %v1169_v56 }
 0x5e1   :  { %v848_v15 = vpop.f32.mrf.mxu3 }
 0x5e9   :  { %v975_v58 = vpop.f32.mrf.mxu3 }
 0x5ea   :  { %v976_v59 = vadd.f32 %v2536_v57, %v975_v58  ;;  %v1168_v58 = vld [vmem:[%s3547_s15 + $0x20] sm:$0xff] }
 0x5eb   :  { %1194 = vmatpush.msrb.mxu1 %v1168_v58 }
 0x5ec   :  { %v981_v50 = vadd.f32 %v976_v59, %v2927_v5 }
 0x5ee   :  { %v985_v60 = vsel %vm164_vm1, %v981_v50, 0.0 }
 0x5fb   :  { %986 = vadd.xlane.f32.xlu0 %v985_v60  ;;  %v1167_v60 = vld [vmem:[%s3547_s15 + $0x18] sm:$0xff] }
 0x5fc   :  { %1195 = vmatpush.msrb.mxu1 %v1167_v60 }
 0x613   :  { %v900_v45 = vpop.f32.mrf.mxu1 }
 0x614   :  { %934 = vrot.lane.b32.xlu2 %v900_v45, %s2703_s21 }
 0x61a   :  { %v926_v61 = vpop.f32.mrf.mxu2 }
 0x61b   :  { %938 = vrot.lane.b32.xlu1 %v926_v61, %s2702_s19  ;;  %v1166_v61 = vld [vmem:[%s3547_s15 + $0x10] sm:$0xff] }
 0x61c   :  { %1196 = vmatpush.msrb.mxu1 %v1166_v61 }
 0x643   :  { %v931_v62 = vpop.permute.xlu0 %930 }
 0x644   :  { %v941_v5 = vsel %vm274_vm9, %v848_v15, %v931_v62 }
 0x66e   :  { %v987_v63 = vpop.xlane.xlu0 %986  ;;  %v935_v4 = vpop.permute.xlu2 %934 }
 0x66f   :  { %v991_v0 = vmul.f32 %v987_v63, %v2901_v32  ;;  %v942_v9 = vsel %vm605_vm5, %v941_v5, %v935_v4  ;;  %v1165_v63 = vld [vmem:[%s3547_s15 + $0x8] sm:$0xff] }
 0x670   :  { %1197 = vmatpush.msrb.mxu1 %v1165_v63 }
 0x671   :  { %v993_v1 = vsub.f32 %v981_v50, %v991_v0 }
 0x673   :  { %v995_v2 = vmul.f32 %v993_v1, %v993_v1 }
 0x675   :  { %v997_v3 = vsel %vm164_vm1, %v995_v2, 0.0 }
 0x676   :  { %998 = vadd.xlane.f32.xlu2 %v997_v3 }
 0x68d   :  { %v939_v11 = vpop.permute.xlu1 %938 }
 0x68e   :  { %v943_v12 = vsel %vm607_vm6, %v942_v9, %v939_v11 }
 0x68f   :  { %2444 = vmatmul.msk.f32.gmra.mxu3 %vm164_vm1, %v943_v12 }
 0x6e9   :  { %v999_v17 = vpop.xlane.xlu2 %998 }
 0x6ea   :  { %v1003_v18 = vmul.f32 %v999_v17, %v2901_v32 }
 0x6ec   :  { %v1005_v19 = vadd.f32 1e-12, %v1003_v18 }
 0x6ee   :  { %2591 = vrsqrt.f32 %v1005_v19  ;;  %vm1013_vm2 = vweird.f32 %v1005_v19 }
 0x6f4   :  { %v2592_v20 = vpop.eup %2591 }
 0x6f5   :  { %v1008_v21 = vmul.f32 %v2592_v20, %v1005_v19  ;;  %vm1014_vm0 = vweird.f32 %v2592_v20 }
 0x6f6   :  { %vm1015_vm3 = vmor %vm1013_vm2, %vm1014_vm0 }
 0x6f7   :  { %v1009_v22 = vmul.f32 %v2592_v20, %v1008_v21 }
 0x6f9   :  { %v1010_v23 = vmul.f32 0.5, %v1009_v22 }
 0x6fb   :  { %v1011_v24 = vsub.f32 1.5, %v1010_v23 }
 0x6fd   :  { %v1012_v25 = vmul.f32 %v2592_v20, %v1011_v24 }
 0x6ff   :  { %v1016_v27 = vsel %vm1015_vm3, %v2592_v20, %v1012_v25 }
 0x700   :  { %v1027_v28 = vmul.f32 %v1016_v27, %v993_v1  ;;  %v1164_v1 = vld [vmem:[%s3547_s15] sm:$0xff] }
 0x701   :  { %1198 = vmatpush.msrb.mxu1 %v1164_v1 }
 0x702   :  { %v1032_v31 = vmul.f32 %v3122_v26, %v1027_v28 }
 0x704   :  { %v3131_v33 = vadd.f32 %v3127_v29, %v1032_v31 }
 0x706   :  { %2445 = vmatmul.msk.f32.vlgmr.msra.gmra.mxu0 %vm164_vm1, %v3131_v33 }
 0x712   :  { %v978_v34 = vpop.f32.mrf.mxu3 }
 0x713   :  { %v979_v35 = vadd.f32 %v2536_v57, %v978_v34 }
 0x715   :  { %v982_v36 = vadd.f32 %v979_v35, %v2931_v10 }
 0x717   :  { %v988_v37 = vsel %vm164_vm1, %v982_v36, 0.0 }
 0x718   :  { %989 = vadd.xlane.f32.xlu1 %v988_v37 }
 0x783   :  { %v1070_v7 = vpop.f32.mrf.mxu0 }
 0x784   :  { %v3143_v39 = vadd.f32 %v3140_v38, %v1070_v7 }
 0x786   :  { %v1078_v40 = vmul.f32 0.70710677, %v3143_v39  ;;  %v1076_v28 = vmul.f32 0.5, %v3143_v39 }
 0x788   :  { %v1080_v41 = vmul.f32 %v1078_v40, %v1078_v40 }
 0x78a   :  { %v1081_v42 = vmin.f32 %v1080_v41, 16.0 }
 0x78b   :  { %v990_v43 = vpop.xlane.xlu1 %989 }
 0x78c   :  { %v1082_v44 = vmul.f32 2.1237322e-06, %v1081_v42  ;;  %v1093_v46 = vmul.f32 3.8918573e-05, %v1081_v42  ;;  %v992_v10 = vmul.f32 %v990_v43, %v2901_v32 }
 0x78e   :  { %v1083_v48 = vadd.f32 0.00028619796, %v1082_v44  ;;  %v1094_v49 = vadd.f32 0.001143296, %v1093_v46  ;;  %v3150_v51 = vsub.f32 %v982_v36, %v992_v10 }
 0x790   :  { %v1084_v53 = vmul.f32 %v1083_v48, %v1081_v42  ;;  %v1095_v54 = vmul.f32 %v1094_v49, %v1081_v42  ;;  %v996_v55 = vmul.f32 %v3150_v51, %v3150_v51  ;;  %v3189_v48 = vld [vmem:[%s3548_s16] ss:$0 sm:$0xff] }
 0x792   :  { %v1096_v15 = vadd.f32 0.014752088, %v1095_v54  ;;  %v1000_v57 = vsel %vm164_vm1, %v996_v55, 0.0  ;;  %v1085_v59 = vadd.f32 0.0036580483, %v1084_v53 }
 0x793   :  { %1001 = vadd.xlane.f32.xlu0 %v1000_v57 }
 0x794   :  { %v1097_v50 = vmul.f32 %v1096_v15, %v1081_v42  ;;  %v1086_v62 = vmul.f32 %v1085_v59, %v1081_v42 }
 0x796   :  { %v1098_v45 = vadd.f32 0.112945676, %v1097_v50  ;;  %v1087_v3 = vadd.f32 0.05243302, %v1086_v62 }
 0x798   :  { %v1099_v0 = vmul.f32 %v1098_v45, %v1081_v42  ;;  %v1088_v9 = vmul.f32 %v1087_v3, %v1081_v42 }
 0x79a   :  { %v1100_v2 = vadd.f32 0.4994258, %v1099_v0  ;;  %v1089_v11 = vadd.f32 0.18741608, %v1088_v9 }
 0x79c   :  { %v1101_v4 = vmul.f32 %v1100_v2, %v1081_v42  ;;  %v1090_v6 = vmul.f32 %v1089_v11, %v1081_v42 }
 0x79e   :  { %v1102_v5 = vadd.f32 1.0, %v1101_v4  ;;  %v1091_v17 = vadd.f32 1.1283791, %v1090_v6 }
 0x7a0   :  { %2593 = vrcp.f32 %v1102_v5  ;;  %v1114_v16 = vand.u32 2147483648, %v1102_v5  ;;  %v1112_v19 = vand.u32 2147483647, %v1102_v5  ;;  %vm1108_vm7 = vweird.f32 %v1102_v5 }
 0x7a1   :  { %v1092_v22 = vmul.f32 %v1091_v17, %v1078_v40 }
 0x7a2   :  { %v1115_v21 = vor.u32 1.1754944e-38, %v1114_v16  ;;  %vm1113_vm10 = vcmp.eq.f32.partialorder %v1112_v19, 8.507059e+37 }
 0x7a6   :  { %v2594_v12 = vpop.eup %2593 }
 0x7a7   :  { %v1104_v13 = vmul.f32 %v2594_v12, %v1102_v5  ;;  %vm1109_vm4 = vweird.f32 %v2594_v12 }
 0x7a8   :  { %vm1110_vm8 = vmor %vm1108_vm7, %vm1109_vm4 }
 0x7a9   :  { %v1105_v14 = vsub.f32 1.0, %v1104_v13 }
 0x7ab   :  { %v1106_v18 = vmul.f32 %v2594_v12, %v1105_v14 }
 0x7ad   :  { %v1107_v20 = vadd.f32 %v2594_v12, %v1106_v18 }
 0x7af   :  { %v1111_v23 = vsel %vm1110_vm8, %v2594_v12, %v1107_v20 }
 0x7b0   :  { %v1116_v24 = vsel %vm1113_vm10, %v1115_v21, %v1111_v23 }
 0x7b1   :  { %v1117_v25 = vmul.f32 %v1116_v24, %v1092_v22 }
 0x7b3   :  { %v2447_v27 = vclamps-f32 %v1117_v25, 1.0 }
 0x7b5   :  { %v1160_v31 = vadd.f32 1.0, %v2447_v27 }
 0x7b7   :  { %v1162_v34 = vmul.f32 %v1160_v31, %v1076_v28 }
 0x7b9   :  { %2449 = vmatmul.msk.f32.vlgmr.msrb.gmra.mxu1 %vm1176_vm11, %v1162_v34 }
 0x806   :  { %v1002_v35 = vpop.xlane.xlu0 %1001 }
 0x807   :  { %v1004_v36 = vmul.f32 %v1002_v35, %v2901_v32 }
 0x809   :  { %v1006_v37 = vadd.f32 1e-12, %v1004_v36 }
 0x80b   :  { %2595 = vrsqrt.f32 %v1006_v37  ;;  %vm1023_vm13 = vweird.f32 %v1006_v37 }
 0x811   :  { %v2596_v7 = vpop.eup %2595 }
 0x812   :  { %v1018_v41 = vmul.f32 %v2596_v7, %v1006_v37  ;;  %vm1024_vm12 = vweird.f32 %v2596_v7 }
 0x813   :  { %vm1025_vm14 = vmor %vm1023_vm13, %vm1024_vm12 }
 0x814   :  { %v1019_v40 = vmul.f32 %v2596_v7, %v1018_v41  ;;  %v2453_v41 = vld [vmem:[%s3584_s20 + $0x30] sm:$0xff] }
 0x816   :  { %v1020_v42 = vmul.f32 0.5, %v1019_v40  ;;  %v2452_v40 = vld [vmem:[%s3584_s20 + $0x28] sm:$0xff] }
 0x818   :  { %v1021_v43 = vsub.f32 1.5, %v1020_v42  ;;  %v2451_v42 = vld [vmem:[%s3584_s20 + $0x20] sm:$0xff] }
 0x81a   :  { %v1022_v44 = vmul.f32 %v2596_v7, %v1021_v43 }
 0x81c   :  { %v1026_v39 = vsel %vm1025_vm14, %v2596_v7, %v1022_v44  ;;  %v2454_v7 = vld [vmem:[%s3584_s20 + $0x38] sm:$0xff] }
 0x81d   :  { %v1028_v46 = vmul.f32 %v1026_v39, %v3150_v51  ;;  %1292 = vmatpush.msra.mxu2 %v2454_v7 }
 0x81f   :  { %v1033_v10 = vmul.f32 %v3122_v26, %v1028_v46  ;;  %1293 = vmatpush.msra.mxu2 %v2453_v41 }
 0x821   :  { %v3182_v47 = vadd.f32 %v3127_v29, %v1033_v10  ;;  %1294 = vmatpush.msra.mxu2 %v2452_v40 }
 0x823   :  { %2446 = vmatmul.msk.f32.gmra.mxu0 %vm164_vm1, %v3182_v47  ;;  %1295 = vmatpush.msra.mxu2 %v2451_v42 }
 0x836   :  { %v1200_v49 = vpop.f32.mrf.mxu1 }
 0x837   :  { %v1201_v52 = vadd.f32 %v3189_v48, %v1200_v49 }
 0x839   :  { %v1206_v53 = vadd.f32 %v1201_v52, %v3131_v33 }
 0x83b   :  { %v1210_v51 = vsel %vm164_vm1, %v1206_v53, 0.0 }
 0x83c   :  { %1211 = vadd.xlane.f32.xlu2 %v1210_v51 }
 0x8a0   :  { %v1073_v26 = vpop.f32.mrf.mxu0 }
 0x8a1   :  { %v1074_v29 = vadd.f32 %v3140_v38, %v1073_v26  ;;  %v3214_v26 = vld [vmem:[%s3549_s17] ss:$0 sm:$0xff] }
 0x8a3   :  { %v1079_v54 = vmul.f32 0.70710677, %v1074_v29  ;;  %v1077_v35 = vmul.f32 0.5, %v1074_v29 }
 0x8a5   :  { %v1120_v55 = vmul.f32 %v1079_v54, %v1079_v54 }
 0x8a7   :  { %v1121_v56 = vmin.f32 %v1120_v55, 16.0  ;;  %v2542_v55 = vld [vmem:[%s3550_s18] ss:$0 sm:$0xff] }
 0x8a9   :  { %v1122_v15 = vmul.f32 2.1237322e-06, %v1121_v56  ;;  %v1133_v57 = vmul.f32 3.8918573e-05, %v1121_v56 }
 0x8ab   :  { %v1123_v58 = vadd.f32 0.00028619796, %v1122_v15  ;;  %v1134_v59 = vadd.f32 0.001143296, %v1133_v57 }
 0x8ad   :  { %v1124_v50 = vmul.f32 %v1123_v58, %v1121_v56  ;;  %v1135_v60 = vmul.f32 %v1134_v59, %v1121_v56 }
 0x8af   :  { %v1136_v45 = vadd.f32 0.014752088, %v1135_v60  ;;  %v1212_v61 = vpop.xlane.xlu2 %1211  ;;  %v1125_v62 = vadd.f32 0.0036580483, %v1124_v50  ;;  %v3230_v60 = vld [vmem:[%s3540_s8 + $0x1] ss:$0 sm:$0xff] }
 0x8b0   :  { %v1216_v33 = vmul.f32 %v1212_v61, %v2901_v32  ;;  %s3588_s8 = smov 48  }
 0x8b1   :  { %v1137_v63 = vmul.f32 %v1136_v45, %v1121_v56  ;;  %v1126_v2 = vmul.f32 %v1125_v62, %v1121_v56 }
 0x8b2   :  { %v1218_v0 = vsub.f32 %v1206_v53, %v1216_v33 }
 0x8b3   :  { %v1138_v1 = vadd.f32 0.112945676, %v1137_v63  ;;  %v1127_v9 = vadd.f32 0.05243302, %v1126_v2 }
 0x8b4   :  { %v1220_v3 = vmul.f32 %v1218_v0, %v1218_v0 }
 0x8b5   :  { %v1139_v38 = vmul.f32 %v1138_v1, %v1121_v56  ;;  %v1128_v6 = vmul.f32 %v1127_v9, %v1121_v56 }
 0x8b6   :  { %v1222_v4 = vsel %vm164_vm1, %v1220_v3, 0.0 }
 0x8b7   :  { %v1140_v5 = vadd.f32 0.4994258, %v1139_v38  ;;  %1223 = vadd.xlane.f32.xlu1 %v1222_v4  ;;  %v1129_v13 = vadd.f32 0.18741608, %v1128_v6 }
 0x8b9   :  { %v1141_v11 = vmul.f32 %v1140_v5, %v1121_v56  ;;  %v1130_v16 = vmul.f32 %v1129_v13, %v1121_v56 }
 0x8bb   :  { %v1142_v12 = vadd.f32 1.0, %v1141_v11  ;;  %v1131_v20 = vadd.f32 1.1283791, %v1130_v16 }
 0x8bd   :  { %2597 = vrcp.f32 %v1142_v12  ;;  %v1154_v19 = vand.u32 2147483648, %v1142_v12  ;;  %v1152_v22 = vand.u32 2147483647, %v1142_v12  ;;  %vm1148_vm0 = vweird.f32 %v1142_v12 }
 0x8be   :  { %v1132_v25 = vmul.f32 %v1131_v20, %v1079_v54 }
 0x8bf   :  { %v1155_v24 = vor.u32 1.1754944e-38, %v1154_v19  ;;  %vm1153_vm3 = vcmp.eq.f32.partialorder %v1152_v22, 8.507059e+37 }
 0x8c3   :  { %v2598_v14 = vpop.eup %2597 }
 0x8c4   :  { %v1144_v17 = vmul.f32 %v2598_v14, %v1142_v12  ;;  %vm1149_vm15 = vweird.f32 %v2598_v14 }
 0x8c5   :  { %vm1150_vm2 = vmor %vm1148_vm0, %vm1149_vm15 }
 0x8c6   :  { %v1145_v18 = vsub.f32 1.0, %v1144_v17 }
 0x8c8   :  { %v1146_v21 = vmul.f32 %v2598_v14, %v1145_v18 }
 0x8ca   :  { %v1147_v23 = vadd.f32 %v2598_v14, %v1146_v21 }
 0x8cc   :  { %v1151_v27 = vsel %vm1150_vm2, %v2598_v14, %v1147_v23 }
 0x8cd   :  { %v1156_v28 = vsel %vm1153_vm3, %v1155_v24, %v1151_v27 }
 0x8ce   :  { %v1157_v31 = vmul.f32 %v1156_v28, %v1132_v25 }
 0x8d0   :  { %v2448_v34 = vclamps-f32 %v1157_v31, 1.0 }
 0x8d2   :  { %v1161_v36 = vadd.f32 1.0, %v2448_v34 }
 0x8d4   :  { %v1163_v37 = vmul.f32 %v1161_v36, %v1077_v35 }
 0x8d6   :  { %2450 = vmatmul.msk.f32.gmra.mxu1 %vm1176_vm11, %v1163_v37 }
 0x92a   :  { %v1224_v43 = vpop.xlane.xlu1 %1223 }
 0x92b   :  { %v1228_v44 = vmul.f32 %v1224_v43, %v2901_v32 }
 0x92d   :  { %v1230_v39 = vadd.f32 1e-12, %v1228_v44 }
 0x92f   :  { %2599 = vrsqrt.f32 %v1230_v39  ;;  %vm1238_vm7 = vweird.f32 %v1230_v39 }
 0x935   :  { %v2600_v46 = vpop.eup %2599 }
 0x936   :  { %v1233_v10 = vmul.f32 %v2600_v46, %v1230_v39  ;;  %vm1239_vm4 = vweird.f32 %v2600_v46 }
 0x937   :  { %vm1240_vm8 = vmor %vm1238_vm7, %vm1239_vm4 }
 0x938   :  { %v1234_v49 = vmul.f32 %v2600_v46, %v1233_v10 }
 0x93a   :  { %v1235_v52 = vmul.f32 0.5, %v1234_v49 }
 0x93c   :  { %v1236_v53 = vsub.f32 1.5, %v1235_v52 }
 0x93e   :  { %v1237_v51 = vmul.f32 %v2600_v46, %v1236_v53 }
 0x940   :  { %v1241_v29 = vsel %vm1240_vm8, %v2600_v46, %v1237_v51 }
 0x941   :  { %v1252_v54 = vmul.f32 %v1241_v29, %v1218_v0 }
 0x943   :  { %v1257_v56 = vmul.f32 %v3214_v26, %v1252_v54 }
 0x945   :  { %v3220_v15 = vadd.f32 %v2542_v55, %v1257_v56 }
 0x947   :  { %2456 = vmatmul.msk.f32.vlgmr.msra.gmra.mxu2 %vm164_vm1, %v3220_v15 }
 0x953   :  { %v1203_v57 = vpop.f32.mrf.mxu1 }
 0x954   :  { %v1204_v58 = vadd.f32 %v3189_v48, %v1203_v57 }
 0x956   :  { %v1207_v59 = vadd.f32 %v1204_v58, %v3182_v47 }
 0x958   :  { %v1213_v50 = vsel %vm164_vm1, %v1207_v59, 0.0 }
 0x959   :  { %1214 = vadd.xlane.f32.xlu0 %v1213_v50 }
 0x9ca   :  { %v1297_v45 = vpop.f32.mrf.mxu2 }
 0x9cb   :  { %v3233_v61 = vadd.f32 %v3230_v60, %v1297_v45 }
 0x9cc   :  { %v1215_v62 = vpop.xlane.xlu0 %1214 }
 0x9cd   :  { %v1217_v33 = vmul.f32 %v1215_v62, %v2901_v32  ;;  %1360 = vrot.lane.b32.xlu0 %v3233_v61, %s2697_s2  ;;  %1304 = vrot.lane.b32.xlu1 %v3233_v61, %s2695_s30 }
 0x9cf   :  { %v1219_v47 = vsub.f32 %v1207_v59, %v1217_v33 }
 0x9d1   :  { %v1221_v48 = vmul.f32 %v1219_v47, %v1219_v47 }
 0x9d3   :  { %v1225_v63 = vsel %vm164_vm1, %v1221_v48, 0.0 }
 0x9d4   :  { %1226 = vadd.xlane.f32.xlu2 %v1225_v63 }
 0x9d5   :  { %1358 = vrot.lane.b32.xlu0 %v3233_v61, %s2698_s0  ;;  %1386 = vrot.lane.b32.xlu1 %v3233_v61, %s2696_s1 }
 0x9dd   :  { %1330 = vrot.lane.b32.xlu0 %v3233_v61, %s2692_s7 }
 0x9e5   :  { %1596 = vrot.lane.b32.xlu0 %v3233_v61, %s2700_s25 }
 0x9ec   :  { %1388 = vrot.lane.b32.xlu2 %v3233_v61, %s2691_s29 }
 0x9f4   :  { %1332 = vrot.lane.b32.xlu2 %v3233_v61, %s2693_s22 }
 0x9fc   :  { %1570 = vrot.lane.b32.xlu2 %v3233_v61, %s3588_s8 }
 0xa3f   :  { %v1361_v0 = vpop.permute.xlu0 %1360  ;;  %v1305_v1 = vpop.permute.xlu1 %1304 }
 0xa40   :  { %2458 = vmatpush.xpose.msk.msrb.mxu3 %vm274_vm9, %v1305_v1  ;;  %2462 = vmatpush.xpose.msk.msrb.mxu2 %vm274_vm9, %v1361_v0 }
 0xa43   :  { %2459 = vmatmul.msk.f32.vlgmr.msrb.gmra.mxu3 %vm274_vm9, %v3233_v61 }
 0xa47   :  { %v1359_v2 = vpop.permute.xlu0 %1358  ;;  %v1227_v3 = vpop.xlane.xlu2 %1226 }
 0xa48   :  { %v1229_v38 = vmul.f32 %v1227_v3, %v2901_v32  ;;  %v1387_v12 = vpop.permute.xlu1 %1386 }
 0xa4a   :  { %v1231_v4 = vadd.f32 1e-12, %v1229_v38 }
 0xa4c   :  { %2601 = vrsqrt.f32 %v1231_v4  ;;  %vm1248_vm12 = vweird.f32 %v1231_v4 }
 0xa4f   :  { %v1331_v5 = vpop.permute.xlu0 %1330  ;;  %v1389_v9 = vpop.permute.xlu2 %1388 }
 0xa50   :  { %2464 = vmatpush.xpose.msk.msra.mxu3 %vm274_vm9, %v1389_v9 }
 0xa52   :  { %v2602_v11 = vpop.eup %2601 }
 0xa53   :  { %v1243_v6 = vmul.f32 %v2602_v11, %v1231_v4  ;;  %2465 = vmatmul.msk.f32.vlgmr.msra.gmra.mxu3 %vm274_vm9, %v1387_v12  ;;  %vm1249_vm10 = vweird.f32 %v2602_v11 }
 0xa54   :  { %vm1250_vm13 = vmor %vm1248_vm12, %vm1249_vm10 }
 0xa55   :  { %v1244_v13 = vmul.f32 %v2602_v11, %v1243_v6 }
 0xa57   :  { %v1597_v14 = vpop.permute.xlu0 %1596  ;;  %v1245_v16 = vmul.f32 0.5, %v1244_v13  ;;  %v1333_v17 = vpop.permute.xlu2 %1332 }
 0xa58   :  { %1617 = vmatpush.msrb.mxu3 %v1597_v14  ;;  %2460 = vmatpush.xpose.msk.msrb.mxu0 %vm274_vm9, %v1333_v17 }
 0xa59   :  { %v1246_v18 = vsub.f32 1.5, %v1245_v16 }
 0xa5b   :  { %v1247_v19 = vmul.f32 %v2602_v11, %v1246_v18  ;;  %2461 = vmatmul.msk.f32.vlgmr.msrb.gmra.mxu0 %vm274_vm9, %v1331_v5 }
 0xa5d   :  { %v1251_v20 = vsel %vm1250_vm13, %v2602_v11, %v1247_v19 }
 0xa5e   :  { %v1253_v21 = vmul.f32 %v1251_v20, %v1219_v47 }
 0xa5f   :  { %v1571_v22 = vpop.permute.xlu2 %1570 }
 0xa60   :  { %1591 = vmatpush.msra.mxu2 %v1571_v22  ;;  %v1258_v23 = vmul.f32 %v3214_v26, %v1253_v21 }
 0xa62   :  { %v3265_v24 = vadd.f32 %v2542_v55, %v1258_v23 }
 0xa64   :  { %2457 = vmatmul.msk.f32.gmra.mxu2 %vm164_vm1, %v3265_v24 }
 0xa6c   :  { %2463 = vmatmul.msk.f32.vlgmr.msrb.gmra.mxu2 %vm274_vm9, %v1359_v2 }
 0xac6   :  { %v1327_v25 = vpop.f32.mrf.mxu3 }
 0xac7   :  { %v1414_v27 = vmul.f32 0.35355338, %v1327_v25 }
 0xac9   :  { %v1418_v28 = vadd.f32 %v1414_v27, %v2975_v30 }
 0xacb   :  { %v1422_v31 = vsel %vm274_vm9, %v1418_v28, -inf }
 0xacc   :  { %1423 = vmax.xlane.f32.xlu1 %v1422_v31 }
 0xad6   :  { %v1411_v34 = vpop.f32.mrf.mxu3 }
 0xad7   :  { %v1417_v35 = vmul.f32 0.35355338, %v1411_v34 }
 0xad8   :  { %v1355_v36 = vpop.f32.mrf.mxu0 }
 0xad9   :  { %v1415_v37 = vmul.f32 0.35355338, %v1355_v36  ;;  %v1421_v7 = vadd.f32 %v1417_v35, %v2975_v30 }
 0xadb   :  { %v1431_v41 = vsel %vm274_vm9, %v1421_v7, -inf  ;;  %v1419_v40 = vadd.f32 %v1415_v37, %v2975_v30 }
 0xadc   :  { %1432 = vmax.xlane.f32.xlu2 %v1431_v41 }
 0xadd   :  { %v1425_v42 = vsel %vm274_vm9, %v1419_v40, -inf }
 0xade   :  { %1426 = vmax.xlane.f32.xlu0 %v1425_v42 }
 0xae7   :  { %v1300_v43 = vpop.f32.mrf.mxu2 }
 0xae8   :  { %v3277_v39 = vadd.f32 %v3230_v60, %v1300_v43 }
 0xaef   :  { %v1383_v44 = vpop.f32.mrf.mxu2 }
 0xaf0   :  { %v1416_v46 = vmul.f32 0.35355338, %v1383_v44 }
 0xaf2   :  { %1722 = vrot.lane.b32.xlu0 %v3277_v39, %s2691_s29  ;;  %v1420_v10 = vadd.f32 %v1416_v46, %v2975_v30  ;;  %s3589_s29 = smov 64  }
 0xaf4   :  { %1692 = vrot.lane.b32.xlu2 %v3277_v39, %s2698_s0  ;;  %v1428_v49 = vsel %vm274_vm9, %v1420_v10, -inf }
 0xaf5   :  { %1429 = vmax.xlane.f32.xlu1 %v1428_v49 }
 0xafa   :  { %1720 = vrot.lane.b32.xlu0 %v3277_v39, %s2696_s1  ;;  %s3590_s1 = smov 56  }
 0xb0e   :  { %1694 = vrot.lane.b32.xlu1 %v3277_v39, %s2697_s2 }
 0xb3f   :  { %v1424_v58 = vpop.xlane.xlu1 %1423 }
 0xb40   :  { %v1434_v48 = vsub.f32 %v1418_v28, %v1424_v58 }
 0xb42   :  { %v1438_v63 = vmul.f32 1.442695, %v1434_v48 }
 0xb4f   :  { %v1433_v52 = vpop.xlane.xlu2 %1432 }
 0xb50   :  { %v1437_v53 = vsub.f32 %v1421_v7, %v1433_v52 }
 0xb51   :  { %v1427_v51 = vpop.xlane.xlu0 %1426 }
 0xb52   :  { %v1444_v26 = vmul.f32 1.442695, %v1437_v53  ;;  %v1435_v29 = vsub.f32 %v1419_v40, %v1427_v51 }
 0xb54   :  { %2603 = vpow2.f32 %v1444_v26  ;;  %v1440_v54 = vmul.f32 1.442695, %v1435_v29 }
 0xb56   :  { %2605 = vpow2.f32 %v1440_v54 }
 0xb57   :  { %v1693_v19 = vpop.permute.xlu2 %1692 }
 0xb5a   :  { %v2604_v30 = vpop.eup %2603 }
 0xb5b   :  { %v1455_v55 = vsel %vm274_vm9, %v2604_v30, 0.0 }
 0xb5c   :  { %v3290_v56 = vpop.eup %2605  ;;  %1456 = vadd.xlane.f32.xlu0 %v1455_v55 }
 0xb5d   :  { %v1449_v57 = vsel %vm274_vm9, %v3290_v56, 0.0 }
 0xb5e   :  { %1450 = vadd.xlane.f32.xlu1 %v1449_v57 }
 0xb64   :  { %v1723_v59 = vpop.permute.xlu0 %1722 }
 0xb65   :  { %2476 = vmatpush.xpose.msk.msra.mxu3 %vm274_vm9, %v1723_v59 }
 0xb68   :  { %v1430_v50 = vpop.xlane.xlu1 %1429 }
 0xb69   :  { %v1436_v60 = vsub.f32 %v1420_v10, %v1430_v50 }
 0xb6b   :  { %v1442_v45 = vmul.f32 1.442695, %v1436_v60 }
 0xb6c   :  { %v1721_v2 = vpop.permute.xlu0 %1720 }
 0xb6d   :  { %2607 = vpow2.f32 %v1442_v45 }
 0xb6e   :  { %2609 = vpow2.f32 %v1438_v63 }
 0xb70   :  { %1664 = vrot.lane.b32.xlu0 %v3277_v39, %s2692_s7  ;;  %s3592_s7 = sld [smem:[#allocation19_spill]] }
 0xb73   :  { %v3297_v62 = vpop.eup %2607 }
 0xb74   :  { %v1452_v33 = vsel %vm274_vm9, %v3297_v62, 0.0  ;;  %v3310_v0 = vpop.eup %2609 }
 0xb75   :  { %1453 = vadd.xlane.f32.xlu2 %v1452_v33  ;;  %v1446_v1 = vsel %vm274_vm9, %v3310_v0, 0.0 }
 0xb77   :  { %1666 = vrot.lane.b32.xlu1 %v3277_v39, %s2693_s22 }
 0xb78   :  { %1638 = vrot.lane.b32.xlu0 %v3277_v39, %s2695_s30 }
 0xb7f   :  { %1518 = vrot.lane.b32.xlu1 %v3233_v61, %s3589_s29 }
 0xb80   :  { %v1695_v47 = vpop.permute.xlu1 %1694 }
 0xb81   :  { %2474 = vmatpush.xpose.msk.msrb.mxu2 %vm274_vm9, %v1695_v47 }
 0xb8d   :  { %1544 = vrot.lane.b32.xlu2 %v3233_v61, %s3590_s1 }
 0xbb6   :  { %1447 = vadd.xlane.f32.xlu2 %v1446_v1 }
 0xbcf   :  { %v1457_v3 = vpop.xlane.xlu0 %1456 }
 0xbd0   :  { %2611 = vrcp.f32 %v1457_v3  ;;  %v1514_v12 = vand.u32 2147483648, %v1457_v3  ;;  %v1512_v13 = vand.u32 2147483647, %v1457_v3  ;;  %vm1508_vm15 = vweird.f32 %v1457_v3 }
 0xbd1   :  { %v1451_v38 = vpop.xlane.xlu1 %1450 }
 0xbd2   :  { %2613 = vrcp.f32 %v1451_v38  ;;  %v1515_v16 = vor.u32 1.1754944e-38, %v1514_v12  ;;  %vm1513_vm2 = vcmp.eq.f32.partialorder %v1512_v13, 8.507059e+37  ;;  %v1484_v25 = vand.u32 2147483648, %v1451_v38 }
 0xbd3   :  { %vm1478_vm4 = vweird.f32 %v1451_v38  ;;  %v1482_v27 = vand.u32 2147483647, %v1451_v38 }
 0xbd4   :  { %v1485_v36 = vor.u32 1.1754944e-38, %v1484_v25 }
 0xbd5   :  { %vm1483_vm8 = vcmp.eq.f32.partialorder %v1482_v27, 8.507059e+37 }
 0xbd6   :  { %v2612_v4 = vpop.eup %2611 }
 0xbd7   :  { %v1504_v5 = vmul.f32 %v2612_v4, %v1457_v3  ;;  %vm1509_vm14 = vweird.f32 %v2612_v4 }
 0xbd8   :  { %v2614_v9 = vpop.eup %2613  ;;  %vm1510_vm0 = vmor %vm1508_vm15, %vm1509_vm14 }
 0xbd9   :  { %v1505_v11 = vsub.f32 1.0, %v1504_v5  ;;  %v1474_v61 = vmul.f32 %v2614_v9, %v1451_v38  ;;  %vm1479_vm3 = vweird.f32 %v2614_v9 }
 0xbda   :  { %vm1480_vm7 = vmor %vm1478_vm4, %vm1479_vm3 }
 0xbdb   :  { %v1506_v6 = vmul.f32 %v2612_v4, %v1505_v11  ;;  %v1475_v17 = vsub.f32 1.0, %v1474_v61 }
 0xbdd   :  { %v1507_v14 = vadd.f32 %v2612_v4, %v1506_v6  ;;  %v1476_v22 = vmul.f32 %v2614_v9, %v1475_v17 }
 0xbdf   :  { %v1511_v18 = vsel %vm1510_vm0, %v2612_v4, %v1507_v14  ;;  %v1477_v23 = vadd.f32 %v2614_v9, %v1476_v22 }
 0xbe0   :  { %v1516_v20 = vsel %vm1513_vm2, %v1515_v16, %v1511_v18 }
 0xbe1   :  { %v1517_v21 = vmul.f32 %v2604_v30, %v1516_v20  ;;  %v1481_v35 = vsel %vm1480_vm7, %v2614_v9, %v1477_v23 }
 0xbe2   :  { %v1665_v28 = vpop.permute.xlu0 %1664  ;;  %v1486_v37 = vsel %vm1483_vm8, %v1485_v36, %v1481_v35 }
 0xbe3   :  { %2469 = vmatmul.msk.f32.vlgmr.msrb.gmra.mxu3 %vm274_vm9, %v1517_v21  ;;  %v1487_v42 = vmul.f32 %v3290_v56, %v1486_v37 }
 0xbe8   :  { %v1454_v31 = vpop.xlane.xlu2 %1453 }
 0xbe9   :  { %2615 = vrcp.f32 %v1454_v31  ;;  %v1667_v34 = vpop.permute.xlu1 %1666  ;;  %v1499_v10 = vand.u32 2147483648, %v1454_v31  ;;  %v1497_v52 = vand.u32 2147483647, %v1454_v31  ;;  %vm1493_vm12 = vweird.f32 %v1454_v31 }
 0xbea   :  { %v1639_v46 = vpop.permute.xlu0 %1638 }
 0xbeb   :  { %2477 = vmatmul.msk.f32.vlgmr.msra.gmra.mxu3 %vm274_vm9, %v1721_v2  ;;  %v1500_v51 = vor.u32 1.1754944e-38, %v1499_v10  ;;  %vm1498_vm14 = vcmp.eq.f32.partialorder %v1497_v52, 8.507059e+37 }
 0xbef   :  { %v2616_v7 = vpop.eup %2615 }
 0xbf0   :  { %v1489_v41 = vmul.f32 %v2616_v7, %v1454_v31  ;;  %v1545_v40 = vpop.permute.xlu2 %1544  ;;  %vm1494_vm10 = vweird.f32 %v2616_v7 }
 0xbf1   :  { %v1519_v43 = vpop.permute.xlu1 %1518  ;;  %1565 = vmatpush.msra.mxu1 %v1545_v40  ;;  %vm1495_vm13 = vmor %vm1493_vm12, %vm1494_vm10 }
 0xbf2   :  { %v1490_v44 = vsub.f32 1.0, %v1489_v41  ;;  %1539 = vmatpush.msra.mxu0 %v1519_v43  ;;  %2467 = vmatmul.msk.f32.vlgmr.msra.gmra.mxu1 %vm274_vm9, %v1487_v42 }
 0xbf3   :  { %2472 = vmatpush.xpose.msk.msrb.mxu1 %vm274_vm9, %v1667_v34 }
 0xbf4   :  { %2470 = vmatpush.xpose.msk.msrb.mxu0 %vm274_vm9, %v1639_v46  ;;  %v1491_v49 = vmul.f32 %v2616_v7, %v1490_v44 }
 0xbf6   :  { %v1492_v53 = vadd.f32 %v2616_v7, %v1491_v49 }
 0xbf8   :  { %v1496_v26 = vsel %vm1495_vm13, %v2616_v7, %v1492_v53 }
 0xbf9   :  { %v1501_v29 = vsel %vm1498_vm14, %v1500_v51, %v1496_v26 }
 0xbfa   :  { %2473 = vmatmul.msk.f32.vlgmr.msrb.gmra.mxu1 %vm274_vm9, %v1665_v28  ;;  %v1502_v54 = vmul.f32 %v3297_v62, %v1501_v29 }
 0xbfc   :  { %2468 = vmatmul.msk.f32.vlgmr.msra.gmra.mxu2 %vm274_vm9, %v1502_v54 }
 0xc04   :  { %2475 = vmatmul.msk.f32.vlgmr.msrb.gmra.mxu2 %vm274_vm9, %v1693_v19 }
 0xc29   :  { %v1448_v30 = vpop.xlane.xlu2 %1447 }
 0xc2a   :  { %2617 = vrcp.f32 %v1448_v30  ;;  %v1469_v58 = vand.u32 2147483648, %v1448_v30  ;;  %v1467_v50 = vand.u32 2147483647, %v1448_v30  ;;  %vm1463_vm0 = vweird.f32 %v1448_v30 }
 0xc2c   :  { %v1470_v45 = vor.u32 1.1754944e-38, %v1469_v58  ;;  %vm1468_vm3 = vcmp.eq.f32.partialorder %v1467_v50, 8.507059e+37 }
 0xc30   :  { %v2618_v55 = vpop.eup %2617 }
 0xc31   :  { %v1459_v56 = vmul.f32 %v2618_v55, %v1448_v30  ;;  %vm1464_vm15 = vweird.f32 %v2618_v55 }
 0xc32   :  { %vm1465_vm2 = vmor %vm1463_vm0, %vm1464_vm15 }
 0xc33   :  { %v1460_v57 = vsub.f32 1.0, %v1459_v56 }
 0xc35   :  { %v1461_v59 = vmul.f32 %v2618_v55, %v1460_v57 }
 0xc37   :  { %v1462_v60 = vadd.f32 %v2618_v55, %v1461_v59 }
 0xc39   :  { %v1466_v33 = vsel %vm1465_vm2, %v2618_v55, %v1462_v60 }
 0xc3a   :  { %v1471_v62 = vsel %vm1468_vm3, %v1470_v45, %v1466_v33 }
 0xc3b   :  { %v1472_v47 = vmul.f32 %v3310_v0, %v1471_v62 }
 0xc3d   :  { %2466 = vmatmul.msk.f32.vlgmr.msra.gmra.mxu0 %vm274_vm9, %v1472_v47 }
 0xc45   :  { %2471 = vmatmul.msk.f32.vlgmr.msrb.gmra.mxu0 %vm274_vm9, %v3277_v39 }
 0xc66   :  { %v1619_v48 = vpop.f32.mrf.mxu3 }
 0xc6e   :  { %v1745_v63 = vpop.f32.mrf.mxu3 }
 0xc6f   :  { %v1751_v1 = vmul.f32 0.35355338, %v1745_v63  ;;  %v1567_v2 = vpop.f32.mrf.mxu1 }
 0xc71   :  { %v1755_v3 = vadd.f32 %v1751_v1, %v3034_v8 }
 0xc73   :  { %v1765_v38 = vsel %vm274_vm9, %v1755_v3, -inf }
 0xc74   :  { %1766 = vmax.xlane.f32.xlu0 %v1765_v38 }
 0xc77   :  { %v1689_v4 = vpop.f32.mrf.mxu1 }
 0xc78   :  { %v1749_v5 = vmul.f32 0.35355338, %v1689_v4 }
 0xc7a   :  { %v1753_v9 = vadd.f32 %v1749_v5, %v3034_v8 }
 0xc7c   :  { %v1759_v0 = vsel %vm274_vm9, %v1753_v9, -inf }
 0xc7d   :  { %1760 = vmax.xlane.f32.xlu2 %v1759_v0 }
 0xc7f   :  { %v1593_v11 = vpop.f32.mrf.mxu2 }
 0xc87   :  { %v1717_v12 = vpop.f32.mrf.mxu2 }
 0xc88   :  { %v1750_v61 = vmul.f32 0.35355338, %v1717_v12 }
 0xc8a   :  { %v1754_v6 = vadd.f32 %v1750_v61, %v3034_v8 }
 0xc8c   :  { %v1762_v13 = vsel %vm274_vm9, %v1754_v6, -inf }
 0xc8d   :  { %1763 = vmax.xlane.f32.xlu1 %v1762_v13 }
 0xcba   :  { %v3334_v14 = vpop.f32.mrf.mxu0 }
 0xcc2   :  { %v1661_v16 = vpop.f32.mrf.mxu0 }
 0xcc3   :  { %v1748_v17 = vmul.f32 0.35355338, %v1661_v16 }
 0xcc5   :  { %v1752_v18 = vadd.f32 %v1748_v17, %v3034_v8 }
 0xcc7   :  { %v1756_v19 = vsel %vm274_vm9, %v1752_v18, -inf }
 0xcc8   :  { %1757 = vmax.xlane.f32.xlu2 %v1756_v19 }
 0xce7   :  { %v1767_v20 = vpop.xlane.xlu0 %1766 }
 0xce8   :  { %v1771_v21 = vsub.f32 %v1755_v3, %v1767_v20  ;;  %v2485_v20 = vld [vmem:[%s3541_s9 + $0x38] sm:$0xff] }
 0xcea   :  { %v1778_v22 = vmul.f32 1.442695, %v1771_v21  ;;  %v2484_v21 = vld [vmem:[%s3541_s9 + $0x30] sm:$0xff] }
 0xcec   :  { %2619 = vpow2.f32 %v1778_v22  ;;  %v2483_v22 = vld [vmem:[%s3541_s9 + $0x28] sm:$0xff] }
 0xcf0   :  { %v1761_v23 = vpop.xlane.xlu2 %1760 }
 0xcf1   :  { %v1769_v25 = vsub.f32 %v1753_v9, %v1761_v23  ;;  %v2482_v23 = vld [vmem:[%s3541_s9 + $0x20] sm:$0xff]  ;;  %s3593_s9 = sld [smem:[#allocation18_spill]] }
 0xcf2   :  { %v2620_v27 = vpop.eup %2619 }
 0xcf3   :  { %v1774_v28 = vmul.f32 1.442695, %v1769_v25  ;;  %v1789_v31 = vsel %vm274_vm9, %v2620_v27, 0.0 }
 0xcf4   :  { %1790 = vadd.xlane.f32.xlu2 %v1789_v31 }
 0xcf5   :  { %2621 = vpow2.f32 %v1774_v28 }
 0xcfb   :  { %v2622_v34 = vpop.eup %2621 }
 0xcfc   :  { %v1783_v35 = vsel %vm274_vm9, %v2622_v34, 0.0 }
 0xcfd   :  { %1784 = vadd.xlane.f32.xlu0 %v1783_v35 }
 0xd00   :  { %v1764_v8 = vpop.xlane.xlu1 %1763 }
 0xd01   :  { %v1770_v36 = vsub.f32 %v1754_v6, %v1764_v8 }
 0xd03   :  { %v1776_v37 = vmul.f32 1.442695, %v1770_v36 }
 0xd05   :  { %2623 = vpow2.f32 %v1776_v37 }
 0xd0b   :  { %v3340_v7 = vpop.eup %2623 }
 0xd0c   :  { %1930 = vrot.lane.b32.xlu2 %v3277_v39, %s2700_s25  ;;  %v1786_v41 = vsel %vm274_vm9, %v3340_v7, 0.0 }
 0xd0d   :  { %1787 = vadd.xlane.f32.xlu1 %v1786_v41 }
 0xd11   :  { %1878 = vrot.lane.b32.xlu0 %v3277_v39, %s3590_s1 }
 0xd14   :  { %1623 = vrot.lane.b32.xlu2 %v1567_v2, %s2704_s4 }
 0xd19   :  { %1852 = vrot.lane.b32.xlu0 %v3277_v39, %s3589_s29 }
 0xd1c   :  { %1631 = vrot.lane.b32.xlu2 %v1619_v48, %s2702_s19 }
 0xd21   :  { %1627 = vrot.lane.b32.xlu0 %v1593_v11, %s2703_s21 }
 0xd26   :  { %1904 = vrot.lane.b32.xlu1 %v3277_v39, %s3588_s8 }
 0xd3b   :  { %v1758_v40 = vpop.xlane.xlu2 %1757 }
 0xd3c   :  { %v1768_v42 = vsub.f32 %v1752_v18, %v1758_v40 }
 0xd3e   :  { %v1772_v43 = vmul.f32 1.442695, %v1768_v42 }
 0xd40   :  { %2625 = vpow2.f32 %v1772_v43 }
 0xd46   :  { %v3355_v44 = vpop.eup %2625 }
 0xd47   :  { %v1780_v46 = vsel %vm274_vm9, %v3355_v44, 0.0 }
 0xd50   :  { %1781 = vadd.xlane.f32.xlu1 %v1780_v46 }
 0xd67   :  { %v1791_v10 = vpop.xlane.xlu2 %1790 }
 0xd68   :  { %2627 = vrcp.f32 %v1791_v10  ;;  %v1848_v39 = vand.u32 2147483648, %v1791_v10  ;;  %v1846_v54 = vand.u32 2147483647, %v1791_v10  ;;  %vm1842_vm7 = vweird.f32 %v1791_v10 }
 0xd6a   :  { %v1849_v55 = vor.u32 1.1754944e-38, %v1848_v39  ;;  %vm1847_vm10 = vcmp.eq.f32.partialorder %v1846_v54, 8.507059e+37 }
 0xd6e   :  { %v2628_v49 = vpop.eup %2627 }
 0xd6f   :  { %v1838_v52 = vmul.f32 %v2628_v49, %v1791_v10  ;;  %v1931_v53 = vpop.permute.xlu2 %1930  ;;  %vm1843_vm4 = vweird.f32 %v2628_v49 }
 0xd70   :  { %v1785_v51 = vpop.xlane.xlu0 %1784  ;;  %1951 = vmatpush.msrb.mxu3 %v1931_v53  ;;  %vm1844_vm8 = vmor %vm1842_vm7, %vm1843_vm4 }
 0xd71   :  { %v1839_v26 = vsub.f32 1.0, %v1838_v52  ;;  %2629 = vrcp.f32 %v1785_v51  ;;  %v1818_v45 = vand.u32 2147483648, %v1785_v51  ;;  %v1816_v62 = vand.u32 2147483647, %v1785_v51 }
 0xd72   :  { %vm1812_vm13 = vweird.f32 %v1785_v51 }
 0xd73   :  { %v1840_v29 = vmul.f32 %v2628_v49, %v1839_v26  ;;  %v1819_v48 = vor.u32 1.1754944e-38, %v1818_v45  ;;  %vm1817_vm15 = vcmp.eq.f32.partialorder %v1816_v62, 8.507059e+37 }
 0xd75   :  { %v1841_v30 = vadd.f32 %v2628_v49, %v1840_v29 }
 0xd77   :  { %v2630_v56 = vpop.eup %2629  ;;  %v1845_v57 = vsel %vm1844_vm8, %v2628_v49, %v1841_v30 }
 0xd78   :  { %v1850_v58 = vsel %vm1847_vm10, %v1849_v55, %v1845_v57  ;;  %v1808_v59 = vmul.f32 %v2630_v56, %v1785_v51  ;;  %vm1813_vm12 = vweird.f32 %v2630_v56 }
 0xd79   :  { %v1851_v50 = vmul.f32 %v2620_v27, %v1850_v58  ;;  %vm1814_vm14 = vmor %vm1812_vm13, %vm1813_vm12 }
 0xd7a   :  { %v1809_v60 = vsub.f32 1.0, %v1808_v59 }
 0xd7b   :  { %2481 = vmatmul.msk.f32.vlgmr.msrb.gmra.mxu3 %vm274_vm9, %v1851_v50 }
 0xd7c   :  { %v1810_v33 = vmul.f32 %v2630_v56, %v1809_v60 }
 0xd7e   :  { %v1811_v47 = vadd.f32 %v2630_v56, %v1810_v33 }
 0xd80   :  { %v1815_v63 = vsel %vm1814_vm14, %v2630_v56, %v1811_v47  ;;  %v1788_v1 = vpop.xlane.xlu1 %1787 }
 0xd81   :  { %v1820_v2 = vsel %vm1817_vm15, %v1819_v48, %v1815_v63  ;;  %2631 = vrcp.f32 %v1788_v1  ;;  %v1833_v61 = vand.u32 2147483648, %v1788_v1  ;;  %vm1827_vm2 = vweird.f32 %v1788_v1 }
 0xd82   :  { %v1821_v3 = vmul.f32 %v2622_v34, %v1820_v2  ;;  %v1831_v6 = vand.u32 2147483647, %v1788_v1  ;;  %v2494_v2 = vld [vmem:[%s3545_s13 + $0x38] sm:$0xff] }
 0xd83   :  { %v1879_v38 = vpop.permute.xlu0 %1878  ;;  %v1834_v16 = vor.u32 1.1754944e-38, %v1833_v61 }
 0xd84   :  { %1899 = vmatpush.msra.mxu1 %v1879_v38  ;;  %vm1832_vm4 = vcmp.eq.f32.partialorder %v1831_v6, 8.507059e+37  ;;  %v2492_v38 = vld [vmem:[%s3545_s13 + $0x28] sm:$0xff] }
 0xd85   :  { %2479 = vmatmul.msk.f32.vlgmr.msra.gmra.mxu1 %vm274_vm9, %v1821_v3  ;;  %v2493_v3 = vld [vmem:[%s3545_s13 + $0x30] sm:$0xff] }
 0xd86   :  { %2098 = vmatpush.msrb.mxu1 %v2494_v2 }
 0xd87   :  { %v2632_v4 = vpop.eup %2631 }
 0xd88   :  { %v1823_v5 = vmul.f32 %v2632_v4, %v1788_v1  ;;  %vm1828_vm0 = vweird.f32 %v2632_v4  ;;  %2099 = vmatpush.msrb.mxu1 %v2493_v3 }
 0xd89   :  { %vm1829_vm3 = vmor %vm1827_vm2, %vm1828_vm0 }
 0xd8a   :  { %v1824_v9 = vsub.f32 1.0, %v1823_v5  ;;  %2100 = vmatpush.msrb.mxu1 %v2492_v38 }
 0xd8b   :  { %v1853_v0 = vpop.permute.xlu0 %1852 }
 0xd8c   :  { %v1825_v11 = vmul.f32 %v2632_v4, %v1824_v9  ;;  %1873 = vmatpush.msra.mxu0 %v1853_v0 }
 0xd8e   :  { %v1826_v12 = vadd.f32 %v2632_v4, %v1825_v11  ;;  %1999 = vmatpush.msrb.mxu0 %v2485_v20 }
 0xd90   :  { %v1830_v13 = vsel %vm1829_vm3, %v2632_v4, %v1826_v12  ;;  %2000 = vmatpush.msrb.mxu0 %v2484_v21 }
 0xd91   :  { %v1835_v17 = vsel %vm1832_vm4, %v1834_v16, %v1830_v13  ;;  %v3414_v16 = vld [vmem:[%s3543_s11 + $0x1] ss:$0 sm:$0xff] }
 0xd92   :  { %v1836_v19 = vmul.f32 %v3340_v7, %v1835_v17  ;;  %2001 = vmatpush.msrb.mxu0 %v2483_v22  ;;  %v1624_v7 = vpop.permute.xlu2 %1623 }
 0xd93   :  { %v1628_v43 = vpop.permute.xlu0 %1627  ;;  %v1634_v46 = vsel %vm274_vm9, %v3334_v14, %v1624_v7  ;;  %v2544_v14 = vld [vmem:[%s3542_s10 + $0x1] ss:$0 sm:$0xff] }
 0xd94   :  { %2002 = vmatpush.msrb.mxu0 %v2482_v23  ;;  %v1635_v10 = vsel %vm605_vm5, %v1634_v46, %v1628_v43 }
 0xd98   :  { %v1905_v18 = vpop.permute.xlu1 %1904 }
 0xd99   :  { %1925 = vmatpush.msra.mxu2 %v1905_v18 }
 0xd9a   :  { %2480 = vmatmul.msk.f32.vlgmr.msra.gmra.mxu2 %vm274_vm9, %v1836_v19  ;;  %v1632_v49 = vpop.permute.xlu2 %1631  ;;  %v3419_v19 = vld [vmem:[%s3544_s12 + $0x1] ss:$0 sm:$0xff] }
 0xd9b   :  { %v1636_v52 = vsel %vm607_vm6, %v1635_v10, %v1632_v49  ;;  %v2506_v10 = vld [vmem:[%s3547_s15 + $0x70] sm:$0xff] }
 0xdc3   :  { %v1782_v25 = vpop.xlane.xlu1 %1781 }
 0xdc4   :  { %2633 = vrcp.f32 %v1782_v25  ;;  %v1803_v34 = vand.u32 2147483648, %v1782_v25  ;;  %v1801_v8 = vand.u32 2147483647, %v1782_v25  ;;  %vm1797_vm8 = vweird.f32 %v1782_v25 }
 0xdc6   :  { %v1804_v37 = vor.u32 1.1754944e-38, %v1803_v34  ;;  %vm1802_vm12 = vcmp.eq.f32.partialorder %v1801_v8, 8.507059e+37 }
 0xdca   :  { %v2634_v27 = vpop.eup %2633 }
 0xdcb   :  { %v1793_v28 = vmul.f32 %v2634_v27, %v1782_v25  ;;  %vm1798_vm7 = vweird.f32 %v2634_v27 }
 0xdcc   :  { %vm1799_vm10 = vmor %vm1797_vm8, %vm1798_vm7 }
 0xdcd   :  { %v1794_v31 = vsub.f32 1.0, %v1793_v28 }
 0xdcf   :  { %v1795_v35 = vmul.f32 %v2634_v27, %v1794_v31  ;;  %v3432_v31 = vld [vmem:[%s3546_s14 + $0x1] ss:$0 sm:$0xff] }
 0xdd1   :  { %v1796_v36 = vadd.f32 %v2634_v27, %v1795_v35 }
 0xdd3   :  { %v1800_v41 = vsel %vm1799_vm10, %v2634_v27, %v1796_v36 }
 0xdd4   :  { %v1805_v40 = vsel %vm1802_vm12, %v1804_v37, %v1800_v41 }
 0xdd5   :  { %v1806_v42 = vmul.f32 %v3355_v44, %v1805_v40  ;;  %v2507_v40 = vld [vmem:[%s3547_s15 + $0x78] sm:$0xff] }
 0xdd6   :  { %2225 = vmatpush.msrb.mxu2 %v2507_v40 }
 0xdd7   :  { %2478 = vmatmul.msk.f32.vlgmr.msra.gmra.mxu0 %vm274_vm9, %v1806_v42 }
 0xdd8   :  { %2226 = vmatpush.msrb.mxu2 %v2506_v10 }
 0xddf   :  { %2487 = vmatmul.msk.f32.vlgmr.msrb.gmra.mxu0 %vm164_vm1, %v1636_v52 }
 0xdfe   :  { %v1953_v51 = vpop.f32.mrf.mxu3 }
 0xe02   :  { %v1901_v53 = vpop.f32.mrf.mxu1 }
 0xe03   :  { %1957 = vrot.lane.b32.xlu0 %v1901_v53, %s2704_s4  ;;  %v2505_v53 = vld [vmem:[%s3547_s15 + $0x68] sm:$0xff] }
 0xe04   :  { %2227 = vmatpush.msrb.mxu2 %v2505_v53 }
 0xe0b   :  { %1965 = vrot.lane.b32.xlu0 %v1953_v51, %s2702_s19  ;;  %s3594_s19 = sld [smem:[#allocation20_spill]] }
 0xe1d   :  { %v1927_v44 = vpop.f32.mrf.mxu2 }
 0xe1e   :  { %1961 = vrot.lane.b32.xlu2 %v1927_v44, %s2703_s21  ;;  %s2705_s21 = smov [#allocation6]  }
 0xe54   :  { %v1875_v26 = vpop.f32.mrf.mxu0 }
 0xe5c   :  { %v2004_v39 = vpop.f32.mrf.mxu0 }
 0xe5d   :  { %v2005_v29 = vadd.f32 %v2544_v14, %v2004_v39 }
 0xe5f   :  { %v2010_v54 = vadd.f32 %v2005_v29, %v3220_v15  ;;  %v2503_v29 = vld [vmem:[%s3547_s15 + $0x58] sm:$0xff] }
 0xe61   :  { %v2016_v30 = vsel %vm164_vm1, %v2010_v54, 0.0 }
 0xe62   :  { %2017 = vadd.xlane.f32.xlu2 %v2016_v30 }
 0xe75   :  { %v1958_v55 = vpop.permute.xlu0 %1957 }
 0xe76   :  { %v1968_v57 = vsel %vm274_vm9, %v1875_v26, %v1958_v55  ;;  %v2504_v26 = vld [vmem:[%s3547_s15 + $0x60] sm:$0xff] }
 0xe77   :  { %2228 = vmatpush.msrb.mxu2 %v2504_v26 }
 0xe78   :  { %v1962_v56 = vpop.permute.xlu2 %1961 }
 0xe79   :  { %v1969_v58 = vsel %vm605_vm5, %v1968_v57, %v1962_v56  ;;  %2229 = vmatpush.msrb.mxu2 %v2503_v29  ;;  %v2502_v56 = vld [vmem:[%s3547_s15 + $0x50] sm:$0xff] }
 0xe7b   :  { %2230 = vmatpush.msrb.mxu2 %v2502_v56 }
 0xe7d   :  { %v1966_v59 = vpop.permute.xlu0 %1965 }
 0xe7e   :  { %v1970_v50 = vsel %vm607_vm6, %v1969_v58, %v1966_v59 }
 0xe7f   :  { %2488 = vmatmul.msk.f32.gmra.mxu0 %vm164_vm1, %v1970_v50  ;;  %v2501_v50 = vld [vmem:[%s3547_s15 + $0x48] sm:$0xff] }
 0xe80   :  { %2231 = vmatpush.msrb.mxu2 %v2501_v50 }
 0xed5   :  { %v2018_v60 = vpop.xlane.xlu2 %2017 }
 0xed6   :  { %v2022_v45 = vmul.f32 %v2018_v60, %v2901_v32  ;;  %v2500_v60 = vld [vmem:[%s3547_s15 + $0x40] sm:$0xff]  ;;  %s2374_s15 = sshll.u32 %s2705_s21, 4  ;;  %s2375_s15 = int_to_ptr.vmem [resolvable:$true] %s2374_s15 }
 0xed7   :  { %2232 = vmatpush.msrb.mxu2 %v2500_v60 }
 0xed8   :  { %v2024_v33 = vsub.f32 %v2010_v54, %v2022_v45 }
 0xeda   :  { %v2026_v62 = vmul.f32 %v2024_v33, %v2024_v33 }
 0xedc   :  { %v2028_v15 = vsel %vm164_vm1, %v2026_v62, 0.0 }
 0xedd   :  { %2029 = vadd.xlane.f32.xlu1 %v2028_v15 }
 0xefc   :  { %v2007_v47 = vpop.f32.mrf.mxu0 }
 0xefd   :  { %v2008_v48 = vadd.f32 %v2544_v14, %v2007_v47 }
 0xeff   :  { %v2011_v63 = vadd.f32 %v2008_v48, %v3265_v24  ;;  %v2491_v24 = vld [vmem:[%s3545_s13 + $0x20] sm:$0xff] }
 0xf00   :  { %2101 = vmatpush.msrb.mxu1 %v2491_v24 }
 0xf01   :  { %v2019_v1 = vsel %vm164_vm1, %v2011_v63, 0.0 }
 0xf02   :  { %2020 = vadd.xlane.f32.xlu0 %v2019_v1 }
 0xf50   :  { %v2030_v4 = vpop.xlane.xlu1 %2029 }
 0xf51   :  { %v2034_v5 = vmul.f32 %v2030_v4, %v2901_v32 }
 0xf53   :  { %v2036_v9 = vadd.f32 1e-12, %v2034_v5 }
 0xf55   :  { %2635 = vrsqrt.f32 %v2036_v9  ;;  %vm2044_vm5 = vweird.f32 %v2036_v9 }
 0xf5b   :  { %v2636_v0 = vpop.eup %2635 }
 0xf5c   :  { %v2039_v11 = vmul.f32 %v2636_v0, %v2036_v9  ;;  %vm2045_vm9 = vweird.f32 %v2636_v0 }
 0xf5d   :  { %vm2046_vm6 = vmor %vm2044_vm5, %vm2045_vm9 }
 0xf5e   :  { %v2040_v12 = vmul.f32 %v2636_v0, %v2039_v11 }
 0xf60   :  { %v2041_v61 = vmul.f32 0.5, %v2040_v12 }
 0xf62   :  { %v2042_v6 = vsub.f32 1.5, %v2041_v61 }
 0xf64   :  { %v2043_v13 = vmul.f32 %v2636_v0, %v2042_v6 }
 0xf66   :  { %v2047_v17 = vsel %vm2046_vm6, %v2636_v0, %v2043_v13 }
 0xf67   :  { %v2058_v18 = vmul.f32 %v2047_v17, %v2024_v33 }
 0xf69   :  { %v2063_v20 = vmul.f32 %v3414_v16, %v2058_v18 }
 0xf6b   :  { %v3423_v21 = vadd.f32 %v3419_v19, %v2063_v20 }
 0xf6d   :  { %2496 = vmatmul.msk.f32.vlgmr.msrb.gmra.mxu1 %vm164_vm1, %v3423_v21 }
 0xf75   :  { %v2021_v22 = vpop.xlane.xlu0 %2020 }
 0xf76   :  { %v2023_v23 = vmul.f32 %v2021_v22, %v2901_v32 }
 0xf78   :  { %v2025_v25 = vsub.f32 %v2011_v63, %v2023_v23 }
 0xf7a   :  { %v2027_v27 = vmul.f32 %v2025_v25, %v2025_v25 }
 0xf7c   :  { %v2031_v28 = vsel %vm164_vm1, %v2027_v27, 0.0 }
 0xf7d   :  { %2032 = vadd.xlane.f32.xlu1 %v2031_v28 }
 0xfea   :  { %v2103_v34 = vpop.f32.mrf.mxu1 }
 0xfeb   :  { %v3435_v35 = vadd.f32 %v3432_v31, %v2103_v34 }
 0xfed   :  { %v3438_v8 = vmul.f32 0.70710677, %v3435_v35  ;;  %v2109_v27 = vmul.f32 0.5, %v3435_v35 }
 0xfef   :  { %v2113_v36 = vmul.f32 %v3438_v8, %v3438_v8 }
 0xff0   :  { %v2033_v37 = vpop.xlane.xlu1 %2032 }
 0xff1   :  { %v2114_v7 = vmin.f32 %v2113_v36, 16.0  ;;  %v2035_v41 = vmul.f32 %v2033_v37, %v2901_v32 }
 0xff3   :  { %v2115_v42 = vmul.f32 2.1237322e-06, %v2114_v7  ;;  %v2126_v43 = vmul.f32 3.8918573e-05, %v2114_v7  ;;  %v2037_v46 = vadd.f32 1e-12, %v2035_v41 }
 0xff5   :  { %v2116_v49 = vadd.f32 0.00028619796, %v2115_v42  ;;  %v2127_v52 = vadd.f32 0.001143296, %v2126_v43  ;;  %2637 = vrsqrt.f32 %v2037_v46  ;;  %vm2054_vm14 = vweird.f32 %v2037_v46 }
 0xff7   :  { %v2117_v51 = vmul.f32 %v2116_v49, %v2114_v7  ;;  %v2128_v44 = vmul.f32 %v2127_v52, %v2114_v7 }
 0xff9   :  { %v2129_v14 = vadd.f32 0.014752088, %v2128_v44  ;;  %v2118_v39 = vadd.f32 0.0036580483, %v2117_v51 }
 0xffb   :  { %v2638_v54 = vpop.eup %2637  ;;  %v2130_v30 = vmul.f32 %v2129_v14, %v2114_v7  ;;  %v2119_v58 = vmul.f32 %v2118_v39, %v2114_v7 }
 0xffc   :  { %v2049_v55 = vmul.f32 %v2638_v54, %v2037_v46  ;;  %vm2055_vm13 = vweird.f32 %v2638_v54 }
 0xffd   :  { %v2131_v57 = vadd.f32 0.112945676, %v2130_v30  ;;  %v2120_v15 = vadd.f32 0.05243302, %v2119_v58  ;;  %vm2056_vm15 = vmor %vm2054_vm14, %vm2055_vm13 }
 0xffe   :  { %v2050_v59 = vmul.f32 %v2638_v54, %v2049_v55 }
 0xfff   :  { %v2132_v45 = vmul.f32 %v2131_v57, %v2114_v7  ;;  %v2121_v2 = vmul.f32 %v2120_v15, %v2114_v7 }
0x1000   :  { %v2051_v33 = vmul.f32 0.5, %v2050_v59 }
0x1001   :  { %v2133_v62 = vadd.f32 0.4994258, %v2132_v45  ;;  %v2122_v24 = vadd.f32 0.18741608, %v2121_v2 }
0x1002   :  { %v2052_v47 = vsub.f32 1.5, %v2051_v33 }
0x1003   :  { %v2134_v48 = vmul.f32 %v2133_v62, %v2114_v7  ;;  %v2123_v0 = vmul.f32 %v2122_v24, %v2114_v7 }
0x1004   :  { %v2053_v63 = vmul.f32 %v2638_v54, %v2052_v47 }
0x1005   :  { %v2135_v1 = vadd.f32 1.0, %v2134_v48  ;;  %v2124_v6 = vadd.f32 1.1283791, %v2123_v0 }
0x1006   :  { %v2057_v3 = vsel %vm2056_vm15, %v2638_v54, %v2053_v63  ;;  %vm2303_vm15 = vcmask 1040384  }
0x1007   :  { %2639 = vrcp.f32 %v2135_v1  ;;  %v2059_v38 = vmul.f32 %v2057_v3, %v2025_v25  ;;  %v2147_v61 = vand.u32 2147483648, %v2135_v1  ;;  %v2145_v17 = vand.u32 2147483647, %v2135_v1 }
0x1008   :  { %vm2141_vm2 = vweird.f32 %v2135_v1 }
0x1009   :  { %v2064_v4 = vmul.f32 %v3414_v16, %v2059_v38  ;;  %v2148_v20 = vor.u32 1.1754944e-38, %v2147_v61  ;;  %v2125_v16 = vmul.f32 %v2124_v6, %v3438_v8  ;;  %vm2146_vm4 = vcmp.eq.f32.partialorder %v2145_v17, 8.507059e+37 }
0x100b   :  { %v3469_v5 = vadd.f32 %v3419_v19, %v2064_v4  ;;  %v2548_v4 = vld [vmem:[%s3548_s16 + $0x1] ss:$0 sm:$0xff] }
0x100d   :  { %v2640_v9 = vpop.eup %2639  ;;  %2497 = vmatmul.msk.f32.gmra.mxu1 %vm164_vm1, %v3469_v5 }
0x100e   :  { %v2137_v11 = vmul.f32 %v2640_v9, %v2135_v1  ;;  %vm2142_vm0 = vweird.f32 %v2640_v9 }
0x100f   :  { %vm2143_vm3 = vmor %vm2141_vm2, %vm2142_vm0 }
0x1010   :  { %v2138_v12 = vsub.f32 1.0, %v2137_v11 }
0x1012   :  { %v2139_v13 = vmul.f32 %v2640_v9, %v2138_v12 }
0x1014   :  { %v2140_v18 = vadd.f32 %v2640_v9, %v2139_v13 }
0x1016   :  { %v2144_v19 = vsel %vm2143_vm3, %v2640_v9, %v2140_v18 }
0x1017   :  { %v2149_v22 = vsel %vm2146_vm4, %v2148_v20, %v2144_v19 }
0x1018   :  { %v2150_v23 = vmul.f32 %v2149_v22, %v2125_v16 }
0x101a   :  { %v2498_v25 = vclamps-f32 %v2150_v23, 1.0 }
0x101c   :  { %v2193_v28 = vadd.f32 1.0, %v2498_v25 }
0x101e   :  { %v2195_v34 = vmul.f32 %v2193_v28, %v2109_v27 }
0x1020   :  { %2509 = vmatmul.msk.f32.vlgmr.msrb.gmra.mxu2 %vm1176_vm11, %v2195_v34 }
0x108a   :  { %v2106_v36 = vpop.f32.mrf.mxu1 }
0x108b   :  { %v2107_v37 = vadd.f32 %v3432_v31, %v2106_v36  ;;  %v2307_v36 = vld [vmem:[%s3591_s6 + $0x10] sm:$0xff] }
0x108d   :  { %v2112_v7 = vmul.f32 0.70710677, %v2107_v37  ;;  %v2110_v2 = vmul.f32 0.5, %v2107_v37  ;;  %v2306_v37 = vld [vmem:[%s3591_s6 + $0x8] sm:$0xff] }
0x108f   :  { %v2153_v41 = vmul.f32 %v2112_v7, %v2112_v7 }
0x1091   :  { %v2154_v40 = vmin.f32 %v2153_v41, 16.0  ;;  %v2305_v41 = vld [vmem:[%s3591_s6] sm:$0xff] }
0x1093   :  { %v2155_v42 = vmul.f32 2.1237322e-06, %v2154_v40  ;;  %v2166_v43 = vmul.f32 3.8918573e-05, %v2154_v40 }
0x1095   :  { %v2156_v8 = vadd.f32 0.00028619796, %v2155_v42  ;;  %v2167_v46 = vadd.f32 0.001143296, %v2166_v43 }
0x1097   :  { %v2157_v10 = vmul.f32 %v2156_v8, %v2154_v40  ;;  %v2168_v49 = vmul.f32 %v2167_v46, %v2154_v40 }
0x1099   :  { %v2169_v52 = vadd.f32 0.014752088, %v2168_v49  ;;  %v2158_v53 = vadd.f32 0.0036580483, %v2157_v10 }
0x109b   :  { %v2170_v51 = vmul.f32 %v2169_v52, %v2154_v40  ;;  %v2159_v44 = vmul.f32 %v2158_v53, %v2154_v40 }
0x109d   :  { %v2171_v35 = vadd.f32 0.112945676, %v2170_v51  ;;  %v2160_v39 = vadd.f32 0.05243302, %v2159_v44 }
0x109f   :  { %v2172_v26 = vmul.f32 %v2171_v35, %v2154_v40  ;;  %v2161_v31 = vmul.f32 %v2160_v39, %v2154_v40 }
0x10a1   :  { %v2173_v14 = vadd.f32 0.4994258, %v2172_v26  ;;  %v2162_v30 = vadd.f32 0.18741608, %v2161_v31  ;;  %v2550_v31 = vld [vmem:[%s3550_s18 + $0x1] ss:$0 sm:$0xff] }
0x10a3   :  { %v2174_v29 = vmul.f32 %v2173_v14, %v2154_v40  ;;  %v2163_v56 = vmul.f32 %v2162_v30, %v2154_v40  ;;  %v2234_v24 = vpop.f32.mrf.mxu2  ;;  %v2549_v14 = vld [vmem:[%s3549_s17 + $0x1] ss:$0 sm:$0xff] }
0x10a4   :  { %v2235_v12 = vadd.f32 %v2548_v4, %v2234_v24 }
0x10a5   :  { %v2175_v54 = vadd.f32 1.0, %v2174_v29  ;;  %v2164_v50 = vadd.f32 1.1283791, %v2163_v56 }
0x10a6   :  { %v2240_v6 = vadd.f32 %v2235_v12, %v3423_v21  ;;  %v2308_v21 = vld [vmem:[%s3591_s6 + $0x18] sm:$0xff]  ;;  %s2376_s6 = sshll.u32 %s3595_s27, 4  ;;  %s2377_s6 = int_to_ptr.hbm [resolvable:$true] %s2376_s6 }
0x10a7   :  { %2641 = vrcp.f32 %v2175_v54  ;;  %v2187_v59 = vand.u32 2147483648, %v2175_v54  ;;  %v2185_v45 = vand.u32 2147483647, %v2175_v54  ;;  %vm2181_vm8 = vweird.f32 %v2175_v54  ;;  %2328 = vmatpush.msra.mxu3 %v2308_v21 }
0x10a8   :  { %v2165_v15 = vmul.f32 %v2164_v50, %v2112_v7  ;;  %v2246_v13 = vsel %vm164_vm1, %v2240_v6, 0.0 }
0x10a9   :  { %v2188_v62 = vor.u32 1.1754944e-38, %v2187_v59  ;;  %vm2186_vm12 = vcmp.eq.f32.partialorder %v2185_v45, 8.507059e+37  ;;  %2329 = vmatpush.msra.mxu3 %v2307_v36  ;;  %v2340_v45 = vld [vmem:[%s3592_s7 + $0x18] sm:$0xff] }
0x10ab   :  { %2330 = vmatpush.msra.mxu3 %v2306_v37 }
0x10ad   :  { %v2642_v55 = vpop.eup %2641  ;;  %2331 = vmatpush.msra.mxu3 %v2305_v41 }
0x10ae   :  { %v2177_v57 = vmul.f32 %v2642_v55, %v2175_v54  ;;  %vm2182_vm7 = vweird.f32 %v2642_v55 }
0x10af   :  { %vm2183_vm10 = vmor %vm2181_vm8, %vm2182_vm7  ;;  %2360 = vmatpush.msrb.mxu3 %v2340_v45 }
0x10b0   :  { %v2178_v58 = vsub.f32 1.0, %v2177_v57 }
0x10b2   :  { %v2179_v60 = vmul.f32 %v2642_v55, %v2178_v58 }
0x10b4   :  { %v2180_v33 = vadd.f32 %v2642_v55, %v2179_v60 }
0x10b6   :  { %v2184_v47 = vsel %vm2183_vm10, %v2642_v55, %v2180_v33  ;;  %v2339_v33 = vld [vmem:[%s3592_s7 + $0x10] sm:$0xff] }
0x10b7   :  { %v2189_v48 = vsel %vm2186_vm12, %v2188_v62, %v2184_v47  ;;  %v2338_v62 = vld [vmem:[%s3592_s7 + $0x8] sm:$0xff]  ;;  %2361 = vmatpush.msrb.mxu3 %v2339_v33  ;;  %v2551_v47 = vld [vmem:[%s3593_s9] ss:$0 sm:$0xff] }
0x10b8   :  { %v2190_v63 = vmul.f32 %v2189_v48, %v2165_v15  ;;  %v2337_v15 = vld [vmem:[%s3592_s7] sm:$0xff] }
0x10b9   :  { %2362 = vmatpush.msrb.mxu3 %v2338_v62 }
0x10ba   :  { %v2499_v1 = vclamps-f32 %v2190_v63, 1.0 }
0x10bb   :  { %2363 = vmatpush.msrb.mxu3 %v2337_v15 }
0x10bc   :  { %v2194_v3 = vadd.f32 1.0, %v2499_v1 }
0x10be   :  { %v2196_v38 = vmul.f32 %v2194_v3, %v2110_v2  ;;  %v2552_v2 = vld [vmem:[%s3594_s19] ss:$0 sm:$0xff] }
0x10c0   :  { %2510 = vmatmul.msk.f32.gmra.mxu2 %vm1176_vm11, %v2196_v38 }
0x1143   :  { %v2237_v9 = vpop.f32.mrf.mxu2 }
0x1144   :  { %v2238_v0 = vadd.f32 %v2548_v4, %v2237_v9 }
0x1146   :  { %v2241_v11 = vadd.f32 %v2238_v0, %v3469_v5 }
0x1148   :  { %v2249_v61 = vsel %vm164_vm1, %v2241_v11, 0.0 }
0x1149   :  { %2250 = vadd.xlane.f32.xlu1 %v2249_v61 }
0x1151   :  { %2247 = vadd.xlane.f32.xlu1 %v2246_v13 }
0x11bc   :  { %v2251_v17 = vpop.xlane.xlu1 %2250 }
0x11bd   :  { %v2253_v18 = vmul.f32 %v2251_v17, %v2901_v32 }
0x11bf   :  { %v2255_v20 = vsub.f32 %v2241_v11, %v2253_v18 }
0x11c1   :  { %v2257_v16 = vmul.f32 %v2255_v20, %v2255_v20 }
0x11c3   :  { %v2261_v19 = vsel %vm164_vm1, %v2257_v16, 0.0 }
0x11c4   :  { %2262 = vadd.xlane.f32.xlu2 %v2261_v19  ;;  %v2248_v22 = vpop.xlane.xlu1 %2247 }
0x11c5   :  { %v2252_v5 = vmul.f32 %v2248_v22, %v2901_v32 }
0x11c7   :  { %v2254_v23 = vsub.f32 %v2240_v6, %v2252_v5 }
0x11c9   :  { %v2256_v25 = vmul.f32 %v2254_v23, %v2254_v23 }
0x11cb   :  { %v2258_v27 = vsel %vm164_vm1, %v2256_v25, 0.0 }
0x11cc   :  { %2259 = vadd.xlane.f32.xlu1 %v2258_v27 }
0x1237   :  { %v2263_v28 = vpop.xlane.xlu2 %2262 }
0x1238   :  { %v2265_v34 = vmul.f32 %v2263_v28, %v2901_v32 }
0x123a   :  { %v2267_v7 = vadd.f32 1e-12, %v2265_v34 }
0x123c   :  { %2643 = vrsqrt.f32 %v2267_v7  ;;  %vm2284_vm9 = vweird.f32 %v2267_v7 }
0x123f   :  { %v2260_v40 = vpop.xlane.xlu1 %2259 }
0x1240   :  { %v2264_v42 = vmul.f32 %v2260_v40, %v2901_v32 }
0x1242   :  { %v2644_v43 = vpop.eup %2643  ;;  %v2266_v8 = vadd.f32 1e-12, %v2264_v42 }
0x1243   :  { %v2279_v46 = vmul.f32 %v2644_v43, %v2267_v7  ;;  %vm2285_vm11 = vweird.f32 %v2644_v43 }
0x1244   :  { %2645 = vrsqrt.f32 %v2266_v8  ;;  %vm2286_vm5 = vmor %vm2284_vm9, %vm2285_vm11  ;;  %vm2274_vm13 = vweird.f32 %v2266_v8 }
0x1245   :  { %v2280_v10 = vmul.f32 %v2644_v43, %v2279_v46 }
0x1247   :  { %v2281_v49 = vmul.f32 0.5, %v2280_v10 }
0x1249   :  { %v2282_v52 = vsub.f32 1.5, %v2281_v49 }
0x124a   :  { %v2646_v53 = vpop.eup %2645 }
0x124b   :  { %v2283_v51 = vmul.f32 %v2644_v43, %v2282_v52  ;;  %v2269_v35 = vmul.f32 %v2646_v53, %v2266_v8  ;;  %vm2275_vm6 = vweird.f32 %v2646_v53 }
0x124c   :  { %vm2276_vm14 = vmor %vm2274_vm13, %vm2275_vm6 }
0x124d   :  { %v2287_v44 = vsel %vm2286_vm5, %v2644_v43, %v2283_v51  ;;  %v2270_v26 = vmul.f32 %v2646_v53, %v2269_v35 }
0x124e   :  { %v2289_v32 = vmul.f32 %v2287_v44, %v2255_v20 }
0x124f   :  { %v2271_v39 = vmul.f32 0.5, %v2270_v26 }
0x1250   :  { %v2294_v54 = vmul.f32 %v2549_v14, %v2289_v32 }
0x1251   :  { %v2272_v29 = vsub.f32 1.5, %v2271_v39 }
0x1252   :  { %v2299_v57 = vadd.f32 %v2550_v31, %v2294_v54 }
0x1253   :  { %v2273_v30 = vmul.f32 %v2646_v53, %v2272_v29 }
0x1254   :  { %v2301_v50 = vrot.slane %v2299_v57, 7 }
0x1255   :  { %v2277_v55 = vsel %vm2276_vm14, %v2646_v53, %v2273_v30 }
0x1256   :  { %v2288_v56 = vmul.f32 %v2277_v55, %v2254_v23 }
0x1258   :  { %v2293_v58 = vmul.f32 %v2549_v14, %v2288_v56 }
0x125a   :  { %v2298_v59 = vadd.f32 %v2550_v31, %v2293_v58 }
0x125c   :  { %v2304_v60 = vsel %vm2303_vm15, %v2298_v59, %v2301_v50 }
0x125d   :  { %2513 = vmatmul.msk.f32.vlgmr.msra.gmra.mxu3 %vm164_vm1, %v2304_v60 }
0x12e0   :  { %v2333_v48 = vpop.f32.mrf.mxu3 }
0x12e1   :  { %v2334_v63 = vadd.f32 %v2551_v47, %v2333_v48 }
0x12e3   :  { %2647 = vtanh.f32 %v2334_v63 }
0x12e9   :  { %v2648_v1 = vpop.eup %2647 }
0x12ea   :  { %2514 = vmatmul.msk.f32.vlgmr.msrb.gmra.mxu3 %vm164_vm1, %v2648_v1 }
0x136d   :  { %v2365_v3 = vpop.f32.mrf.mxu3 }
0x136e   :  { %v2366_v38 = vadd.f32 %v2552_v2, %v2365_v3 }
0x1370   :  { %2368 = vst [vmem:[#allocation6] sm:$0x3] %v2366_v38 }
0x1371   :  { %2379 = dma.vmem_to_hbm [thread:$0]  %s2375_s15, 32, %s2377_s6, [#allocation4]  }
0x1372   :  { %2687 = dma.done.wait [#allocation4], 32  }
0x1373   :  { %2688 = vsyncadd [#allocation4], 4294967264 }
0x1374   :  { %2384 = vsyncpa [#allocation4], 1 }
0x1375   :  { %2385 = vsyncpa [#allocation5], 1 }

</bundles_post_ra>
